<compile_context>
chip_gen: v7x
topology: tpu7x:2x2x1
jax: 0.10.0
libtpu: 0.0.40
codegen_flags: <defaults>
</compile_context>

<pallas_src>
import numpy as np
import jax
import jax.numpy as jnp
from jax.experimental import pallas as pl
from jax.experimental.pallas import tpu as pltpu


# -----------------------------------------------------------------------------
# Host-side precompute: 1-D resample matrix A (H_out, H_in) such that
#   pooled = A_h @ X @ A_w^T  per (batch, channel) plane, then fold both axes
# and the channel block-structure into one matrix R^T = kron(I_C, kron(A_h,A_w)^T)
# so pooled_flat = image_flat @ R^T in a single MXU matmul.
# -----------------------------------------------------------------------------
def make_resample_matrix(in_size: int, up: int = 7, k: int = 32) -> np.ndarray:
    up_size = in_size * up
    out_size = up_size // k            # AvgPool2d(k): stride = k, no padding
    A = np.zeros((out_size, in_size), dtype=np.float32)
    for o in range(out_size):
        for u in range(o * k, o * k + k):
            A[o, u // up] += 1.0 / k
    return A


def make_fused_resample_matrix(c: int, h: int, w: int,
                               up: int = 7, k: int = 32) -> np.ndarray:
    a_h = make_resample_matrix(h, up, k)                       # (Ho, H)
    a_w = make_resample_matrix(w, up, k)                       # (Wo, W)
    kron_t = np.kron(a_h, a_w).T.astype(np.float32)            # (H*W, Ho*Wo)
    return np.kron(np.eye(c, dtype=np.float32), kron_t)        # (C*H*W, C*Ho*Wo)


# -----------------------------------------------------------------------------
# Single fused kernel:
#   pooled   = img_flat @ R^T            (resample: upsample x7 + avgpool 32)
#   img_feat = pooled  @ W_img           (synthetic CLIP image head)
#   cos      = <normalize(img_feat), normalize(txt_emb)>
#   similarity = 1 - (100*cos)/100 = 1 - cos
#   loss     = similarity + 0.8 * mean((w_hat - w)^2)
# -----------------------------------------------------------------------------
def clip_loss_kernel(img_ref, rT_ref, wimg_ref, txt_ref, w_ref, what_ref, o_ref):
    img = img_ref[...]                                   # (N, C*H*W)
    pooled = jnp.dot(img, rT_ref[...],
                     preferred_element_type=jnp.float32)  # (N, C*Ho*Wo)
    img_feat = jnp.dot(pooled, wimg_ref[...],
                       preferred_element_type=jnp.float32)  # (N, D)

    img_nrm = img_feat * jax.lax.rsqrt(
        jnp.sum(img_feat * img_feat, axis=-1, keepdims=True) + 1e-12)
    txt = txt_ref[...]                                    # (1, D)
    txt_nrm = txt * jax.lax.rsqrt(
        jnp.sum(txt * txt, axis=-1, keepdims=True) + 1e-12)

    cos = jnp.sum(img_nrm * txt_nrm, axis=-1, keepdims=True)   # (N, 1)
    similarity = 1.0 - cos                                     # == 1 - 100*cos/100

    diff = what_ref[...] - w_ref[...]
    mse = jnp.mean(diff * diff)                                # torch MSELoss default: mean over all

    o_ref[...] = similarity + 0.8 * mse


def clip_loss_forward(image, txt_emb, w, w_hat, params):
    """Fused forward: one pallas_call, single grid step."""
    n, c, h, wd = image.shape
    img_flat = image.reshape(n, c * h * wd).astype(jnp.float32)   # (N, C*H*W)
    rT = params["resample_T"]                                     # (C*H*W, C*Ho*Wo)
    w_img = params["w_img"]                                       # (C*Ho*Wo, D)
    f_in, f_out = rT.shape
    d = w_img.shape[1]
    l = w.shape[1]

    return pl.pallas_call(
        clip_loss_kernel,
        out_shape=jax.ShapeDtypeStruct((n, 1), jnp.float32),
        grid=(1,),
        in_specs=[
            pl.BlockSpec((n, f_in), lambda i: (0, 0)),
            pl.BlockSpec((f_in, f_out), lambda i: (0, 0)),
            pl.BlockSpec((f_out, d), lambda i: (0, 0)),
            pl.BlockSpec((1, d), lambda i: (0, 0)),
            pl.BlockSpec((n, l), lambda i: (0, 0)),
            pl.BlockSpec((n, l), lambda i: (0, 0)),
        ],
        out_specs=pl.BlockSpec((n, 1), lambda i: (0, 0)),
        compiler_params=pltpu.CompilerParams(
            dimension_semantics=("arbitrary",)),
    )(img_flat, rT, w_img, txt_emb, w, w_hat)


# -----------------------------------------------------------------------------
# Hoisted text embedding (computed once per text, outside the traced forward).
# TODO(synk): clip.tokenize (BPE string tokenization) has no Pallas equivalent;
# a simple byte-level tokenization + embedding mean stands in for it here.
# -----------------------------------------------------------------------------
def embed_text(text, tok_emb):
    token_ids = jnp.asarray([ord(ch) % 256 for ch in text], dtype=jnp.int32)
    return jnp.mean(tok_emb[token_ids], axis=0, keepdims=True)      # (1, D)


if __name__ == "__main__":
    key = jax.random.PRNGKey(0)
    k_img, k_w, k_wh, k_proj, k_tok = jax.random.split(key, 5)

    # Small shapes: N=2, C=4, H=W=32  -> upsample x7 = 224 -> avgpool 32 -> 7x7
    N, C, H, W = 2, 4, 32, 32
    D_EMBED = 32      # synthetic CLIP embedding dim
    L_LATENT = 64     # latent w / w_hat dim
    H_OUT = (H * 7) // 32
    W_OUT = (W * 7) // 32

    image = jax.random.normal(k_img, (N, C, H, W), dtype=jnp.float32)
    w = jax.random.normal(k_w, (N, L_LATENT), dtype=jnp.float32)
    w_hat = jax.random.normal(k_wh, (N, L_LATENT), dtype=jnp.float32)
    text = "a photo of a cat"

    tok_emb = 0.02 * jax.random.normal(k_tok, (256, D_EMBED), dtype=jnp.float32)
    params = {
        # Fused Upsample(x7)+AvgPool2d(32) as one (C*H*W, C*Ho*Wo) matrix,
        # pre-transposed on host (no in-kernel transpose, no per-plane loop).
        "resample_T": jnp.asarray(make_fused_resample_matrix(C, H, W)),   # (4096, 196)
        "w_img": 0.02 * jax.random.normal(
            k_proj, (C * H_OUT * W_OUT, D_EMBED), dtype=jnp.float32),     # (196, 32)
    }

    # Text embedding computed once, outside the kernel / traced forward.
    txt_emb = embed_text(text, tok_emb)                                   # (1, 32)

    loss = clip_loss_forward(image, txt_emb, w, w_hat, params)
    jax.block_until_ready(loss)
    assert loss.shape == (N, 1)
    assert bool(jnp.all(jnp.isfinite(loss)))
    print("KERNEL_OK")
</pallas_src>

<mosaic_0001>
module attributes {stable_mosaic.version = 11 : i64} {
  func.func @clip_loss_kernel(%arg0: i32, %arg1: memref<2x4096xf32, #tpu.memory_space<vmem>>, %arg2: memref<4096x196xf32, #tpu.memory_space<vmem>>, %arg3: memref<196x32xf32, #tpu.memory_space<vmem>>, %arg4: memref<1x32xf32, #tpu.memory_space<vmem>>, %arg5: memref<2x64xf32, #tpu.memory_space<vmem>>, %arg6: memref<2x64xf32, #tpu.memory_space<vmem>>, %arg7: memref<2x1xf32, #tpu.memory_space<vmem>>) attributes {dimension_semantics = [#tpu.dimension_semantics<arbitrary>], iteration_bounds = array<i64: 1>, scalar_prefetch = 0 : i64, scratch_operands = 0 : i64, tpu.core_type = #tpu.core_type<tc>, window_params = [{pipeline_mode = #tpu.pipeline_mode<synchronous>, transform_indices = @transform_0, window_bounds = array<i64: 2, 4096>}, {pipeline_mode = #tpu.pipeline_mode<synchronous>, transform_indices = @transform_1, window_bounds = array<i64: 4096, 196>}, {pipeline_mode = #tpu.pipeline_mode<synchronous>, transform_indices = @transform_2, window_bounds = array<i64: 196, 32>}, {pipeline_mode = #tpu.pipeline_mode<synchronous>, transform_indices = @transform_3, window_bounds = array<i64: 1, 32>}, {pipeline_mode = #tpu.pipeline_mode<synchronous>, transform_indices = @transform_4, window_bounds = array<i64: 2, 64>}, {pipeline_mode = #tpu.pipeline_mode<synchronous>, transform_indices = @transform_5, window_bounds = array<i64: 2, 64>}, {pipeline_mode = #tpu.pipeline_mode<synchronous>, transform_indices = @transform_6, window_bounds = array<i64: 2, 1>}]} {
    %c0 = arith.constant 0 : index
    %c0_0 = arith.constant 0 : index
    %0 = vector.load %arg1[%c0, %c0_0] : memref<2x4096xf32, #tpu.memory_space<vmem>>, vector<2x4096xf32>
    %c0_1 = arith.constant 0 : index
    %c0_2 = arith.constant 0 : index
    %1 = vector.load %arg2[%c0_1, %c0_2] : memref<4096x196xf32, #tpu.memory_space<vmem>>, vector<4096x196xf32>
    %cst = arith.constant dense<0.000000e+00> : vector<2x196xf32>
    %2 = tpu.matmul %0, %1, %cst {dimension_numbers = #tpu.dot_dimension_numbers<[1], [0], [0], [1], [0, 0, 1, 1], [], []>} : vector<2x4096xf32>, vector<4096x196xf32>, vector<2x196xf32> -> vector<2x196xf32>
    %c0_3 = arith.constant 0 : index
    %c0_4 = arith.constant 0 : index
    %3 = vector.load %arg3[%c0_3, %c0_4] : memref<196x32xf32, #tpu.memory_space<vmem>>, vector<196x32xf32>
    %cst_5 = arith.constant dense<0.000000e+00> : vector<2x32xf32>
    %4 = tpu.matmul %2, %3, %cst_5 {dimension_numbers = #tpu.dot_dimension_numbers<[1], [0], [0], [1], [0, 0, 1, 1], [], []>} : vector<2x196xf32>, vector<196x32xf32>, vector<2x32xf32> -> vector<2x32xf32>
    %5 = arith.mulf %4, %4 : vector<2x32xf32>
    %cst_6 = arith.constant dense<0.000000e+00> : vector<2xf32>
    %6 = vector.multi_reduction <add>, %5, %cst_6 [1] : vector<2x32xf32> to vector<2xf32>
    %7 = vector.shape_cast %6 : vector<2xf32> to vector<2x1xf32>
    %cst_7 = arith.constant 9.99999996E-13 : f32
    %8 = vector.broadcast %cst_7 : f32 to vector<2x1xf32>
    %9 = arith.addf %7, %8 : vector<2x1xf32>
    %10 = math.rsqrt %9 : vector<2x1xf32>
    %11 = vector.broadcast %10 : vector<2x1xf32> to vector<2x32xf32>
    %12 = arith.mulf %4, %11 : vector<2x32xf32>
    %c0_8 = arith.constant 0 : index
    %c0_9 = arith.constant 0 : index
    %13 = vector.load %arg4[%c0_8, %c0_9] : memref<1x32xf32, #tpu.memory_space<vmem>>, vector<1x32xf32>
    %14 = arith.mulf %13, %13 : vector<1x32xf32>
    %cst_10 = arith.constant dense<0.000000e+00> : vector<1xf32>
    %15 = vector.multi_reduction <add>, %14, %cst_10 [1] : vector<1x32xf32> to vector<1xf32>
    %16 = vector.shape_cast %15 : vector<1xf32> to vector<1x1xf32>
    %cst_11 = arith.constant 9.99999996E-13 : f32
    %17 = vector.broadcast %cst_11 : f32 to vector<1x1xf32>
    %18 = arith.addf %16, %17 : vector<1x1xf32>
    %19 = math.rsqrt %18 : vector<1x1xf32>
    %20 = vector.broadcast %19 : vector<1x1xf32> to vector<1x32xf32>
    %21 = arith.mulf %13, %20 : vector<1x32xf32>
    %22 = vector.broadcast %21 : vector<1x32xf32> to vector<2x32xf32>
    %23 = arith.mulf %12, %22 : vector<2x32xf32>
    %cst_12 = arith.constant dense<0.000000e+00> : vector<2xf32>
    %24 = vector.multi_reduction <add>, %23, %cst_12 [1] : vector<2x32xf32> to vector<2xf32>
    %25 = vector.shape_cast %24 : vector<2xf32> to vector<2x1xf32>
    %cst_13 = arith.constant 1.000000e+00 : f32
    %26 = vector.broadcast %cst_13 : f32 to vector<2x1xf32>
    %27 = arith.subf %26, %25 : vector<2x1xf32>
    %c0_14 = arith.constant 0 : index
    %c0_15 = arith.constant 0 : index
    %28 = vector.load %arg6[%c0_14, %c0_15] : memref<2x64xf32, #tpu.memory_space<vmem>>, vector<2x64xf32>
    %c0_16 = arith.constant 0 : index
    %c0_17 = arith.constant 0 : index
    %29 = vector.load %arg5[%c0_16, %c0_17] : memref<2x64xf32, #tpu.memory_space<vmem>>, vector<2x64xf32>
    %30 = arith.subf %28, %29 : vector<2x64xf32>
    %31 = arith.mulf %30, %30 : vector<2x64xf32>
    %32 = vector.shape_cast %31 : vector<2x64xf32> to vector<1x2x64xf32>
    %cst_18 = arith.constant dense<0.000000e+00> : vector<1xf32>
    %33 = vector.multi_reduction <add>, %32, %cst_18 [1, 2] : vector<1x2x64xf32> to vector<1xf32>
    %34 = vector.shape_cast %33 : vector<1xf32> to vector<1x1x1xf32>
    %35 = vector.extract %34[0, 0, 0] : f32 from vector<1x1x1xf32>
    %cst_19 = arith.constant 1.280000e+02 : f32
    %36 = arith.divf %35, %cst_19 : f32
    %cst_20 = arith.constant 8.000000e-01 : f32
    %37 = arith.mulf %cst_20, %36 : f32
    %38 = vector.broadcast %37 : f32 to vector<2x1xf32>
    %39 = arith.addf %27, %38 : vector<2x1xf32>
    %c0_21 = arith.constant 0 : index
    %c0_22 = arith.constant 0 : index
    %40 = vector.load %arg7[%c0_21, %c0_22] : memref<2x1xf32, #tpu.memory_space<vmem>>, vector<2x1xf32>
    tpu.vector_store %arg7[%c0_21, %c0_22], %39 {strides = array<i32>} : memref<2x1xf32, #tpu.memory_space<vmem>>, vector<2x1xf32>,
    return
  }
  func.func @transform_0(%arg0: i32) -> (i32, i32) {
    %c0_i32 = arith.constant 0 : i32
    %c0_i32_0 = arith.constant 0 : i32
    %c0_i32_1 = arith.constant 0 : i32
    return %c0_i32, %c0_i32_0 : i32, i32
  }
  func.func @transform_1(%arg0: i32) -> (i32, i32) {
    %c0_i32 = arith.constant 0 : i32
    %c0_i32_0 = arith.constant 0 : i32
    %c0_i32_1 = arith.constant 0 : i32
    return %c0_i32, %c0_i32_0 : i32, i32
  }
  func.func @transform_2(%arg0: i32) -> (i32, i32) {
    %c0_i32 = arith.constant 0 : i32
    %c0_i32_0 = arith.constant 0 : i32
    %c0_i32_1 = arith.constant 0 : i32
    return %c0_i32, %c0_i32_0 : i32, i32
  }
  func.func @transform_3(%arg0: i32) -> (i32, i32) {
    %c0_i32 = arith.constant 0 : i32
    %c0_i32_0 = arith.constant 0 : i32
    %c0_i32_1 = arith.constant 0 : i32
    return %c0_i32, %c0_i32_0 : i32, i32
  }
  func.func @transform_4(%arg0: i32) -> (i32, i32) {
    %c0_i32 = arith.constant 0 : i32
    %c0_i32_0 = arith.constant 0 : i32
    %c0_i32_1 = arith.constant 0 : i32
    return %c0_i32, %c0_i32_0 : i32, i32
  }
  func.func @transform_5(%arg0: i32) -> (i32, i32) {
    %c0_i32 = arith.constant 0 : i32
    %c0_i32_0 = arith.constant 0 : i32
    %c0_i32_1 = arith.constant 0 : i32
    return %c0_i32, %c0_i32_0 : i32, i32
  }
  func.func @transform_6(%arg0: i32) -> (i32, i32) {
    %c0_i32 = arith.constant 0 : i32
    %c0_i32_0 = arith.constant 0 : i32
    %c0_i32_1 = arith.constant 0 : i32
    return %c0_i32, %c0_i32_0 : i32, i32
  }
}

</mosaic_0001>

<bundles_post_ra>
// kernel: tpu_custom_call.1
= control target key start
LH: loop header
LB: loop body
LE: loop exit
PB: predicated region body
PF: predicated region fallthrough
CT: control target
= control target key end

     0   :  { %vm2396_vm0 = vcmask 1043456   ;;  %vm2480_vm1 = vcmask 253952   ;;  %vm2392_vm2 = vcmask 556032   ;;  %vm2502_vm3 = vcmask 517120   ;;  %s6999_s1 = inlined_call_operand.vmem [shape: f32[4096,196], index: 1, kind: input, shape index: {}]   ;;  %s7000_s0 = inlined_call_operand.vmem [shape: f32[2,4096], index: 0, kind: input, shape index: {}]   ;;  %s7001_s2 = inlined_call_operand.vmem [shape: f32[196,32], index: 2, kind: input, shape index: {}]   ;;  %s7002_s3 = inlined_call_operand.vmem [shape: f32[1,32], index: 3, kind: input, shape index: {}]   ;;  %s7003_s4 = inlined_call_operand.vmem [shape: f32[2,64], index: 4, kind: input, shape index: {}]   ;;  %s7004_s5 = inlined_call_operand.vmem [shape: f32[2,64], index: 5, kind: input, shape index: {}]   ;;  %s7005_s6 = inlined_call_operand.vmem [shape: f32[2,1], index: 6, kind: output, shape index: {}]  }
   0x1   :  { %v32_v0 = vld [vmem:[%s6999_s1 + $0x8] sm:$0xff]  ;;  %v34_v1 = vld [vmem:[%s6999_s1 + $0x18] sm:$0xff]  ;;  %v31_v5 = vld [vmem:[%s6999_s1] sm:$0xff]  ;;  %vm2471_vm4 = vcmask 254976   ;;  %vm2519_vm5 = vcmask 1024  }
   0x2   :  { %v544_v2 = vld [vmem:[%s6999_s1 + $0x1008] sm:$0xff]  ;;  %v2527_v3 = vpack.c.bf16 %v34_v1, %v32_v0  ;;  %v546_v4 = vld [vmem:[%s6999_s1 + $0x1018] sm:$0xff]  ;;  %v33_v6 = vld [vmem:[%s6999_s1 + $0x10] sm:$0xff] }
   0x3   :  { %v3039_v7 = vpack.c.bf16 %v546_v4, %v544_v2  ;;  %v2529_v8 = vpack.c.bf16 %v33_v6, %v31_v5  ;;  %v543_v9 = vld [vmem:[%s6999_s1 + $0x1000] sm:$0xff]  ;;  %v545_v10 = vld [vmem:[%s6999_s1 + $0x1010] sm:$0xff]  ;;  %v36_v11 = vld [vmem:[%s6999_s1 + $0x28] sm:$0xff] }
   0x4   :  { %2528 = vmatprep.subr.bf16.mxu1 %v2527_v3  ;;  %v3041_v12 = vpack.c.bf16 %v545_v10, %v543_v9  ;;  %v38_v13 = vld [vmem:[%s6999_s1 + $0x38] sm:$0xff]  ;;  %v548_v14 = vld [vmem:[%s6999_s1 + $0x1028] sm:$0xff]  ;;  %v35_v18 = vld [vmem:[%s6999_s1 + $0x20] sm:$0xff] }
   0x5   :  { %v550_v15 = vld [vmem:[%s6999_s1 + $0x1038] sm:$0xff]  ;;  %3040 = vmatprep.subr.bf16.mxu0 %v3039_v7  ;;  %2530 = vmatpush1.bf16.msra.mxu1 %v2529_v8  ;;  %v2531_v16 = vpack.c.bf16 %v38_v13, %v36_v11  ;;  %v37_v19 = vld [vmem:[%s6999_s1 + $0x30] sm:$0xff]  ;;  %v547_v20 = vld [vmem:[%s6999_s1 + $0x1020] sm:$0xff] }
   0x6   :  { %v3043_v17 = vpack.c.bf16 %v550_v15, %v548_v14  ;;  %3042 = vmatpush1.bf16.msra.mxu0 %v3041_v12  ;;  %v2533_v21 = vpack.c.bf16 %v37_v19, %v35_v18  ;;  %v549_v22 = vld [vmem:[%s6999_s1 + $0x1030] sm:$0xff]  ;;  %v40_v23 = vld [vmem:[%s6999_s1 + $0x48] sm:$0xff]  ;;  %v42_v24 = vld [vmem:[%s6999_s1 + $0x58] sm:$0xff] }
   0x7   :  { %2532 = vmatprep.subr.bf16.mxu1 %v2531_v16  ;;  %v3045_v25 = vpack.c.bf16 %v549_v22, %v547_v20  ;;  %v2535_v26 = vpack.c.bf16 %v42_v24, %v40_v23  ;;  %v552_v27 = vld [vmem:[%s6999_s1 + $0x1048] sm:$0xff]  ;;  %v554_v28 = vld [vmem:[%s6999_s1 + $0x1058] sm:$0xff]  ;;  %v39_v29 = vld [vmem:[%s6999_s1 + $0x40] sm:$0xff] }
   0x8   :  { %3044 = vmatprep.subr.bf16.mxu0 %v3043_v17  ;;  %v3047_v30 = vpack.c.bf16 %v554_v28, %v552_v27  ;;  %v41_v31 = vld [vmem:[%s6999_s1 + $0x50] sm:$0xff]  ;;  %v551_v32 = vld [vmem:[%s6999_s1 + $0x1040] sm:$0xff]  ;;  %v44_v35 = vld [vmem:[%s6999_s1 + $0x68] sm:$0xff] }
   0x9   :  { %v553_v33 = vld [vmem:[%s6999_s1 + $0x1050] sm:$0xff]  ;;  %2534 = vmatpush1.bf16.msra.mxu1 %v2533_v21  ;;  %v2537_v34 = vpack.c.bf16 %v41_v31, %v39_v29  ;;  %v46_v36 = vld [vmem:[%s6999_s1 + $0x78] sm:$0xff]  ;;  %v556_v37 = vld [vmem:[%s6999_s1 + $0x1068] sm:$0xff] }
   0xa   :  { %3046 = vmatpush1.bf16.msra.mxu0 %v3045_v25  ;;  %2536 = vmatprep.subr.bf16.mxu1 %v2535_v26  ;;  %v3049_v38 = vpack.c.bf16 %v553_v33, %v551_v32  ;;  %v2539_v39 = vpack.c.bf16 %v46_v36, %v44_v35  ;;  %v558_v40 = vld [vmem:[%s6999_s1 + $0x1078] sm:$0xff]  ;;  %v43_v41 = vld [vmem:[%s6999_s1 + $0x60] sm:$0xff]  ;;  %v45_v42 = vld [vmem:[%s6999_s1 + $0x70] sm:$0xff] }
   0xb   :  { %3048 = vmatprep.subr.bf16.mxu0 %v3047_v30  ;;  %v3051_v43 = vpack.c.bf16 %v558_v40, %v556_v37  ;;  %v555_v44 = vld [vmem:[%s6999_s1 + $0x1060] sm:$0xff]  ;;  %v557_v45 = vld [vmem:[%s6999_s1 + $0x1070] sm:$0xff]  ;;  %v48_v46 = vld [vmem:[%s6999_s1 + $0x88] sm:$0xff]  ;;  %v2541_v50 = vpack.c.bf16 %v45_v42, %v43_v41 }
   0xc   :  { %v50_v47 = vld [vmem:[%s6999_s1 + $0x98] sm:$0xff]  ;;  %v560_v48 = vld [vmem:[%s6999_s1 + $0x1088] sm:$0xff]  ;;  %v3053_v51 = vpack.c.bf16 %v557_v45, %v555_v44  ;;  %v47_v53 = vld [vmem:[%s6999_s1 + $0x80] sm:$0xff] }
   0xd   :  { %v562_v49 = vld [vmem:[%s6999_s1 + $0x1098] sm:$0xff]  ;;  %2538 = vmatpush1.bf16.msra.mxu1 %v2537_v34  ;;  %v2543_v52 = vpack.c.bf16 %v50_v47, %v48_v46  ;;  %v49_v54 = vld [vmem:[%s6999_s1 + $0x90] sm:$0xff]  ;;  %v559_v55 = vld [vmem:[%s6999_s1 + $0x1080] sm:$0xff]  ;;  %v3634_v46 = vmov 1983009808  }
   0xe   :  { %3050 = vmatpush1.bf16.msra.mxu0 %v3049_v38  ;;  %2540 = vmatprep.subr.bf16.mxu1 %v2539_v39  ;;  %v3055_v56 = vpack.c.bf16 %v562_v49, %v560_v48  ;;  %v561_v57 = vld [vmem:[%s6999_s1 + $0x1090] sm:$0xff]  ;;  %v52_v58 = vld [vmem:[%s6999_s1 + $0xa8] sm:$0xff]  ;;  %v54_v59 = vld [vmem:[%s6999_s1 + $0xb8] sm:$0xff]  ;;  %v2545_v62 = vpack.c.bf16 %v49_v54, %v47_v53  ;;  %v1065_v47 = vunpack.c.l.s4 %v3634_v46  ;;  %v1067_v48 = vlaneseq }
   0xf   :  { %3052 = vmatprep.subr.bf16.mxu0 %v3051_v43  ;;  %v564_v60 = vld [vmem:[%s6999_s1 + $0x10a8] sm:$0xff]  ;;  %v566_v61 = vld [vmem:[%s6999_s1 + $0x10b8] sm:$0xff]  ;;  %v3057_v63 = vpack.c.bf16 %v561_v57, %v559_v55  ;;  %v2547_v0 = vpack.c.bf16 %v54_v59, %v52_v58  ;;  %v51_v1 = vld [vmem:[%s6999_s1 + $0xa0] sm:$0xff] }
  0x10   :  { %v53_v2 = vld [vmem:[%s6999_s1 + $0xb0] sm:$0xff]  ;;  %v563_v3 = vld [vmem:[%s6999_s1 + $0x10a0] sm:$0xff]  ;;  %v3059_v4 = vpack.c.bf16 %v566_v61, %v564_v60  ;;  %v56_v6 = vld [vmem:[%s6999_s1 + $0xc8] sm:$0xff]  ;;  %v1066_v61 = vunpack.c.0.s8 %v1065_v47 }
  0x11   :  { %2542 = vmatpush1.bf16.msra.mxu1 %v2541_v50  ;;  %v565_v5 = vld [vmem:[%s6999_s1 + $0x10b0] sm:$0xff]  ;;  %v58_v7 = vld [vmem:[%s6999_s1 + $0xd8] sm:$0xff]  ;;  %v568_v8 = vld [vmem:[%s6999_s1 + $0x10c8] sm:$0xff]  ;;  %v2549_v10 = vpack.c.bf16 %v53_v2, %v51_v1 }
  0x12   :  { %3054 = vmatpush1.bf16.msra.mxu0 %v3053_v51  ;;  %2544 = vmatprep.subr.bf16.mxu1 %v2543_v52  ;;  %v570_v9 = vld [vmem:[%s6999_s1 + $0x10d8] sm:$0xff]  ;;  %v3061_v11 = vpack.c.bf16 %v565_v5, %v563_v3  ;;  %v2551_v12 = vpack.c.bf16 %v58_v7, %v56_v6  ;;  %v55_v13 = vld [vmem:[%s6999_s1 + $0xc0] sm:$0xff]  ;;  %v57_v14 = vld [vmem:[%s6999_s1 + $0xd0] sm:$0xff] }
  0x13   :  { %3056 = vmatprep.subr.bf16.mxu0 %v3055_v56  ;;  %v567_v15 = vld [vmem:[%s6999_s1 + $0x10c0] sm:$0xff]  ;;  %v3063_v16 = vpack.c.bf16 %v570_v9, %v568_v8  ;;  %v569_v17 = vld [vmem:[%s6999_s1 + $0x10d0] sm:$0xff]  ;;  %v60_v18 = vld [vmem:[%s6999_s1 + $0xe8] sm:$0xff]  ;;  %v2553_v22 = vpack.c.bf16 %v57_v14, %v55_v13 }
  0x14   :  { %v62_v19 = vld [vmem:[%s6999_s1 + $0xf8] sm:$0xff]  ;;  %v572_v20 = vld [vmem:[%s6999_s1 + $0x10e8] sm:$0xff]  ;;  %v3065_v23 = vpack.c.bf16 %v569_v17, %v567_v15  ;;  %v59_v25 = vld [vmem:[%s6999_s1 + $0xe0] sm:$0xff] }
  0x15   :  { %2546 = vmatpush1.bf16.msra.mxu1 %v2545_v62  ;;  %v574_v21 = vld [vmem:[%s6999_s1 + $0x10f8] sm:$0xff]  ;;  %v2555_v24 = vpack.c.bf16 %v62_v19, %v60_v18  ;;  %v61_v26 = vld [vmem:[%s6999_s1 + $0xf0] sm:$0xff]  ;;  %v571_v27 = vld [vmem:[%s6999_s1 + $0x10e0] sm:$0xff]  ;;  %v3924_v62 = vshrl.u32 %v1067_v48, 7 }
  0x16   :  { %3058 = vmatpush1.bf16.msra.mxu0 %v3057_v63  ;;  %2548 = vmatprep.subr.bf16.mxu1 %v2547_v0  ;;  %v3067_v28 = vpack.c.bf16 %v574_v21, %v572_v20  ;;  %v573_v29 = vld [vmem:[%s6999_s1 + $0x10f0] sm:$0xff]  ;;  %v64_v30 = vld [vmem:[%s6999_s1 + $0x108] sm:$0xff]  ;;  %v66_v31 = vld [vmem:[%s6999_s1 + $0x118] sm:$0xff]  ;;  %v2557_v34 = vpack.c.bf16 %v61_v26, %v59_v25 }
  0x17   :  { %3060 = vmatprep.subr.bf16.mxu0 %v3059_v4  ;;  %v576_v32 = vld [vmem:[%s6999_s1 + $0x1108] sm:$0xff]  ;;  %v578_v33 = vld [vmem:[%s6999_s1 + $0x1118] sm:$0xff]  ;;  %v3069_v35 = vpack.c.bf16 %v573_v29, %v571_v27  ;;  %v2559_v36 = vpack.c.bf16 %v66_v31, %v64_v30  ;;  %v63_v37 = vld [vmem:[%s6999_s1 + $0x100] sm:$0xff] }
  0x18   :  { %v65_v38 = vld [vmem:[%s6999_s1 + $0x110] sm:$0xff]  ;;  %v575_v39 = vld [vmem:[%s6999_s1 + $0x1100] sm:$0xff]  ;;  %v3071_v40 = vpack.c.bf16 %v578_v33, %v576_v32  ;;  %v68_v42 = vld [vmem:[%s6999_s1 + $0x128] sm:$0xff] }
  0x19   :  { %2550 = vmatpush1.bf16.msra.mxu1 %v2549_v10  ;;  %v577_v41 = vld [vmem:[%s6999_s1 + $0x1110] sm:$0xff]  ;;  %v70_v43 = vld [vmem:[%s6999_s1 + $0x138] sm:$0xff]  ;;  %v580_v44 = vld [vmem:[%s6999_s1 + $0x1128] sm:$0xff]  ;;  %v2561_v49 = vpack.c.bf16 %v65_v38, %v63_v37 }
  0x1a   :  { %3062 = vmatpush1.bf16.msra.mxu0 %v3061_v11  ;;  %2552 = vmatprep.subr.bf16.mxu1 %v2551_v12  ;;  %v582_v45 = vld [vmem:[%s6999_s1 + $0x1138] sm:$0xff]  ;;  %v3073_v50 = vpack.c.bf16 %v577_v41, %v575_v39  ;;  %v2563_v51 = vpack.c.bf16 %v70_v43, %v68_v42  ;;  %v67_v52 = vld [vmem:[%s6999_s1 + $0x120] sm:$0xff]  ;;  %v69_v53 = vld [vmem:[%s6999_s1 + $0x130] sm:$0xff]  ;;  %v3951_v11 = vsub.s32 %v1066_v61, %v3924_v62 }
  0x1b   :  { %3064 = vmatprep.subr.bf16.mxu0 %v3063_v16  ;;  %v579_v54 = vld [vmem:[%s6999_s1 + $0x1120] sm:$0xff]  ;;  %v3075_v55 = vpack.c.bf16 %v582_v45, %v580_v44  ;;  %v581_v56 = vld [vmem:[%s6999_s1 + $0x1130] sm:$0xff]  ;;  %v72_v57 = vld [vmem:[%s6999_s1 + $0x148] sm:$0xff]  ;;  %v2565_v63 = vpack.c.bf16 %v69_v53, %v67_v52 }
  0x1c   :  { %v74_v58 = vld [vmem:[%s6999_s1 + $0x158] sm:$0xff]  ;;  %v584_v59 = vld [vmem:[%s6999_s1 + $0x1148] sm:$0xff]  ;;  %v3077_v0 = vpack.c.bf16 %v581_v56, %v579_v54  ;;  %v71_v2 = vld [vmem:[%s6999_s1 + $0x140] sm:$0xff] }
  0x1d   :  { %2554 = vmatpush1.bf16.msra.mxu1 %v2553_v22  ;;  %v586_v60 = vld [vmem:[%s6999_s1 + $0x1158] sm:$0xff]  ;;  %v2567_v1 = vpack.c.bf16 %v74_v58, %v72_v57  ;;  %v73_v3 = vld [vmem:[%s6999_s1 + $0x150] sm:$0xff]  ;;  %v583_v4 = vld [vmem:[%s6999_s1 + $0x1140] sm:$0xff] }
  0x1e   :  { %3066 = vmatpush1.bf16.msra.mxu0 %v3065_v23  ;;  %2556 = vmatprep.subr.bf16.mxu1 %v2555_v24  ;;  %v3079_v5 = vpack.c.bf16 %v586_v60, %v584_v59  ;;  %v585_v6 = vld [vmem:[%s6999_s1 + $0x1150] sm:$0xff]  ;;  %v76_v7 = vld [vmem:[%s6999_s1 + $0x168] sm:$0xff]  ;;  %v78_v8 = vld [vmem:[%s6999_s1 + $0x178] sm:$0xff]  ;;  %v2569_v12 = vpack.c.bf16 %v73_v3, %v71_v2 }
  0x1f   :  { %3068 = vmatprep.subr.bf16.mxu0 %v3067_v28  ;;  %v588_v9 = vld [vmem:[%s6999_s1 + $0x1168] sm:$0xff]  ;;  %v590_v10 = vld [vmem:[%s6999_s1 + $0x1178] sm:$0xff]  ;;  %v75_v13 = vld [vmem:[%s6999_s1 + $0x160] sm:$0xff]  ;;  %v3081_v14 = vpack.c.bf16 %v585_v6, %v583_v4  ;;  %v2571_v15 = vpack.c.bf16 %v78_v8, %v76_v7 }
  0x20   :  { %v77_v16 = vld [vmem:[%s6999_s1 + $0x170] sm:$0xff]  ;;  %v587_v17 = vld [vmem:[%s6999_s1 + $0x1160] sm:$0xff]  ;;  %v3083_v19 = vpack.c.bf16 %v590_v10, %v588_v9  ;;  %v80_v20 = vld [vmem:[%s6999_s1 + $0x188] sm:$0xff] }
  0x21   :  { %2558 = vmatpush1.bf16.msra.mxu1 %v2557_v34  ;;  %v589_v18 = vld [vmem:[%s6999_s1 + $0x1170] sm:$0xff]  ;;  %v82_v21 = vld [vmem:[%s6999_s1 + $0x198] sm:$0xff]  ;;  %v3974_v22 = vld [vmem:[%s7000_s0] sm:$0xff]  ;;  %v2573_v27 = vpack.c.bf16 %v77_v16, %v75_v13 }
  0x22   :  { %3070 = vmatpush1.bf16.msra.mxu0 %v3069_v35  ;;  %2560 = vmatprep.subr.bf16.mxu1 %v2559_v36  ;;  %v592_v23 = vld [vmem:[%s6999_s1 + $0x1188] sm:$0xff]  ;;  %v594_v24 = vld [vmem:[%s6999_s1 + $0x1198] sm:$0xff]  ;;  %v3984_v25 = vrot.slane %v3974_v22, %v3951_v11  ;;  %v3989_v26 = vld [vmem:[%s7000_s0 + $0x20] sm:$0xff]  ;;  %v3085_v29 = vpack.c.bf16 %v589_v18, %v587_v17  ;;  %v2575_v30 = vpack.c.bf16 %v82_v21, %v80_v20 }
  0x23   :  { %3072 = vmatprep.subr.bf16.mxu0 %v3071_v40  ;;  %v3993_v28 = vrot.slane %v3989_v26, %v3951_v11  ;;  %v79_v31 = vld [vmem:[%s6999_s1 + $0x180] sm:$0xff]  ;;  %v81_v32 = vld [vmem:[%s6999_s1 + $0x190] sm:$0xff]  ;;  %v3087_v35 = vpack.c.bf16 %v594_v24, %v592_v23  ;;  %v84_v37 = vld [vmem:[%s6999_s1 + $0x1a8] sm:$0xff] }
  0x24   :  { %v591_v33 = vld [vmem:[%s6999_s1 + $0x1180] sm:$0xff]  ;;  %v1078_v34 = vcombine.high %v3984_v25, %v3984_v25  ;;  %v593_v36 = vld [vmem:[%s6999_s1 + $0x1190] sm:$0xff]  ;;  %v86_v38 = vld [vmem:[%s6999_s1 + $0x1b8] sm:$0xff]  ;;  %v2577_v42 = vpack.c.bf16 %v81_v32, %v79_v31 }
  0x25   :  { %2562 = vmatpush1.bf16.msra.mxu1 %v2561_v49  ;;  %v1146_v39 = vcombine.high %v3993_v28, %v3993_v28  ;;  %v596_v40 = vld [vmem:[%s6999_s1 + $0x11a8] sm:$0xff]  ;;  %v598_v41 = vld [vmem:[%s6999_s1 + $0x11b8] sm:$0xff]  ;;  %v3089_v43 = vpack.c.bf16 %v593_v36, %v591_v33  ;;  %v2579_v44 = vpack.c.bf16 %v86_v38, %v84_v37  ;;  %v83_v45 = vld [vmem:[%s6999_s1 + $0x1a0] sm:$0xff] }
  0x26   :  { %3074 = vmatpush1.bf16.msra.mxu0 %v3073_v50  ;;  %2564 = vmatprep.subr.bf16.mxu1 %v2563_v51  ;;  %v85_v46 = vld [vmem:[%s6999_s1 + $0x1b0] sm:$0xff]  ;;  %v595_v47 = vld [vmem:[%s6999_s1 + $0x11a0] sm:$0xff]  ;;  %v3091_v48 = vpack.c.bf16 %v598_v41, %v596_v40  ;;  %v88_v50 = vld [vmem:[%s6999_s1 + $0x1c8] sm:$0xff] }
  0x27   :  { %3076 = vmatprep.subr.bf16.mxu0 %v3075_v55  ;;  %1295 = vmatprep.mubr.f32.mxu1 %v1078_v34  ;;  %v597_v49 = vld [vmem:[%s6999_s1 + $0x11b0] sm:$0xff]  ;;  %v90_v51 = vld [vmem:[%s6999_s1 + $0x1d8] sm:$0xff]  ;;  %v600_v52 = vld [vmem:[%s6999_s1 + $0x11c8] sm:$0xff]  ;;  %v2581_v54 = vpack.c.bf16 %v85_v46, %v83_v45 }
  0x28   :  { %1863 = vmatprep.mubr.f32.mxu0 %v1146_v39  ;;  %v602_v53 = vld [vmem:[%s6999_s1 + $0x11d8] sm:$0xff]  ;;  %v3093_v55 = vpack.c.bf16 %v597_v49, %v595_v47  ;;  %v2583_v56 = vpack.c.bf16 %v90_v51, %v88_v50  ;;  %v87_v57 = vld [vmem:[%s6999_s1 + $0x1c0] sm:$0xff]  ;;  %v89_v58 = vld [vmem:[%s6999_s1 + $0x1d0] sm:$0xff] }
  0x29   :  { %2566 = vmatpush1.bf16.msra.mxu1 %v2565_v63  ;;  %v599_v59 = vld [vmem:[%s6999_s1 + $0x11c0] sm:$0xff]  ;;  %v3095_v60 = vpack.c.bf16 %v602_v53, %v600_v52  ;;  %v601_v61 = vld [vmem:[%s6999_s1 + $0x11d0] sm:$0xff]  ;;  %v92_v63 = vld [vmem:[%s6999_s1 + $0x1e8] sm:$0xff]  ;;  %v2585_v3 = vpack.c.bf16 %v89_v58, %v87_v57 }
  0x2a   :  { %3078 = vmatpush1.bf16.msra.mxu0 %v3077_v0  ;;  %2568 = vmatprep.subr.bf16.mxu1 %v2567_v1  ;;  %v94_v0 = vld [vmem:[%s6999_s1 + $0x1f8] sm:$0xff]  ;;  %v604_v1 = vld [vmem:[%s6999_s1 + $0x11e8] sm:$0xff]  ;;  %v3097_v4 = vpack.c.bf16 %v601_v61, %v599_v59  ;;  %v91_v6 = vld [vmem:[%s6999_s1 + $0x1e0] sm:$0xff] }
  0x2b   :  { %3080 = vmatprep.subr.bf16.mxu0 %v3079_v5  ;;  %v606_v2 = vld [vmem:[%s6999_s1 + $0x11f8] sm:$0xff]  ;;  %v2587_v5 = vpack.c.bf16 %v94_v0, %v92_v63  ;;  %v93_v7 = vld [vmem:[%s6999_s1 + $0x1f0] sm:$0xff]  ;;  %v603_v8 = vld [vmem:[%s6999_s1 + $0x11e0] sm:$0xff] }
  0x2c   :  { %v3099_v9 = vpack.c.bf16 %v606_v2, %v604_v1  ;;  %v605_v10 = vld [vmem:[%s6999_s1 + $0x11f0] sm:$0xff]  ;;  %v96_v13 = vld [vmem:[%s6999_s1 + $0x208] sm:$0xff]  ;;  %v610_v17 = vld [vmem:[%s6999_s1 + $0x1218] sm:$0xff]  ;;  %v2589_v18 = vpack.c.bf16 %v93_v7, %v91_v6 }
  0x2d   :  { %2570 = vmatpush1.bf16.msra.mxu1 %v2569_v12  ;;  %v1063_v12 = vcombine.high %v3974_v22, %v3974_v22  ;;  %v608_v16 = vld [vmem:[%s6999_s1 + $0x1208] sm:$0xff]  ;;  %v95_v21 = vld [vmem:[%s6999_s1 + $0x200] sm:$0xff]  ;;  %v97_v22 = vld [vmem:[%s6999_s1 + $0x210] sm:$0xff] }
  0x2e   :  { %3082 = vmatpush1.bf16.msra.mxu0 %v3081_v14  ;;  %2572 = vmatprep.subr.bf16.mxu1 %v2571_v15  ;;  %v98_v14 = vld [vmem:[%s6999_s1 + $0x218] sm:$0xff]  ;;  %v1131_v15 = vcombine.high %v3989_v26, %v3989_v26  ;;  %v607_v23 = vld [vmem:[%s6999_s1 + $0x1200] sm:$0xff]  ;;  %v3103_v24 = vpack.c.bf16 %v610_v17, %v608_v16  ;;  %v609_v26 = vld [vmem:[%s6999_s1 + $0x1210] sm:$0xff]  ;;  %v2593_v34 = vpack.c.bf16 %v97_v22, %v95_v21 }
  0x2f   :  { %3084 = vmatprep.subr.bf16.mxu0 %v3083_v19  ;;  %v3101_v19 = vpack.c.bf16 %v605_v10, %v603_v8  ;;  %v2591_v20 = vpack.c.bf16 %v98_v14, %v96_v13  ;;  %v612_v31 = vld [vmem:[%s6999_s1 + $0x1228] sm:$0xff]  ;;  %v614_v32 = vld [vmem:[%s6999_s1 + $0x1238] sm:$0xff]  ;;  %v99_v37 = vld [vmem:[%s6999_s1 + $0x220] sm:$0xff] }
  0x30   :  { %v4127_v33 = vrot.slane %v1131_v15, %v3951_v11  ;;  %v101_v38 = vld [vmem:[%s6999_s1 + $0x230] sm:$0xff]  ;;  %v611_v39 = vld [vmem:[%s6999_s1 + $0x1220] sm:$0xff]  ;;  %v3107_v40 = vpack.c.bf16 %v614_v32, %v612_v31  ;;  %v616_v45 = vld [vmem:[%s6999_s1 + $0x1248] sm:$0xff] }
  0x31   :  { %2574 = vmatpush1.bf16.msra.mxu1 %v2573_v27  ;;  %v100_v27 = vld [vmem:[%s6999_s1 + $0x228] sm:$0xff]  ;;  %v613_v41 = vld [vmem:[%s6999_s1 + $0x1230] sm:$0xff]  ;;  %v618_v46 = vld [vmem:[%s6999_s1 + $0x1258] sm:$0xff] }
  0x32   :  { %3086 = vmatpush1.bf16.msra.mxu0 %v3085_v29  ;;  %2576 = vmatprep.subr.bf16.mxu1 %v2575_v30  ;;  %v102_v29 = vld [vmem:[%s6999_s1 + $0x238] sm:$0xff]  ;;  %v4118_v30 = vrot.slane %v1063_v12, %v3951_v11  ;;  %v1147_v47 = vcombine.high %v4127_v33, %v4127_v33  ;;  %v3109_v49 = vpack.c.bf16 %v613_v41, %v611_v39  ;;  %v105_v51 = vld [vmem:[%s6999_s1 + $0x250] sm:$0xff]  ;;  %v615_v52 = vld [vmem:[%s6999_s1 + $0x1240] sm:$0xff] }
  0x33   :  { %3088 = vmatprep.subr.bf16.mxu0 %v3087_v35  ;;  %v3105_v35 = vpack.c.bf16 %v609_v26, %v607_v23  ;;  %v2595_v36 = vpack.c.bf16 %v102_v29, %v100_v27  ;;  %v3111_v53 = vpack.c.bf16 %v618_v46, %v616_v45  ;;  %v622_v57 = vld [vmem:[%s6999_s1 + $0x1278] sm:$0xff]  ;;  %v107_v61 = vld [vmem:[%s6999_s1 + $0x260] sm:$0xff]  ;;  %v109_v63 = vld [vmem:[%s6999_s1 + $0x270] sm:$0xff] }
  0x34   :  { %v619_v0 = vld [vmem:[%s6999_s1 + $0x1260] sm:$0xff]  ;;  %v621_v2 = vld [vmem:[%s6999_s1 + $0x1270] sm:$0xff]  ;;  %v626_v6 = vld [vmem:[%s6999_s1 + $0x1298] sm:$0xff]  ;;  %v2605_v7 = vpack.c.bf16 %v109_v63, %v107_v61 }
  0x35   :  { %2578 = vmatpush1.bf16.msra.mxu1 %v2577_v42  ;;  %v104_v42 = vld [vmem:[%s6999_s1 + $0x248] sm:$0xff]  ;;  %v3117_v8 = vpack.c.bf16 %v621_v2, %v619_v0  ;;  %v111_v10 = vld [vmem:[%s6999_s1 + $0x280] sm:$0xff]  ;;  %v113_v12 = vld [vmem:[%s6999_s1 + $0x290] sm:$0xff] }
  0x36   :  { %3090 = vmatpush1.bf16.msra.mxu0 %v3089_v43  ;;  %2580 = vmatprep.subr.bf16.mxu1 %v2579_v44  ;;  %v106_v43 = vld [vmem:[%s6999_s1 + $0x258] sm:$0xff]  ;;  %v1079_v44 = vcombine.high %v4118_v30, %v4118_v30  ;;  %v623_v13 = vld [vmem:[%s6999_s1 + $0x1280] sm:$0xff]  ;;  %v625_v15 = vld [vmem:[%s6999_s1 + $0x1290] sm:$0xff] }
  0x37   :  { %3092 = vmatprep.subr.bf16.mxu0 %v3091_v48  ;;  %v2597_v48 = vpack.c.bf16 %v101_v38, %v99_v37  ;;  %v2599_v50 = vpack.c.bf16 %v106_v43, %v104_v42  ;;  %v116_v16 = vld [vmem:[%s6999_s1 + $0x2a8] sm:$0xff]  ;;  %v118_v17 = vld [vmem:[%s6999_s1 + $0x2b8] sm:$0xff]  ;;  %v3121_v21 = vpack.c.bf16 %v625_v15, %v623_v13  ;;  %v115_v23 = vld [vmem:[%s6999_s1 + $0x2a0] sm:$0xff] }
  0x38   :  { %v2611_v22 = vpack.c.bf16 %v118_v17, %v116_v16  ;;  %v627_v26 = vld [vmem:[%s6999_s1 + $0x12a0] sm:$0xff]  ;;  %v629_v29 = vld [vmem:[%s6999_s1 + $0x12b0] sm:$0xff]  ;;  %v120_v31 = vld [vmem:[%s6999_s1 + $0x2c8] sm:$0xff] }
  0x39   :  { %2582 = vmatpush1.bf16.msra.mxu1 %v2581_v54  ;;  %v108_v54 = vld [vmem:[%s6999_s1 + $0x268] sm:$0xff]  ;;  %v122_v32 = vld [vmem:[%s6999_s1 + $0x2d8] sm:$0xff]  ;;  %v3125_v37 = vpack.c.bf16 %v629_v29, %v627_v26  ;;  %v119_v39 = vld [vmem:[%s6999_s1 + $0x2c0] sm:$0xff] }
  0x3a   :  { %3094 = vmatpush1.bf16.msra.mxu0 %v3093_v55  ;;  %2584 = vmatprep.subr.bf16.mxu1 %v2583_v56  ;;  %v110_v55 = vld [vmem:[%s6999_s1 + $0x278] sm:$0xff]  ;;  %v620_v56 = vld [vmem:[%s6999_s1 + $0x1268] sm:$0xff]  ;;  %v2615_v38 = vpack.c.bf16 %v122_v32, %v120_v31  ;;  %v631_v41 = vld [vmem:[%s6999_s1 + $0x12c0] sm:$0xff] }
  0x3b   :  { %3096 = vmatprep.subr.bf16.mxu0 %v3095_v60  ;;  %v2603_v60 = vpack.c.bf16 %v110_v55, %v108_v54  ;;  %v3115_v1 = vpack.c.bf16 %v622_v57, %v620_v56  ;;  %v633_v43 = vld [vmem:[%s6999_s1 + $0x12d0] sm:$0xff]  ;;  %v126_v45 = vld [vmem:[%s6999_s1 + $0x2f8] sm:$0xff]  ;;  %v636_v46 = vld [vmem:[%s6999_s1 + $0x12e8] sm:$0xff] }
  0x3c   :  { %v128_v54 = vld [vmem:[%s6999_s1 + $0x308] sm:$0xff]  ;;  %v130_v55 = vld [vmem:[%s6999_s1 + $0x318] sm:$0xff]  ;;  %v127_v61 = vld [vmem:[%s6999_s1 + $0x300] sm:$0xff] }
  0x3d   :  { %2586 = vmatpush1.bf16.msra.mxu1 %v2585_v3  ;;  %v112_v3 = vld [vmem:[%s6999_s1 + $0x288] sm:$0xff]  ;;  %v642_v57 = vld [vmem:[%s6999_s1 + $0x1318] sm:$0xff]  ;;  %v129_v63 = vld [vmem:[%s6999_s1 + $0x310] sm:$0xff] }
  0x3e   :  { %3098 = vmatpush1.bf16.msra.mxu0 %v3097_v4  ;;  %2588 = vmatprep.subr.bf16.mxu1 %v2587_v5  ;;  %v114_v4 = vld [vmem:[%s6999_s1 + $0x298] sm:$0xff]  ;;  %v624_v5 = vld [vmem:[%s6999_s1 + $0x1288] sm:$0xff]  ;;  %v639_v0 = vld [vmem:[%s6999_s1 + $0x1300] sm:$0xff] }
  0x3f   :  { %3100 = vmatprep.subr.bf16.mxu0 %v3099_v9  ;;  %v2607_v9 = vpack.c.bf16 %v114_v4, %v112_v3  ;;  %v3119_v14 = vpack.c.bf16 %v626_v6, %v624_v5  ;;  %v640_v56 = vld [vmem:[%s6999_s1 + $0x1308] sm:$0xff]  ;;  %v641_v2 = vld [vmem:[%s6999_s1 + $0x1310] sm:$0xff]  ;;  %v134_v4 = vld [vmem:[%s6999_s1 + $0x338] sm:$0xff] }
  0x40   :  { %v132_v3 = vld [vmem:[%s6999_s1 + $0x328] sm:$0xff]  ;;  %v646_v6 = vld [vmem:[%s6999_s1 + $0x1338] sm:$0xff]  ;;  %v643_v13 = vld [vmem:[%s6999_s1 + $0x1320] sm:$0xff] }
  0x41   :  { %2590 = vmatpush1.bf16.msra.mxu1 %v2589_v18  ;;  %v628_v18 = vld [vmem:[%s6999_s1 + $0x12a8] sm:$0xff]  ;;  %v645_v15 = vld [vmem:[%s6999_s1 + $0x1330] sm:$0xff]  ;;  %v138_v17 = vld [vmem:[%s6999_s1 + $0x358] sm:$0xff] }
  0x42   :  { %3102 = vmatpush1.bf16.msra.mxu0 %v3101_v19  ;;  %2592 = vmatprep.subr.bf16.mxu1 %v2591_v20  ;;  %v630_v19 = vld [vmem:[%s6999_s1 + $0x12b8] sm:$0xff]  ;;  %v2609_v20 = vpack.c.bf16 %v113_v12, %v111_v10  ;;  %v644_v5 = vld [vmem:[%s6999_s1 + $0x1328] sm:$0xff]  ;;  %v131_v10 = vld [vmem:[%s6999_s1 + $0x320] sm:$0xff] }
  0x43   :  { %3104 = vmatprep.subr.bf16.mxu0 %v3103_v24  ;;  %v117_v24 = vld [vmem:[%s6999_s1 + $0x2b0] sm:$0xff]  ;;  %v3123_v27 = vpack.c.bf16 %v630_v19, %v628_v18  ;;  %v136_v16 = vld [vmem:[%s6999_s1 + $0x348] sm:$0xff]  ;;  %v650_v19 = vld [vmem:[%s6999_s1 + $0x1358] sm:$0xff] }
  0x44   :  { %1296 = vmatmul.mubr.f32.vlgmr.msra.gmra.mrb[0].mxu1 %v3984_v25  ;;  %v103_v25 = vld [vmem:[%s6999_s1 + $0x240] sm:$0xff]  ;;  %v133_v12 = vld [vmem:[%s6999_s1 + $0x330] sm:$0xff]  ;;  %v648_v18 = vld [vmem:[%s6999_s1 + $0x1348] sm:$0xff] }
  0x45   :  { %2594 = vmatpush1.bf16.msra.mxu1 %v2593_v34  ;;  %1864 = vmatmul.mubr.f32.vlgmr.msra.gmra.mrb[0].mxu0 %v3993_v28  ;;  %v617_v28 = vld [vmem:[%s6999_s1 + $0x1250] sm:$0xff]  ;;  %v2601_v58 = vpack.c.bf16 %v105_v51, %v103_v25  ;;  %v632_v34 = vld [vmem:[%s6999_s1 + $0x12c8] sm:$0xff]  ;;  %v123_v25 = vld [vmem:[%s6999_s1 + $0x2e0] sm:$0xff] }
  0x46   :  { %3106 = vmatpush1.bf16.msra.mxu0 %v3105_v35  ;;  %2596 = vmatprep.subr.bf16.mxu1 %v2595_v36  ;;  %v3113_v59 = vpack.c.bf16 %v617_v28, %v615_v52  ;;  %v634_v35 = vld [vmem:[%s6999_s1 + $0x12d8] sm:$0xff]  ;;  %v2613_v36 = vpack.c.bf16 %v117_v24, %v115_v23  ;;  %v125_v51 = vld [vmem:[%s6999_s1 + $0x2f0] sm:$0xff]  ;;  %v635_v52 = vld [vmem:[%s6999_s1 + $0x12e0] sm:$0xff] }
  0x47   :  { %3108 = vmatprep.subr.bf16.mxu0 %v3107_v40  ;;  %1366 = vmatprep.mubr.f32.mxu1 %v1079_v44  ;;  %v121_v40 = vld [vmem:[%s6999_s1 + $0x2d0] sm:$0xff]  ;;  %v3127_v42 = vpack.c.bf16 %v634_v35, %v632_v34  ;;  %v124_v44 = vld [vmem:[%s6999_s1 + $0x2e8] sm:$0xff]  ;;  %v135_v23 = vld [vmem:[%s6999_s1 + $0x340] sm:$0xff] }
  0x48   :  { %1934 = vmatprep.mubr.f32.mxu0 %v1147_v47  ;;  %v638_v47 = vld [vmem:[%s6999_s1 + $0x12f8] sm:$0xff]  ;;  %v637_v28 = vld [vmem:[%s6999_s1 + $0x12f0] sm:$0xff]  ;;  %v647_v26 = vld [vmem:[%s6999_s1 + $0x1340] sm:$0xff] }
  0x49   :  { %2598 = vmatpush1.bf16.msra.mxu1 %v2597_v48  ;;  %v2617_v48 = vpack.c.bf16 %v121_v40, %v119_v39  ;;  %v137_v24 = vld [vmem:[%s6999_s1 + $0x350] sm:$0xff]  ;;  %v140_v31 = vld [vmem:[%s6999_s1 + $0x368] sm:$0xff]  ;;  %v142_v32 = vld [vmem:[%s6999_s1 + $0x378] sm:$0xff] }
  0x4a   :  { %3110 = vmatpush1.bf16.msra.mxu0 %v3109_v49  ;;  %2600 = vmatprep.subr.bf16.mxu1 %v2599_v50  ;;  %v3129_v49 = vpack.c.bf16 %v633_v43, %v631_v41  ;;  %v2619_v50 = vpack.c.bf16 %v126_v45, %v124_v44  ;;  %v649_v29 = vld [vmem:[%s6999_s1 + $0x1350] sm:$0xff]  ;;  %v652_v34 = vld [vmem:[%s6999_s1 + $0x1368] sm:$0xff]  ;;  %v654_v35 = vld [vmem:[%s6999_s1 + $0x1378] sm:$0xff] }
  0x4b   :  { %3112 = vmatprep.subr.bf16.mxu0 %v3111_v53  ;;  %v3131_v53 = vpack.c.bf16 %v638_v47, %v636_v46  ;;  %v139_v39 = vld [vmem:[%s6999_s1 + $0x360] sm:$0xff]  ;;  %v141_v40 = vld [vmem:[%s6999_s1 + $0x370] sm:$0xff]  ;;  %v144_v44 = vld [vmem:[%s6999_s1 + $0x388] sm:$0xff] }
  0x4c   :  { %v651_v41 = vld [vmem:[%s6999_s1 + $0x1360] sm:$0xff]  ;;  %v653_v43 = vld [vmem:[%s6999_s1 + $0x1370] sm:$0xff]  ;;  %v146_v45 = vld [vmem:[%s6999_s1 + $0x398] sm:$0xff] }
  0x4d   :  { %2602 = vmatpush1.bf16.msra.mxu1 %v2601_v58  ;;  %v2621_v58 = vpack.c.bf16 %v125_v51, %v123_v25  ;;  %v656_v46 = vld [vmem:[%s6999_s1 + $0x1388] sm:$0xff]  ;;  %v658_v47 = vld [vmem:[%s6999_s1 + $0x1398] sm:$0xff]  ;;  %v143_v25 = vld [vmem:[%s6999_s1 + $0x380] sm:$0xff] }
  0x4e   :  { %3114 = vmatpush1.bf16.msra.mxu0 %v3113_v59  ;;  %2604 = vmatprep.subr.bf16.mxu1 %v2603_v60  ;;  %v3133_v59 = vpack.c.bf16 %v637_v28, %v635_v52  ;;  %v2623_v60 = vpack.c.bf16 %v130_v55, %v128_v54  ;;  %v145_v51 = vld [vmem:[%s6999_s1 + $0x390] sm:$0xff]  ;;  %v655_v52 = vld [vmem:[%s6999_s1 + $0x1380] sm:$0xff]  ;;  %v148_v54 = vld [vmem:[%s6999_s1 + $0x3a8] sm:$0xff] }
  0x4f   :  { %3116 = vmatprep.subr.bf16.mxu0 %v3115_v1  ;;  %v3135_v1 = vpack.c.bf16 %v642_v57, %v640_v56  ;;  %v657_v28 = vld [vmem:[%s6999_s1 + $0x1390] sm:$0xff]  ;;  %v150_v55 = vld [vmem:[%s6999_s1 + $0x3b8] sm:$0xff]  ;;  %v660_v56 = vld [vmem:[%s6999_s1 + $0x13a8] sm:$0xff] }
  0x50   :  { %v662_v57 = vld [vmem:[%s6999_s1 + $0x13b8] sm:$0xff] }
  0x51   :  { %2606 = vmatpush1.bf16.msra.mxu1 %v2605_v7  ;;  %v2625_v7 = vpack.c.bf16 %v129_v63, %v127_v61  ;;  %v147_v61 = vld [vmem:[%s6999_s1 + $0x3a0] sm:$0xff]  ;;  %v149_v63 = vld [vmem:[%s6999_s1 + $0x3b0] sm:$0xff] }
  0x52   :  { %3118 = vmatpush1.bf16.msra.mxu0 %v3117_v8  ;;  %2608 = vmatprep.subr.bf16.mxu1 %v2607_v9  ;;  %v3137_v8 = vpack.c.bf16 %v641_v2, %v639_v0  ;;  %v2627_v9 = vpack.c.bf16 %v134_v4, %v132_v3  ;;  %v659_v0 = vld [vmem:[%s6999_s1 + $0x13a0] sm:$0xff]  ;;  %v661_v2 = vld [vmem:[%s6999_s1 + $0x13b0] sm:$0xff]  ;;  %v152_v3 = vld [vmem:[%s6999_s1 + $0x3c8] sm:$0xff] }
  0x53   :  { %3120 = vmatprep.subr.bf16.mxu0 %v3119_v14  ;;  %v3139_v14 = vpack.c.bf16 %v646_v6, %v644_v5  ;;  %v154_v4 = vld [vmem:[%s6999_s1 + $0x3d8] sm:$0xff]  ;;  %v664_v5 = vld [vmem:[%s6999_s1 + $0x13c8] sm:$0xff] }
  0x54   :  { %v666_v6 = vld [vmem:[%s6999_s1 + $0x13d8] sm:$0xff] }
  0x55   :  { %2610 = vmatpush1.bf16.msra.mxu1 %v2609_v20  ;;  %v2629_v20 = vpack.c.bf16 %v133_v12, %v131_v10  ;;  %v151_v10 = vld [vmem:[%s6999_s1 + $0x3c0] sm:$0xff]  ;;  %v153_v12 = vld [vmem:[%s6999_s1 + $0x3d0] sm:$0xff] }
  0x56   :  { %3122 = vmatpush1.bf16.msra.mxu0 %v3121_v21  ;;  %2612 = vmatprep.subr.bf16.mxu1 %v2611_v22  ;;  %v3141_v21 = vpack.c.bf16 %v645_v15, %v643_v13  ;;  %v2631_v22 = vpack.c.bf16 %v138_v17, %v136_v16  ;;  %v663_v13 = vld [vmem:[%s6999_s1 + $0x13c0] sm:$0xff]  ;;  %v665_v15 = vld [vmem:[%s6999_s1 + $0x13d0] sm:$0xff]  ;;  %v156_v16 = vld [vmem:[%s6999_s1 + $0x3e8] sm:$0xff] }
  0x57   :  { %3124 = vmatprep.subr.bf16.mxu0 %v3123_v27  ;;  %v3143_v27 = vpack.c.bf16 %v650_v19, %v648_v18  ;;  %v158_v17 = vld [vmem:[%s6999_s1 + $0x3f8] sm:$0xff]  ;;  %v668_v18 = vld [vmem:[%s6999_s1 + $0x13e8] sm:$0xff] }
  0x58   :  { %v670_v19 = vld [vmem:[%s6999_s1 + $0x13f8] sm:$0xff] }
  0x59   :  { %2614 = vmatpush1.bf16.msra.mxu1 %v2613_v36  ;;  %v2633_v36 = vpack.c.bf16 %v137_v24, %v135_v23  ;;  %v155_v23 = vld [vmem:[%s6999_s1 + $0x3e0] sm:$0xff]  ;;  %v157_v24 = vld [vmem:[%s6999_s1 + $0x3f0] sm:$0xff] }
  0x5a   :  { %3126 = vmatpush1.bf16.msra.mxu0 %v3125_v37  ;;  %2616 = vmatprep.subr.bf16.mxu1 %v2615_v38  ;;  %v3145_v37 = vpack.c.bf16 %v649_v29, %v647_v26  ;;  %v2635_v38 = vpack.c.bf16 %v142_v32, %v140_v31  ;;  %v667_v26 = vld [vmem:[%s6999_s1 + $0x13e0] sm:$0xff]  ;;  %v669_v29 = vld [vmem:[%s6999_s1 + $0x13f0] sm:$0xff]  ;;  %v160_v31 = vld [vmem:[%s6999_s1 + $0x408] sm:$0xff] }
  0x5b   :  { %3128 = vmatprep.subr.bf16.mxu0 %v3127_v42  ;;  %v3147_v42 = vpack.c.bf16 %v654_v35, %v652_v34  ;;  %v162_v32 = vld [vmem:[%s6999_s1 + $0x418] sm:$0xff]  ;;  %v672_v34 = vld [vmem:[%s6999_s1 + $0x1408] sm:$0xff] }
  0x5c   :  { %v674_v35 = vld [vmem:[%s6999_s1 + $0x1418] sm:$0xff] }
  0x5d   :  { %2618 = vmatpush1.bf16.msra.mxu1 %v2617_v48  ;;  %v2637_v48 = vpack.c.bf16 %v141_v40, %v139_v39  ;;  %v159_v39 = vld [vmem:[%s6999_s1 + $0x400] sm:$0xff]  ;;  %v161_v40 = vld [vmem:[%s6999_s1 + $0x410] sm:$0xff] }
  0x5e   :  { %3130 = vmatpush1.bf16.msra.mxu0 %v3129_v49  ;;  %2620 = vmatprep.subr.bf16.mxu1 %v2619_v50  ;;  %v3149_v49 = vpack.c.bf16 %v653_v43, %v651_v41  ;;  %v2639_v50 = vpack.c.bf16 %v146_v45, %v144_v44  ;;  %v671_v41 = vld [vmem:[%s6999_s1 + $0x1400] sm:$0xff]  ;;  %v673_v43 = vld [vmem:[%s6999_s1 + $0x1410] sm:$0xff]  ;;  %v164_v44 = vld [vmem:[%s6999_s1 + $0x428] sm:$0xff] }
  0x5f   :  { %3132 = vmatprep.subr.bf16.mxu0 %v3131_v53  ;;  %v3151_v53 = vpack.c.bf16 %v658_v47, %v656_v46  ;;  %v166_v45 = vld [vmem:[%s6999_s1 + $0x438] sm:$0xff]  ;;  %v676_v46 = vld [vmem:[%s6999_s1 + $0x1428] sm:$0xff] }
  0x60   :  { %v678_v47 = vld [vmem:[%s6999_s1 + $0x1438] sm:$0xff] }
  0x61   :  { %2622 = vmatpush1.bf16.msra.mxu1 %v2621_v58  ;;  %v2641_v58 = vpack.c.bf16 %v145_v51, %v143_v25  ;;  %v3169_v25 = vpack.c.bf16 %v673_v43, %v671_v41  ;;  %v2659_v51 = vpack.c.bf16 %v166_v45, %v164_v44  ;;  %v179_v43 = vld [vmem:[%s6999_s1 + $0x4a0] sm:$0xff]  ;;  %v181_v44 = vld [vmem:[%s6999_s1 + $0x4b0] sm:$0xff] }
  0x62   :  { %3134 = vmatpush1.bf16.msra.mxu0 %v3133_v59  ;;  %2624 = vmatprep.subr.bf16.mxu1 %v2623_v60  ;;  %v3153_v59 = vpack.c.bf16 %v657_v28, %v655_v52  ;;  %v2643_v60 = vpack.c.bf16 %v150_v55, %v148_v54  ;;  %v165_v52 = vld [vmem:[%s6999_s1 + $0x430] sm:$0xff]  ;;  %v4540_v54 = vld [vmem:[%s7000_s0 + $0x28] sm:$0xff]  ;;  %v3171_v55 = vpack.c.bf16 %v678_v47, %v676_v46  ;;  %v691_v45 = vld [vmem:[%s6999_s1 + $0x14a0] sm:$0xff] }
  0x63   :  { %3136 = vmatprep.subr.bf16.mxu0 %v3135_v1  ;;  %v3155_v1 = vpack.c.bf16 %v662_v57, %v660_v56  ;;  %v677_v56 = vld [vmem:[%s6999_s1 + $0x1430] sm:$0xff]  ;;  %v168_v57 = vld [vmem:[%s6999_s1 + $0x448] sm:$0xff] }
  0x64   :  { %v693_v47 = vld [vmem:[%s6999_s1 + $0x14b0] sm:$0xff] }
  0x65   :  { %2626 = vmatpush1.bf16.msra.mxu1 %v2625_v7  ;;  %v2645_v7 = vpack.c.bf16 %v149_v63, %v147_v61  ;;  %v682_v61 = vld [vmem:[%s6999_s1 + $0x1458] sm:$0xff] }
  0x66   :  { %3138 = vmatpush1.bf16.msra.mxu0 %v3137_v8  ;;  %2628 = vmatprep.subr.bf16.mxu1 %v2627_v9  ;;  %v3157_v8 = vpack.c.bf16 %v661_v2, %v659_v0  ;;  %v2647_v9 = vpack.c.bf16 %v154_v4, %v152_v3  ;;  %v167_v3 = vld [vmem:[%s6999_s1 + $0x440] sm:$0xff]  ;;  %v169_v4 = vld [vmem:[%s6999_s1 + $0x450] sm:$0xff] }
  0x67   :  { %3140 = vmatprep.subr.bf16.mxu0 %v3139_v14  ;;  %v3159_v14 = vpack.c.bf16 %v666_v6, %v664_v5  ;;  %v681_v6 = vld [vmem:[%s6999_s1 + $0x1450] sm:$0xff] }
  0x69   :  { %2630 = vmatpush1.bf16.msra.mxu1 %v2629_v20  ;;  %v2649_v20 = vpack.c.bf16 %v153_v12, %v151_v10  ;;  %v686_v10 = vld [vmem:[%s6999_s1 + $0x1478] sm:$0xff]  ;;  %v2665_v12 = vpack.c.bf16 %v169_v4, %v167_v3 }
  0x6a   :  { %3142 = vmatpush1.bf16.msra.mxu0 %v3141_v21  ;;  %2632 = vmatprep.subr.bf16.mxu1 %v2631_v22  ;;  %v3161_v21 = vpack.c.bf16 %v665_v15, %v663_v13  ;;  %v2651_v22 = vpack.c.bf16 %v158_v17, %v156_v16  ;;  %v171_v15 = vld [vmem:[%s6999_s1 + $0x460] sm:$0xff]  ;;  %v173_v16 = vld [vmem:[%s6999_s1 + $0x470] sm:$0xff] }
  0x6b   :  { %3144 = vmatprep.subr.bf16.mxu0 %v3143_v27  ;;  %v3163_v27 = vpack.c.bf16 %v670_v19, %v668_v18  ;;  %v683_v17 = vld [vmem:[%s6999_s1 + $0x1460] sm:$0xff]  ;;  %v685_v19 = vld [vmem:[%s6999_s1 + $0x1470] sm:$0xff] }
  0x6d   :  { %2634 = vmatpush1.bf16.msra.mxu1 %v2633_v36  ;;  %v2653_v36 = vpack.c.bf16 %v157_v24, %v155_v23  ;;  %v690_v23 = vld [vmem:[%s6999_s1 + $0x1498] sm:$0xff]  ;;  %v2669_v24 = vpack.c.bf16 %v173_v16, %v171_v15 }
  0x6e   :  { %3146 = vmatpush1.bf16.msra.mxu0 %v3145_v37  ;;  %2636 = vmatprep.subr.bf16.mxu1 %v2635_v38  ;;  %v3165_v37 = vpack.c.bf16 %v669_v29, %v667_v26  ;;  %v2655_v38 = vpack.c.bf16 %v162_v32, %v160_v31  ;;  %v3181_v26 = vpack.c.bf16 %v685_v19, %v683_v17  ;;  %v175_v29 = vld [vmem:[%s6999_s1 + $0x480] sm:$0xff]  ;;  %v177_v31 = vld [vmem:[%s6999_s1 + $0x490] sm:$0xff] }
  0x6f   :  { %3148 = vmatprep.subr.bf16.mxu0 %v3147_v42  ;;  %v3167_v42 = vpack.c.bf16 %v674_v35, %v672_v34  ;;  %v687_v32 = vld [vmem:[%s6999_s1 + $0x1480] sm:$0xff]  ;;  %v689_v35 = vld [vmem:[%s6999_s1 + $0x1490] sm:$0xff] }
  0x70   :  { %v3185_v41 = vpack.c.bf16 %v689_v35, %v687_v32  ;;  %v191_v17 = vld [vmem:[%s6999_s1 + $0x500] sm:$0xff] }
  0x71   :  { %2638 = vmatpush1.bf16.msra.mxu1 %v2637_v48  ;;  %v2657_v48 = vpack.c.bf16 %v161_v40, %v159_v39  ;;  %v694_v39 = vld [vmem:[%s6999_s1 + $0x14b8] sm:$0xff]  ;;  %v2673_v40 = vpack.c.bf16 %v177_v31, %v175_v29  ;;  %v703_v19 = vld [vmem:[%s6999_s1 + $0x1500] sm:$0xff] }
  0x72   :  { %3150 = vmatpush1.bf16.msra.mxu0 %v3149_v49  ;;  %2640 = vmatprep.subr.bf16.mxu1 %v2639_v50  ;;  %v163_v49 = vld [vmem:[%s6999_s1 + $0x420] sm:$0xff]  ;;  %v4525_v50 = vld [vmem:[%s7000_s0 + $0x8] sm:$0xff] }
  0x73   :  { %3152 = vmatprep.subr.bf16.mxu0 %v3151_v53  ;;  %v675_v53 = vld [vmem:[%s6999_s1 + $0x1420] sm:$0xff]  ;;  %v4535_v28 = vrot.slane %v4525_v50, %v3951_v11  ;;  %v2661_v0 = vpack.c.bf16 %v165_v52, %v163_v49  ;;  %v186_v49 = vld [vmem:[%s6999_s1 + $0x4d8] sm:$0xff]  ;;  %v2677_v52 = vpack.c.bf16 %v181_v44, %v179_v43 }
  0x74   :  { %v195_v32 = vld [vmem:[%s6999_s1 + $0x520] sm:$0xff] }
  0x75   :  { %2642 = vmatpush1.bf16.msra.mxu1 %v2641_v58  ;;  %v170_v58 = vld [vmem:[%s6999_s1 + $0x458] sm:$0xff]  ;;  %v1095_v63 = vcombine.high %v4535_v28, %v4535_v28  ;;  %v707_v35 = vld [vmem:[%s6999_s1 + $0x1520] sm:$0xff] }
  0x76   :  { %3154 = vmatpush1.bf16.msra.mxu0 %v3153_v59  ;;  %2644 = vmatprep.subr.bf16.mxu1 %v2643_v60  ;;  %v4553_v59 = vrot.slane %v4540_v54, %v3951_v11  ;;  %v680_v60 = vld [vmem:[%s6999_s1 + $0x1448] sm:$0xff]  ;;  %v2663_v2 = vpack.c.bf16 %v170_v58, %v168_v57  ;;  %v185_v57 = vld [vmem:[%s6999_s1 + $0x4d0] sm:$0xff]  ;;  %v695_v58 = vld [vmem:[%s6999_s1 + $0x14c0] sm:$0xff] }
  0x77   :  { %3156 = vmatprep.subr.bf16.mxu0 %v3155_v1  ;;  %v3175_v5 = vpack.c.bf16 %v682_v61, %v680_v60  ;;  %v697_v61 = vld [vmem:[%s6999_s1 + $0x14d0] sm:$0xff] }
  0x78   :  { %v1163_v1 = vcombine.high %v4553_v59, %v4553_v59  ;;  %v3193_v3 = vpack.c.bf16 %v697_v61, %v695_v58  ;;  %v203_v58 = vld [vmem:[%s6999_s1 + $0x560] sm:$0xff] }
  0x79   :  { %2646 = vmatpush1.bf16.msra.mxu1 %v2645_v7  ;;  %v172_v7 = vld [vmem:[%s6999_s1 + $0x468] sm:$0xff]  ;;  %v715_v61 = vld [vmem:[%s6999_s1 + $0x1560] sm:$0xff] }
  0x7a   :  { %3158 = vmatpush1.bf16.msra.mxu0 %v3157_v8  ;;  %2648 = vmatprep.subr.bf16.mxu1 %v2647_v9  ;;  %v174_v8 = vld [vmem:[%s6999_s1 + $0x478] sm:$0xff]  ;;  %v684_v9 = vld [vmem:[%s6999_s1 + $0x1468] sm:$0xff] }
  0x7b   :  { %3160 = vmatprep.subr.bf16.mxu0 %v3159_v14  ;;  %v2667_v14 = vpack.c.bf16 %v174_v8, %v172_v7  ;;  %v3179_v18 = vpack.c.bf16 %v686_v10, %v684_v9  ;;  %v701_v8 = vld [vmem:[%s6999_s1 + $0x14f0] sm:$0xff]  ;;  %v192_v9 = vld [vmem:[%s6999_s1 + $0x508] sm:$0xff]  ;;  %v194_v10 = vld [vmem:[%s6999_s1 + $0x518] sm:$0xff] }
  0x7c   :  { %v2687_v16 = vpack.c.bf16 %v194_v10, %v192_v9  ;;  %v721_v10 = vld [vmem:[%s6999_s1 + $0x1590] sm:$0xff] }
  0x7d   :  { %2650 = vmatpush1.bf16.msra.mxu1 %v2649_v20  ;;  %v176_v20 = vld [vmem:[%s6999_s1 + $0x488] sm:$0xff] }
  0x7e   :  { %3162 = vmatpush1.bf16.msra.mxu0 %v3161_v21  ;;  %2652 = vmatprep.subr.bf16.mxu1 %v2651_v22  ;;  %v178_v21 = vld [vmem:[%s6999_s1 + $0x498] sm:$0xff]  ;;  %v688_v22 = vld [vmem:[%s6999_s1 + $0x1488] sm:$0xff] }
  0x7f   :  { %3164 = vmatprep.subr.bf16.mxu0 %v3163_v27  ;;  %v2671_v27 = vpack.c.bf16 %v178_v21, %v176_v20  ;;  %v3183_v34 = vpack.c.bf16 %v690_v23, %v688_v22  ;;  %v705_v21 = vld [vmem:[%s6999_s1 + $0x1510] sm:$0xff]  ;;  %v196_v22 = vld [vmem:[%s6999_s1 + $0x528] sm:$0xff]  ;;  %v198_v23 = vld [vmem:[%s6999_s1 + $0x538] sm:$0xff] }
  0x80   :  { %v3201_v29 = vpack.c.bf16 %v705_v21, %v703_v19  ;;  %v2691_v31 = vpack.c.bf16 %v198_v23, %v196_v22  ;;  %v211_v19 = vld [vmem:[%s6999_s1 + $0x5a0] sm:$0xff]  ;;  %v725_v23 = vld [vmem:[%s6999_s1 + $0x15b0] sm:$0xff] }
  0x81   :  { %2654 = vmatpush1.bf16.msra.mxu1 %v2653_v36  ;;  %v180_v36 = vld [vmem:[%s6999_s1 + $0x4a8] sm:$0xff]  ;;  %v723_v21 = vld [vmem:[%s6999_s1 + $0x15a0] sm:$0xff] }
  0x82   :  { %3166 = vmatpush1.bf16.msra.mxu0 %v3165_v37  ;;  %2656 = vmatprep.subr.bf16.mxu1 %v2655_v38  ;;  %v182_v37 = vld [vmem:[%s6999_s1 + $0x4b8] sm:$0xff]  ;;  %v692_v38 = vld [vmem:[%s6999_s1 + $0x14a8] sm:$0xff] }
  0x83   :  { %3168 = vmatprep.subr.bf16.mxu0 %v3167_v42  ;;  %v2675_v42 = vpack.c.bf16 %v182_v37, %v180_v36  ;;  %v3187_v46 = vpack.c.bf16 %v694_v39, %v692_v38  ;;  %v709_v37 = vld [vmem:[%s6999_s1 + $0x1530] sm:$0xff]  ;;  %v200_v38 = vld [vmem:[%s6999_s1 + $0x548] sm:$0xff]  ;;  %v202_v39 = vld [vmem:[%s6999_s1 + $0x558] sm:$0xff] }
  0x84   :  { %1367 = vmatmul.mubr.f32.vlgmr.msra.gmra.mrb[0].mxu1 %v4118_v30  ;;  %v3173_v30 = vpack.c.bf16 %v677_v56, %v675_v53  ;;  %v3189_v53 = vpack.c.bf16 %v693_v47, %v691_v45  ;;  %v183_v56 = vld [vmem:[%s6999_s1 + $0x4c0] sm:$0xff]  ;;  %v3205_v43 = vpack.c.bf16 %v709_v37, %v707_v35  ;;  %v2695_v44 = vpack.c.bf16 %v202_v39, %v200_v38  ;;  %v729_v39 = vld [vmem:[%s6999_s1 + $0x15d0] sm:$0xff] }
  0x85   :  { %2658 = vmatpush1.bf16.msra.mxu1 %v2657_v48  ;;  %1935 = vmatmul.mubr.f32.vlgmr.msra.gmra.mrb[0].mxu0 %v4127_v33  ;;  %v679_v33 = vld [vmem:[%s6999_s1 + $0x1440] sm:$0xff]  ;;  %v184_v48 = vld [vmem:[%s6999_s1 + $0x4c8] sm:$0xff] }
  0x86   :  { %3170 = vmatpush1.bf16.msra.mxu0 %v3169_v25  ;;  %2660 = vmatprep.subr.bf16.mxu1 %v2659_v51  ;;  %v3177_v13 = vpack.c.bf16 %v681_v6, %v679_v33  ;;  %v696_v25 = vld [vmem:[%s6999_s1 + $0x14c8] sm:$0xff]  ;;  %v698_v51 = vld [vmem:[%s6999_s1 + $0x14d8] sm:$0xff]  ;;  %v187_v33 = vld [vmem:[%s6999_s1 + $0x4e0] sm:$0xff] }
  0x87   :  { %3172 = vmatprep.subr.bf16.mxu0 %v3171_v55  ;;  %1437 = vmatprep.mubr.f32.mxu1 %v1095_v63  ;;  %v2679_v55 = vpack.c.bf16 %v186_v49, %v184_v48  ;;  %v3191_v60 = vpack.c.bf16 %v698_v51, %v696_v25  ;;  %v188_v63 = vld [vmem:[%s6999_s1 + $0x4e8] sm:$0xff]  ;;  %v699_v6 = vld [vmem:[%s6999_s1 + $0x14e0] sm:$0xff]  ;;  %v713_v49 = vld [vmem:[%s6999_s1 + $0x1550] sm:$0xff] }
  0x88   :  { %2005 = vmatprep.mubr.f32.mxu0 %v1163_v1  ;;  %v700_v1 = vld [vmem:[%s6999_s1 + $0x14e8] sm:$0xff]  ;;  %v3197_v15 = vpack.c.bf16 %v701_v8, %v699_v6  ;;  %v199_v45 = vld [vmem:[%s6999_s1 + $0x540] sm:$0xff]  ;;  %v206_v51 = vld [vmem:[%s6999_s1 + $0x578] sm:$0xff] }
  0x89   :  { %2662 = vmatpush1.bf16.msra.mxu1 %v2661_v0  ;;  %v190_v0 = vld [vmem:[%s6999_s1 + $0x4f8] sm:$0xff]  ;;  %v711_v47 = vld [vmem:[%s6999_s1 + $0x1540] sm:$0xff]  ;;  %v204_v25 = vld [vmem:[%s6999_s1 + $0x568] sm:$0xff] }
  0x8a   :  { %3174 = vmatpush1.bf16.msra.mxu0 %v3173_v30  ;;  %2664 = vmatprep.subr.bf16.mxu1 %v2663_v2  ;;  %v702_v30 = vld [vmem:[%s6999_s1 + $0x14f8] sm:$0xff]  ;;  %v2681_v2 = vpack.c.bf16 %v185_v57, %v183_v56  ;;  %v2683_v4 = vpack.c.bf16 %v190_v0, %v188_v63  ;;  %v3209_v56 = vpack.c.bf16 %v713_v49, %v711_v47  ;;  %v717_v0 = vld [vmem:[%s6999_s1 + $0x1570] sm:$0xff]  ;;  %v207_v6 = vld [vmem:[%s6999_s1 + $0x580] sm:$0xff] }
  0x8b   :  { %3176 = vmatprep.subr.bf16.mxu0 %v3175_v5  ;;  %v189_v5 = vld [vmem:[%s6999_s1 + $0x4f0] sm:$0xff]  ;;  %v3195_v7 = vpack.c.bf16 %v702_v30, %v700_v1  ;;  %v2699_v57 = vpack.c.bf16 %v206_v51, %v204_v25  ;;  %v208_v1 = vld [vmem:[%s6999_s1 + $0x588] sm:$0xff]  ;;  %v210_v30 = vld [vmem:[%s6999_s1 + $0x598] sm:$0xff] }
  0x8c   :  { %v719_v8 = vld [vmem:[%s6999_s1 + $0x1580] sm:$0xff]  ;;  %v733_v51 = vld [vmem:[%s6999_s1 + $0x15f0] sm:$0xff] }
  0x8d   :  { %2666 = vmatpush1.bf16.msra.mxu1 %v2665_v12  ;;  %v704_v12 = vld [vmem:[%s6999_s1 + $0x1508] sm:$0xff]  ;;  %v215_v35 = vld [vmem:[%s6999_s1 + $0x5c0] sm:$0xff] }
  0x8e   :  { %3178 = vmatpush1.bf16.msra.mxu0 %v3177_v13  ;;  %2668 = vmatprep.subr.bf16.mxu1 %v2667_v14  ;;  %v706_v13 = vld [vmem:[%s6999_s1 + $0x1518] sm:$0xff]  ;;  %v2685_v14 = vpack.c.bf16 %v189_v5, %v187_v33  ;;  %v3213_v33 = vpack.c.bf16 %v717_v0, %v715_v61  ;;  %v2703_v5 = vpack.c.bf16 %v210_v30, %v208_v1  ;;  %v727_v37 = vld [vmem:[%s6999_s1 + $0x15c0] sm:$0xff]  ;;  %v225_v0 = vld [vmem:[%s6999_s1 + $0x610] sm:$0xff] }
  0x8f   :  { %3180 = vmatprep.subr.bf16.mxu0 %v3179_v18  ;;  %v193_v18 = vld [vmem:[%s6999_s1 + $0x510] sm:$0xff]  ;;  %v3199_v20 = vpack.c.bf16 %v706_v13, %v704_v12  ;;  %v212_v12 = vld [vmem:[%s6999_s1 + $0x5a8] sm:$0xff]  ;;  %v214_v13 = vld [vmem:[%s6999_s1 + $0x5b8] sm:$0xff] }
  0x90   :  { %v219_v47 = vld [vmem:[%s6999_s1 + $0x5e0] sm:$0xff]  ;;  %v737_v30 = vld [vmem:[%s6999_s1 + $0x1610] sm:$0xff] }
  0x91   :  { %2670 = vmatpush1.bf16.msra.mxu1 %v2669_v24  ;;  %v708_v24 = vld [vmem:[%s6999_s1 + $0x1528] sm:$0xff]  ;;  %v731_v49 = vld [vmem:[%s6999_s1 + $0x15e0] sm:$0xff] }
  0x92   :  { %3182 = vmatpush1.bf16.msra.mxu0 %v3181_v26  ;;  %2672 = vmatprep.subr.bf16.mxu1 %v2671_v27  ;;  %v710_v26 = vld [vmem:[%s6999_s1 + $0x1538] sm:$0xff]  ;;  %v2689_v27 = vpack.c.bf16 %v193_v18, %v191_v17  ;;  %v3217_v17 = vpack.c.bf16 %v721_v10, %v719_v8  ;;  %v2707_v18 = vpack.c.bf16 %v214_v13, %v212_v12  ;;  %v735_v1 = vld [vmem:[%s6999_s1 + $0x1600] sm:$0xff]  ;;  %v229_v12 = vld [vmem:[%s6999_s1 + $0x630] sm:$0xff] }
  0x93   :  { %3184 = vmatprep.subr.bf16.mxu0 %v3183_v34  ;;  %v197_v34 = vld [vmem:[%s6999_s1 + $0x530] sm:$0xff]  ;;  %v3203_v36 = vpack.c.bf16 %v710_v26, %v708_v24  ;;  %v216_v24 = vld [vmem:[%s6999_s1 + $0x5c8] sm:$0xff]  ;;  %v218_v26 = vld [vmem:[%s6999_s1 + $0x5d8] sm:$0xff]  ;;  %v3229_v61 = vpack.c.bf16 %v733_v51, %v731_v49  ;;  %v3233_v8 = vpack.c.bf16 %v737_v30, %v735_v1 }
  0x94   :  { %v227_v10 = vld [vmem:[%s6999_s1 + $0x620] sm:$0xff] }
  0x95   :  { %2674 = vmatpush1.bf16.msra.mxu1 %v2673_v40  ;;  %v712_v40 = vld [vmem:[%s6999_s1 + $0x1548] sm:$0xff]  ;;  %v739_v13 = vld [vmem:[%s6999_s1 + $0x1620] sm:$0xff] }
  0x96   :  { %3186 = vmatpush1.bf16.msra.mxu0 %v3185_v41  ;;  %2676 = vmatprep.subr.bf16.mxu1 %v2675_v42  ;;  %v714_v41 = vld [vmem:[%s6999_s1 + $0x1558] sm:$0xff]  ;;  %v2693_v42 = vpack.c.bf16 %v197_v34, %v195_v32  ;;  %v3221_v32 = vpack.c.bf16 %v725_v23, %v723_v21  ;;  %v2711_v34 = vpack.c.bf16 %v218_v26, %v216_v24  ;;  %v233_v26 = vld [vmem:[%s6999_s1 + $0x650] sm:$0xff]  ;;  %v239_v51 = vld [vmem:[%s6999_s1 + $0x680] sm:$0xff] }
  0x97   :  { %3188 = vmatprep.subr.bf16.mxu0 %v3187_v46  ;;  %v201_v46 = vld [vmem:[%s6999_s1 + $0x550] sm:$0xff]  ;;  %v3207_v48 = vpack.c.bf16 %v714_v41, %v712_v40  ;;  %v220_v40 = vld [vmem:[%s6999_s1 + $0x5e8] sm:$0xff]  ;;  %v222_v41 = vld [vmem:[%s6999_s1 + $0x5f8] sm:$0xff] }
  0x98   :  { %v243_v1 = vld [vmem:[%s6999_s1 + $0x6a0] sm:$0xff] }
  0x99   :  { %2678 = vmatpush1.bf16.msra.mxu1 %v2677_v52  ;;  %v716_v52 = vld [vmem:[%s6999_s1 + $0x1568] sm:$0xff]  ;;  %v755_v30 = vld [vmem:[%s6999_s1 + $0x16a0] sm:$0xff] }
  0x9a   :  { %3190 = vmatpush1.bf16.msra.mxu0 %v3189_v53  ;;  %2680 = vmatprep.subr.bf16.mxu1 %v2679_v55  ;;  %v718_v53 = vld [vmem:[%s6999_s1 + $0x1578] sm:$0xff]  ;;  %v2697_v55 = vpack.c.bf16 %v201_v46, %v199_v45  ;;  %v3225_v45 = vpack.c.bf16 %v729_v39, %v727_v37  ;;  %v2715_v46 = vpack.c.bf16 %v222_v41, %v220_v40  ;;  %v235_v39 = vld [vmem:[%s6999_s1 + $0x660] sm:$0xff]  ;;  %v237_v40 = vld [vmem:[%s6999_s1 + $0x670] sm:$0xff] }
  0x9b   :  { %3192 = vmatprep.subr.bf16.mxu0 %v3191_v60  ;;  %v205_v60 = vld [vmem:[%s6999_s1 + $0x570] sm:$0xff]  ;;  %v3211_v63 = vpack.c.bf16 %v718_v53, %v716_v52  ;;  %v224_v52 = vld [vmem:[%s6999_s1 + $0x608] sm:$0xff]  ;;  %v226_v53 = vld [vmem:[%s6999_s1 + $0x618] sm:$0xff] }
  0x9c   :  { %v747_v41 = vld [vmem:[%s6999_s1 + $0x1660] sm:$0xff] }
  0x9d   :  { %2682 = vmatpush1.bf16.msra.mxu1 %v2681_v2  ;;  %v720_v2 = vld [vmem:[%s6999_s1 + $0x1588] sm:$0xff] }
  0x9e   :  { %3194 = vmatpush1.bf16.msra.mxu0 %v3193_v3  ;;  %2684 = vmatprep.subr.bf16.mxu1 %v2683_v4  ;;  %v722_v3 = vld [vmem:[%s6999_s1 + $0x1598] sm:$0xff]  ;;  %v2701_v4 = vpack.c.bf16 %v205_v60, %v203_v58  ;;  %v1148_v58 = vcombine.high %v4540_v54, %v4540_v54 }
  0x9f   :  { %3196 = vmatprep.subr.bf16.mxu0 %v3195_v7  ;;  %v209_v7 = vld [vmem:[%s6999_s1 + $0x590] sm:$0xff]  ;;  %v3215_v9 = vpack.c.bf16 %v722_v3, %v720_v2  ;;  %v228_v2 = vld [vmem:[%s6999_s1 + $0x628] sm:$0xff]  ;;  %v230_v3 = vld [vmem:[%s6999_s1 + $0x638] sm:$0xff] }
  0xa1   :  { %2686 = vmatpush1.bf16.msra.mxu1 %v2685_v14  ;;  %v724_v14 = vld [vmem:[%s6999_s1 + $0x15a8] sm:$0xff] }
  0xa2   :  { %3198 = vmatpush1.bf16.msra.mxu0 %v3197_v15  ;;  %2688 = vmatprep.subr.bf16.mxu1 %v2687_v16  ;;  %v726_v15 = vld [vmem:[%s6999_s1 + $0x15b8] sm:$0xff]  ;;  %v2705_v16 = vpack.c.bf16 %v209_v7, %v207_v6  ;;  %v4935_v6 = vrot.slane %v1148_v58, %v3951_v11 }
  0xa3   :  { %3200 = vmatprep.subr.bf16.mxu0 %v3199_v20  ;;  %v213_v20 = vld [vmem:[%s6999_s1 + $0x5b0] sm:$0xff]  ;;  %v3219_v22 = vpack.c.bf16 %v726_v15, %v724_v14  ;;  %v246_v58 = vld [vmem:[%s6999_s1 + $0x6b8] sm:$0xff] }
  0xa4   :  { %v741_v15 = vld [vmem:[%s6999_s1 + $0x1630] sm:$0xff]  ;;  %v1164_v21 = vcombine.high %v4935_v6, %v4935_v6 }
  0xa5   :  { %2690 = vmatpush1.bf16.msra.mxu1 %v2689_v27  ;;  %v728_v27 = vld [vmem:[%s6999_s1 + $0x15c8] sm:$0xff]  ;;  %v3237_v23 = vpack.c.bf16 %v741_v15, %v739_v13  ;;  %v247_v13 = vld [vmem:[%s6999_s1 + $0x6c0] sm:$0xff] }
  0xa6   :  { %3202 = vmatpush1.bf16.msra.mxu0 %v3201_v29  ;;  %2692 = vmatprep.subr.bf16.mxu1 %v2691_v31  ;;  %v730_v29 = vld [vmem:[%s6999_s1 + $0x15d8] sm:$0xff]  ;;  %v2709_v31 = vpack.c.bf16 %v213_v20, %v211_v19  ;;  %v744_v19 = vld [vmem:[%s6999_s1 + $0x1648] sm:$0xff]  ;;  %v759_v15 = vld [vmem:[%s6999_s1 + $0x16c0] sm:$0xff] }
  0xa7   :  { %3204 = vmatprep.subr.bf16.mxu0 %v3203_v36  ;;  %v217_v36 = vld [vmem:[%s6999_s1 + $0x5d0] sm:$0xff]  ;;  %v3223_v38 = vpack.c.bf16 %v730_v29, %v728_v27  ;;  %v746_v20 = vld [vmem:[%s6999_s1 + $0x1658] sm:$0xff]  ;;  %v743_v27 = vld [vmem:[%s6999_s1 + $0x1640] sm:$0xff] }
  0xa8   :  { %v3239_v29 = vpack.c.bf16 %v746_v20, %v744_v19  ;;  %v254_v19 = vld [vmem:[%s6999_s1 + $0x6f8] sm:$0xff]  ;;  %v764_v20 = vld [vmem:[%s6999_s1 + $0x16e8] sm:$0xff] }
  0xa9   :  { %2694 = vmatpush1.bf16.msra.mxu1 %v2693_v42  ;;  %v732_v42 = vld [vmem:[%s6999_s1 + $0x15e8] sm:$0xff] }
  0xaa   :  { %3206 = vmatpush1.bf16.msra.mxu0 %v3205_v43  ;;  %2696 = vmatprep.subr.bf16.mxu1 %v2695_v44  ;;  %v734_v43 = vld [vmem:[%s6999_s1 + $0x15f8] sm:$0xff]  ;;  %v2713_v44 = vpack.c.bf16 %v217_v36, %v215_v35 }
  0xab   :  { %3208 = vmatprep.subr.bf16.mxu0 %v3207_v48  ;;  %v221_v48 = vld [vmem:[%s6999_s1 + $0x5f0] sm:$0xff]  ;;  %v3227_v25 = vpack.c.bf16 %v734_v43, %v732_v42  ;;  %v750_v35 = vld [vmem:[%s6999_s1 + $0x1678] sm:$0xff] }
  0xac   :  { %v2717_v60 = vpack.c.bf16 %v221_v48, %v219_v47  ;;  %v749_v43 = vld [vmem:[%s6999_s1 + $0x1670] sm:$0xff]  ;;  %v754_v47 = vld [vmem:[%s6999_s1 + $0x1698] sm:$0xff]  ;;  %v2733_v48 = vpack.c.bf16 %v237_v40, %v235_v39  ;;  %v255_v39 = vld [vmem:[%s6999_s1 + $0x700] sm:$0xff] }
  0xad   :  { %2698 = vmatpush1.bf16.msra.mxu1 %v2697_v55  ;;  %v1080_v55 = vcombine.high %v4525_v50, %v4525_v50  ;;  %v223_v50 = vld [vmem:[%s6999_s1 + $0x600] sm:$0xff]  ;;  %v3245_v49 = vpack.c.bf16 %v749_v43, %v747_v41  ;;  %v257_v40 = vld [vmem:[%s6999_s1 + $0x710] sm:$0xff] }
  0xae   :  { %3210 = vmatpush1.bf16.msra.mxu0 %v3209_v56  ;;  %2700 = vmatprep.subr.bf16.mxu1 %v2699_v57  ;;  %v736_v56 = vld [vmem:[%s6999_s1 + $0x1608] sm:$0xff]  ;;  %v738_v57 = vld [vmem:[%s6999_s1 + $0x1618] sm:$0xff]  ;;  %v2721_v7 = vpack.c.bf16 %v225_v0, %v223_v50  ;;  %v767_v41 = vld [vmem:[%s6999_s1 + $0x1700] sm:$0xff] }
  0xaf   :  { %3212 = vmatprep.subr.bf16.mxu0 %v3211_v63  ;;  %v2719_v63 = vpack.c.bf16 %v226_v53, %v224_v52  ;;  %v3231_v54 = vpack.c.bf16 %v738_v57, %v736_v56  ;;  %v241_v52 = vld [vmem:[%s6999_s1 + $0x690] sm:$0xff]  ;;  %v751_v53 = vld [vmem:[%s6999_s1 + $0x1680] sm:$0xff]  ;;  %v244_v57 = vld [vmem:[%s6999_s1 + $0x6a8] sm:$0xff] }
  0xb0   :  { %v753_v56 = vld [vmem:[%s6999_s1 + $0x1690] sm:$0xff]  ;;  %v2739_v0 = vpack.c.bf16 %v246_v58, %v244_v57  ;;  %v264_v57 = vld [vmem:[%s6999_s1 + $0x748] sm:$0xff]  ;;  %v266_v58 = vld [vmem:[%s6999_s1 + $0x758] sm:$0xff] }
  0xb1   :  { %2702 = vmatpush1.bf16.msra.mxu1 %v2701_v4  ;;  %v4926_v4 = vrot.slane %v1080_v55, %v3951_v11  ;;  %v3249_v50 = vpack.c.bf16 %v753_v56, %v751_v53  ;;  %v769_v43 = vld [vmem:[%s6999_s1 + $0x1710] sm:$0xff]  ;;  %v771_v53 = vld [vmem:[%s6999_s1 + $0x1720] sm:$0xff] }
  0xb2   :  { %3214 = vmatpush1.bf16.msra.mxu0 %v3213_v33  ;;  %2704 = vmatprep.subr.bf16.mxu1 %v2703_v5  ;;  %v740_v33 = vld [vmem:[%s6999_s1 + $0x1628] sm:$0xff]  ;;  %v742_v5 = vld [vmem:[%s6999_s1 + $0x1638] sm:$0xff]  ;;  %v773_v56 = vld [vmem:[%s6999_s1 + $0x1730] sm:$0xff] }
  0xb3   :  { %3216 = vmatprep.subr.bf16.mxu0 %v3215_v9  ;;  %v2723_v9 = vpack.c.bf16 %v230_v3, %v228_v2  ;;  %v3235_v14 = vpack.c.bf16 %v742_v5, %v740_v33  ;;  %v757_v3 = vld [vmem:[%s6999_s1 + $0x16b0] sm:$0xff]  ;;  %v248_v33 = vld [vmem:[%s6999_s1 + $0x6c8] sm:$0xff]  ;;  %v250_v5 = vld [vmem:[%s6999_s1 + $0x6d8] sm:$0xff] }
  0xb5   :  { %2706 = vmatpush1.bf16.msra.mxu1 %v2705_v16  ;;  %v232_v16 = vld [vmem:[%s6999_s1 + $0x648] sm:$0xff] }
  0xb6   :  { %3218 = vmatpush1.bf16.msra.mxu0 %v3217_v17  ;;  %2708 = vmatprep.subr.bf16.mxu1 %v2707_v18  ;;  %v234_v17 = vld [vmem:[%s6999_s1 + $0x658] sm:$0xff]  ;;  %v1096_v18 = vcombine.high %v4926_v4, %v4926_v4 }
  0xb7   :  { %3220 = vmatprep.subr.bf16.mxu0 %v3219_v22  ;;  %v2725_v22 = vpack.c.bf16 %v229_v12, %v227_v10  ;;  %v2727_v24 = vpack.c.bf16 %v234_v17, %v232_v16  ;;  %v3253_v10 = vpack.c.bf16 %v757_v3, %v755_v30  ;;  %v2743_v12 = vpack.c.bf16 %v250_v5, %v248_v33  ;;  %v761_v17 = vld [vmem:[%s6999_s1 + $0x16d0] sm:$0xff]  ;;  %v775_v30 = vld [vmem:[%s6999_s1 + $0x1740] sm:$0xff]  ;;  %v268_v33 = vld [vmem:[%s6999_s1 + $0x768] sm:$0xff] }
  0xb8   :  { %v777_v3 = vld [vmem:[%s6999_s1 + $0x1750] sm:$0xff]  ;;  %v270_v5 = vld [vmem:[%s6999_s1 + $0x778] sm:$0xff] }
  0xb9   :  { %2710 = vmatpush1.bf16.msra.mxu1 %v2709_v31  ;;  %v236_v31 = vld [vmem:[%s6999_s1 + $0x668] sm:$0xff] }
  0xba   :  { %3222 = vmatpush1.bf16.msra.mxu0 %v3221_v32  ;;  %2712 = vmatprep.subr.bf16.mxu1 %v2711_v34  ;;  %v238_v32 = vld [vmem:[%s6999_s1 + $0x678] sm:$0xff]  ;;  %v748_v34 = vld [vmem:[%s6999_s1 + $0x1668] sm:$0xff] }
  0xbb   :  { %3224 = vmatprep.subr.bf16.mxu0 %v3223_v38  ;;  %v2731_v38 = vpack.c.bf16 %v238_v32, %v236_v31  ;;  %v3243_v42 = vpack.c.bf16 %v750_v35, %v748_v34  ;;  %v256_v31 = vld [vmem:[%s6999_s1 + $0x708] sm:$0xff]  ;;  %v258_v32 = vld [vmem:[%s6999_s1 + $0x718] sm:$0xff] }
  0xbc   :  { %v768_v34 = vld [vmem:[%s6999_s1 + $0x1708] sm:$0xff]  ;;  %v770_v35 = vld [vmem:[%s6999_s1 + $0x1718] sm:$0xff] }
  0xbd   :  { %2714 = vmatpush1.bf16.msra.mxu1 %v2713_v44  ;;  %v240_v44 = vld [vmem:[%s6999_s1 + $0x688] sm:$0xff] }
  0xbe   :  { %3226 = vmatpush1.bf16.msra.mxu0 %v3225_v45  ;;  %2716 = vmatprep.subr.bf16.mxu1 %v2715_v46  ;;  %v242_v45 = vld [vmem:[%s6999_s1 + $0x698] sm:$0xff]  ;;  %v752_v46 = vld [vmem:[%s6999_s1 + $0x1688] sm:$0xff] }
  0xbf   :  { %3228 = vmatprep.subr.bf16.mxu0 %v3227_v25  ;;  %v2735_v25 = vpack.c.bf16 %v242_v45, %v240_v44  ;;  %v3247_v55 = vpack.c.bf16 %v754_v47, %v752_v46  ;;  %v260_v44 = vld [vmem:[%s6999_s1 + $0x728] sm:$0xff]  ;;  %v262_v45 = vld [vmem:[%s6999_s1 + $0x738] sm:$0xff] }
  0xc0   :  { %v772_v46 = vld [vmem:[%s6999_s1 + $0x1728] sm:$0xff]  ;;  %v774_v47 = vld [vmem:[%s6999_s1 + $0x1738] sm:$0xff] }
  0xc1   :  { %2718 = vmatpush1.bf16.msra.mxu1 %v2717_v60  ;;  %v756_v60 = vld [vmem:[%s6999_s1 + $0x16a8] sm:$0xff] }
  0xc2   :  { %3230 = vmatpush1.bf16.msra.mxu0 %v3229_v61  ;;  %2720 = vmatprep.subr.bf16.mxu1 %v2719_v63  ;;  %v758_v61 = vld [vmem:[%s6999_s1 + $0x16b8] sm:$0xff]  ;;  %v2737_v63 = vpack.c.bf16 %v241_v52, %v239_v51  ;;  %v259_v51 = vld [vmem:[%s6999_s1 + $0x720] sm:$0xff]  ;;  %v261_v52 = vld [vmem:[%s6999_s1 + $0x730] sm:$0xff] }
  0xc3   :  { %3232 = vmatprep.subr.bf16.mxu0 %v3231_v54  ;;  %v245_v54 = vld [vmem:[%s6999_s1 + $0x6b0] sm:$0xff]  ;;  %v3251_v2 = vpack.c.bf16 %v758_v61, %v756_v60  ;;  %v776_v60 = vld [vmem:[%s6999_s1 + $0x1748] sm:$0xff]  ;;  %v778_v61 = vld [vmem:[%s6999_s1 + $0x1758] sm:$0xff] }
  0xc4   :  { %1438 = vmatmul.mubr.f32.vlgmr.msra.gmra.mrb[0].mxu1 %v4535_v28  ;;  %v231_v28 = vld [vmem:[%s6999_s1 + $0x640] sm:$0xff] }
  0xc5   :  { %2722 = vmatpush1.bf16.msra.mxu1 %v2721_v7  ;;  %2006 = vmatmul.mubr.f32.vlgmr.msra.gmra.mrb[0].mxu0 %v4553_v59  ;;  %v745_v59 = vld [vmem:[%s6999_s1 + $0x1650] sm:$0xff]  ;;  %v2729_v36 = vpack.c.bf16 %v233_v26, %v231_v28  ;;  %v760_v7 = vld [vmem:[%s6999_s1 + $0x16c8] sm:$0xff]  ;;  %v251_v28 = vld [vmem:[%s6999_s1 + $0x6e0] sm:$0xff] }
  0xc6   :  { %3234 = vmatpush1.bf16.msra.mxu0 %v3233_v8  ;;  %2724 = vmatprep.subr.bf16.mxu1 %v2723_v9  ;;  %v3241_v37 = vpack.c.bf16 %v745_v59, %v743_v27  ;;  %v762_v8 = vld [vmem:[%s6999_s1 + $0x16d8] sm:$0xff]  ;;  %v2741_v9 = vpack.c.bf16 %v245_v54, %v243_v1  ;;  %v253_v26 = vld [vmem:[%s6999_s1 + $0x6f0] sm:$0xff]  ;;  %v763_v27 = vld [vmem:[%s6999_s1 + $0x16e0] sm:$0xff] }
  0xc7   :  { %3236 = vmatprep.subr.bf16.mxu0 %v3235_v14  ;;  %1508 = vmatprep.mubr.f32.mxu1 %v1096_v18  ;;  %v249_v14 = vld [vmem:[%s6999_s1 + $0x6d0] sm:$0xff]  ;;  %v3255_v16 = vpack.c.bf16 %v762_v8, %v760_v7  ;;  %v252_v18 = vld [vmem:[%s6999_s1 + $0x6e8] sm:$0xff]  ;;  %v263_v1 = vld [vmem:[%s6999_s1 + $0x740] sm:$0xff] }
  0xc8   :  { %2076 = vmatprep.mubr.f32.mxu0 %v1164_v21  ;;  %v766_v21 = vld [vmem:[%s6999_s1 + $0x16f8] sm:$0xff]  ;;  %v765_v59 = vld [vmem:[%s6999_s1 + $0x16f0] sm:$0xff]  ;;  %v780_v7 = vld [vmem:[%s6999_s1 + $0x1768] sm:$0xff] }
  0xc9   :  { %2726 = vmatpush1.bf16.msra.mxu1 %v2725_v22  ;;  %v2745_v22 = vpack.c.bf16 %v249_v14, %v247_v13  ;;  %v265_v54 = vld [vmem:[%s6999_s1 + $0x750] sm:$0xff]  ;;  %v782_v8 = vld [vmem:[%s6999_s1 + $0x1778] sm:$0xff]  ;;  %v267_v13 = vld [vmem:[%s6999_s1 + $0x760] sm:$0xff] }
  0xca   :  { %3238 = vmatpush1.bf16.msra.mxu0 %v3237_v23  ;;  %2728 = vmatprep.subr.bf16.mxu1 %v2727_v24  ;;  %v3257_v23 = vpack.c.bf16 %v761_v17, %v759_v15  ;;  %v2747_v24 = vpack.c.bf16 %v254_v19, %v252_v18  ;;  %v269_v14 = vld [vmem:[%s6999_s1 + $0x770] sm:$0xff]  ;;  %v779_v15 = vld [vmem:[%s6999_s1 + $0x1760] sm:$0xff]  ;;  %v272_v18 = vld [vmem:[%s6999_s1 + $0x788] sm:$0xff] }
  0xcb   :  { %3240 = vmatprep.subr.bf16.mxu0 %v3239_v29  ;;  %v3259_v29 = vpack.c.bf16 %v766_v21, %v764_v20  ;;  %v781_v17 = vld [vmem:[%s6999_s1 + $0x1770] sm:$0xff]  ;;  %v274_v19 = vld [vmem:[%s6999_s1 + $0x798] sm:$0xff]  ;;  %v784_v20 = vld [vmem:[%s6999_s1 + $0x1788] sm:$0xff] }
  0xcc   :  { %v786_v21 = vld [vmem:[%s6999_s1 + $0x1798] sm:$0xff] }
  0xcd   :  { %2730 = vmatpush1.bf16.msra.mxu1 %v2729_v36  ;;  %v2749_v36 = vpack.c.bf16 %v253_v26, %v251_v28  ;;  %v271_v28 = vld [vmem:[%s6999_s1 + $0x780] sm:$0xff]  ;;  %v273_v26 = vld [vmem:[%s6999_s1 + $0x790] sm:$0xff] }
  0xce   :  { %3242 = vmatpush1.bf16.msra.mxu0 %v3241_v37  ;;  %2732 = vmatprep.subr.bf16.mxu1 %v2731_v38  ;;  %v3261_v37 = vpack.c.bf16 %v765_v59, %v763_v27  ;;  %v2751_v38 = vpack.c.bf16 %v258_v32, %v256_v31  ;;  %v783_v27 = vld [vmem:[%s6999_s1 + $0x1780] sm:$0xff]  ;;  %v785_v59 = vld [vmem:[%s6999_s1 + $0x1790] sm:$0xff]  ;;  %v276_v31 = vld [vmem:[%s6999_s1 + $0x7a8] sm:$0xff] }
  0xcf   :  { %3244 = vmatprep.subr.bf16.mxu0 %v3243_v42  ;;  %v3263_v42 = vpack.c.bf16 %v770_v35, %v768_v34  ;;  %v278_v32 = vld [vmem:[%s6999_s1 + $0x7b8] sm:$0xff]  ;;  %v788_v34 = vld [vmem:[%s6999_s1 + $0x17a8] sm:$0xff] }
  0xd0   :  { %v790_v35 = vld [vmem:[%s6999_s1 + $0x17b8] sm:$0xff] }
  0xd1   :  { %2734 = vmatpush1.bf16.msra.mxu1 %v2733_v48  ;;  %v2753_v48 = vpack.c.bf16 %v257_v40, %v255_v39  ;;  %v275_v39 = vld [vmem:[%s6999_s1 + $0x7a0] sm:$0xff]  ;;  %v277_v40 = vld [vmem:[%s6999_s1 + $0x7b0] sm:$0xff] }
  0xd2   :  { %3246 = vmatpush1.bf16.msra.mxu0 %v3245_v49  ;;  %2736 = vmatprep.subr.bf16.mxu1 %v2735_v25  ;;  %v3265_v49 = vpack.c.bf16 %v769_v43, %v767_v41  ;;  %v2755_v25 = vpack.c.bf16 %v262_v45, %v260_v44  ;;  %v787_v41 = vld [vmem:[%s6999_s1 + $0x17a0] sm:$0xff]  ;;  %v789_v43 = vld [vmem:[%s6999_s1 + $0x17b0] sm:$0xff]  ;;  %v280_v44 = vld [vmem:[%s6999_s1 + $0x7c8] sm:$0xff] }
  0xd3   :  { %3248 = vmatprep.subr.bf16.mxu0 %v3247_v55  ;;  %v3267_v55 = vpack.c.bf16 %v774_v47, %v772_v46  ;;  %v282_v45 = vld [vmem:[%s6999_s1 + $0x7d8] sm:$0xff]  ;;  %v792_v46 = vld [vmem:[%s6999_s1 + $0x17c8] sm:$0xff] }
  0xd4   :  { %v794_v47 = vld [vmem:[%s6999_s1 + $0x17d8] sm:$0xff] }
  0xd5   :  { %2738 = vmatpush1.bf16.msra.mxu1 %v2737_v63  ;;  %v2757_v63 = vpack.c.bf16 %v261_v52, %v259_v51  ;;  %v279_v51 = vld [vmem:[%s6999_s1 + $0x7c0] sm:$0xff]  ;;  %v281_v52 = vld [vmem:[%s6999_s1 + $0x7d0] sm:$0xff] }
  0xd6   :  { %3250 = vmatpush1.bf16.msra.mxu0 %v3249_v50  ;;  %2740 = vmatprep.subr.bf16.mxu1 %v2739_v0  ;;  %v3269_v50 = vpack.c.bf16 %v773_v56, %v771_v53  ;;  %v2759_v0 = vpack.c.bf16 %v266_v58, %v264_v57  ;;  %v791_v53 = vld [vmem:[%s6999_s1 + $0x17c0] sm:$0xff]  ;;  %v793_v56 = vld [vmem:[%s6999_s1 + $0x17d0] sm:$0xff]  ;;  %v284_v57 = vld [vmem:[%s6999_s1 + $0x7e8] sm:$0xff] }
  0xd7   :  { %3252 = vmatprep.subr.bf16.mxu0 %v3251_v2  ;;  %v3271_v2 = vpack.c.bf16 %v778_v61, %v776_v60  ;;  %v286_v58 = vld [vmem:[%s6999_s1 + $0x7f8] sm:$0xff]  ;;  %v796_v60 = vld [vmem:[%s6999_s1 + $0x17e8] sm:$0xff] }
  0xd8   :  { %v798_v61 = vld [vmem:[%s6999_s1 + $0x17f8] sm:$0xff] }
  0xd9   :  { %2742 = vmatpush1.bf16.msra.mxu1 %v2741_v9  ;;  %v2761_v9 = vpack.c.bf16 %v265_v54, %v263_v1  ;;  %v283_v1 = vld [vmem:[%s6999_s1 + $0x7e0] sm:$0xff]  ;;  %v285_v54 = vld [vmem:[%s6999_s1 + $0x7f0] sm:$0xff] }
  0xda   :  { %3254 = vmatpush1.bf16.msra.mxu0 %v3253_v10  ;;  %2744 = vmatprep.subr.bf16.mxu1 %v2743_v12  ;;  %v3273_v10 = vpack.c.bf16 %v777_v3, %v775_v30  ;;  %v2763_v12 = vpack.c.bf16 %v270_v5, %v268_v33  ;;  %v795_v30 = vld [vmem:[%s6999_s1 + $0x17e0] sm:$0xff]  ;;  %v797_v3 = vld [vmem:[%s6999_s1 + $0x17f0] sm:$0xff]  ;;  %v288_v33 = vld [vmem:[%s6999_s1 + $0x808] sm:$0xff] }
  0xdb   :  { %3256 = vmatprep.subr.bf16.mxu0 %v3255_v16  ;;  %v3275_v16 = vpack.c.bf16 %v782_v8, %v780_v7  ;;  %v290_v5 = vld [vmem:[%s6999_s1 + $0x818] sm:$0xff]  ;;  %v800_v7 = vld [vmem:[%s6999_s1 + $0x1808] sm:$0xff] }
  0xdc   :  { %v802_v8 = vld [vmem:[%s6999_s1 + $0x1818] sm:$0xff] }
  0xdd   :  { %2746 = vmatpush1.bf16.msra.mxu1 %v2745_v22  ;;  %v2765_v22 = vpack.c.bf16 %v269_v14, %v267_v13  ;;  %v3293_v13 = vpack.c.bf16 %v797_v3, %v795_v30  ;;  %v2783_v14 = vpack.c.bf16 %v290_v5, %v288_v33  ;;  %v303_v3 = vld [vmem:[%s6999_s1 + $0x880] sm:$0xff]  ;;  %v305_v33 = vld [vmem:[%s6999_s1 + $0x890] sm:$0xff] }
  0xde   :  { %3258 = vmatpush1.bf16.msra.mxu0 %v3257_v23  ;;  %2748 = vmatprep.subr.bf16.mxu1 %v2747_v24  ;;  %v3277_v23 = vpack.c.bf16 %v781_v17, %v779_v15  ;;  %v2767_v24 = vpack.c.bf16 %v274_v19, %v272_v18  ;;  %v287_v15 = vld [vmem:[%s6999_s1 + $0x800] sm:$0xff]  ;;  %v3295_v18 = vpack.c.bf16 %v802_v8, %v800_v7  ;;  %v801_v19 = vld [vmem:[%s6999_s1 + $0x1810] sm:$0xff] }
  0xdf   :  { %3260 = vmatprep.subr.bf16.mxu0 %v3259_v29  ;;  %v3279_v29 = vpack.c.bf16 %v786_v21, %v784_v20  ;;  %v799_v17 = vld [vmem:[%s6999_s1 + $0x1800] sm:$0xff]  ;;  %v292_v20 = vld [vmem:[%s6999_s1 + $0x828] sm:$0xff]  ;;  %v294_v21 = vld [vmem:[%s6999_s1 + $0x838] sm:$0xff] }
  0xe0   :  { %v815_v5 = vld [vmem:[%s6999_s1 + $0x1880] sm:$0xff]  ;;  %v817_v8 = vld [vmem:[%s6999_s1 + $0x1890] sm:$0xff] }
  0xe1   :  { %2750 = vmatpush1.bf16.msra.mxu1 %v2749_v36  ;;  %v2769_v36 = vpack.c.bf16 %v273_v26, %v271_v28 }
  0xe2   :  { %3262 = vmatpush1.bf16.msra.mxu0 %v3261_v37  ;;  %2752 = vmatprep.subr.bf16.mxu1 %v2751_v38  ;;  %v3281_v37 = vpack.c.bf16 %v785_v59, %v783_v27  ;;  %v2771_v38 = vpack.c.bf16 %v278_v32, %v276_v31  ;;  %v3297_v27 = vpack.c.bf16 %v801_v19, %v799_v17  ;;  %v291_v59 = vld [vmem:[%s6999_s1 + $0x820] sm:$0xff]  ;;  %v293_v31 = vld [vmem:[%s6999_s1 + $0x830] sm:$0xff] }
  0xe3   :  { %3264 = vmatprep.subr.bf16.mxu0 %v3263_v42  ;;  %v3283_v42 = vpack.c.bf16 %v790_v35, %v788_v34  ;;  %v803_v32 = vld [vmem:[%s6999_s1 + $0x1820] sm:$0xff]  ;;  %v805_v35 = vld [vmem:[%s6999_s1 + $0x1830] sm:$0xff]  ;;  %v3313_v17 = vpack.c.bf16 %v817_v8, %v815_v5 }
  0xe4   :  { %v307_v19 = vld [vmem:[%s6999_s1 + $0x8a0] sm:$0xff] }
  0xe5   :  { %2754 = vmatpush1.bf16.msra.mxu1 %v2753_v48  ;;  %v2773_v48 = vpack.c.bf16 %v277_v40, %v275_v39  ;;  %v808_v39 = vld [vmem:[%s6999_s1 + $0x1848] sm:$0xff]  ;;  %v810_v40 = vld [vmem:[%s6999_s1 + $0x1858] sm:$0xff]  ;;  %v323_v5 = vld [vmem:[%s6999_s1 + $0x920] sm:$0xff] }
  0xe6   :  { %3266 = vmatpush1.bf16.msra.mxu0 %v3265_v49  ;;  %2756 = vmatprep.subr.bf16.mxu1 %v2755_v25  ;;  %v3285_v49 = vpack.c.bf16 %v789_v43, %v787_v41  ;;  %v2775_v25 = vpack.c.bf16 %v282_v45, %v280_v44  ;;  %v3301_v43 = vpack.c.bf16 %v805_v35, %v803_v32  ;;  %v297_v45 = vld [vmem:[%s6999_s1 + $0x850] sm:$0xff]  ;;  %v311_v35 = vld [vmem:[%s6999_s1 + $0x8c0] sm:$0xff] }
  0xe7   :  { %3268 = vmatprep.subr.bf16.mxu0 %v3267_v55  ;;  %v3287_v55 = vpack.c.bf16 %v794_v47, %v792_v46  ;;  %v807_v46 = vld [vmem:[%s6999_s1 + $0x1840] sm:$0xff]  ;;  %v3303_v47 = vpack.c.bf16 %v810_v40, %v808_v39  ;;  %v825_v39 = vld [vmem:[%s6999_s1 + $0x18d0] sm:$0xff]  ;;  %v316_v40 = vld [vmem:[%s6999_s1 + $0x8e8] sm:$0xff] }
  0xe8   :  { %v835_v8 = vld [vmem:[%s6999_s1 + $0x1920] sm:$0xff] }
  0xe9   :  { %2758 = vmatpush1.bf16.msra.mxu1 %v2757_v63  ;;  %v2777_v63 = vpack.c.bf16 %v281_v52, %v279_v51  ;;  %v814_v51 = vld [vmem:[%s6999_s1 + $0x1878] sm:$0xff] }
  0xea   :  { %3270 = vmatpush1.bf16.msra.mxu0 %v3269_v50  ;;  %2760 = vmatprep.subr.bf16.mxu1 %v2759_v0  ;;  %v3289_v50 = vpack.c.bf16 %v793_v56, %v791_v53  ;;  %v2779_v0 = vpack.c.bf16 %v286_v58, %v284_v57  ;;  %v299_v56 = vld [vmem:[%s6999_s1 + $0x860] sm:$0xff]  ;;  %v301_v57 = vld [vmem:[%s6999_s1 + $0x870] sm:$0xff] }
  0xeb   :  { %3272 = vmatprep.subr.bf16.mxu0 %v3271_v2  ;;  %v3291_v2 = vpack.c.bf16 %v798_v61, %v796_v60  ;;  %v811_v58 = vld [vmem:[%s6999_s1 + $0x1860] sm:$0xff]  ;;  %v813_v61 = vld [vmem:[%s6999_s1 + $0x1870] sm:$0xff] }
  0xec   :  { %v3309_v30 = vpack.c.bf16 %v813_v61, %v811_v58  ;;  %v319_v58 = vld [vmem:[%s6999_s1 + $0x900] sm:$0xff] }
  0xed   :  { %2762 = vmatpush1.bf16.msra.mxu1 %v2761_v9  ;;  %v5306_v9 = vld [vmem:[%s7000_s0 + $0x10] sm:$0xff]  ;;  %v831_v61 = vld [vmem:[%s6999_s1 + $0x1900] sm:$0xff] }
  0xee   :  { %3274 = vmatpush1.bf16.msra.mxu0 %v3273_v10  ;;  %2764 = vmatprep.subr.bf16.mxu1 %v2763_v12  ;;  %v2781_v10 = vpack.c.bf16 %v285_v54, %v283_v1  ;;  %v5311_v12 = vld [vmem:[%s7000_s0 + $0x30] sm:$0xff]  ;;  %v818_v1 = vld [vmem:[%s6999_s1 + $0x1898] sm:$0xff]  ;;  %v2797_v54 = vpack.c.bf16 %v301_v57, %v299_v56 }
  0xef   :  { %3276 = vmatprep.subr.bf16.mxu0 %v3275_v16  ;;  %v289_v16 = vld [vmem:[%s6999_s1 + $0x810] sm:$0xff]  ;;  %v5343_v28 = vrot.slane %v5311_v12, %v3951_v11 }
  0xf0   :  { %v2785_v26 = vpack.c.bf16 %v289_v16, %v287_v15  ;;  %v822_v15 = vld [vmem:[%s6999_s1 + $0x18b8] sm:$0xff]  ;;  %v2801_v16 = vpack.c.bf16 %v305_v33, %v303_v3 }
  0xf1   :  { %2766 = vmatpush1.bf16.msra.mxu1 %v2765_v22  ;;  %v5333_v22 = vrot.slane %v5306_v9, %v3951_v11  ;;  %v1180_v41 = vcombine.high %v5343_v28, %v5343_v28 }
  0xf2   :  { %3278 = vmatpush1.bf16.msra.mxu0 %v3277_v23  ;;  %2768 = vmatprep.subr.bf16.mxu1 %v2767_v24  ;;  %v804_v23 = vld [vmem:[%s6999_s1 + $0x1828] sm:$0xff]  ;;  %v806_v24 = vld [vmem:[%s6999_s1 + $0x1838] sm:$0xff] }
  0xf3   :  { %3280 = vmatprep.subr.bf16.mxu0 %v3279_v29  ;;  %v2787_v29 = vpack.c.bf16 %v294_v21, %v292_v20  ;;  %v3299_v34 = vpack.c.bf16 %v806_v24, %v804_v23  ;;  %v309_v20 = vld [vmem:[%s6999_s1 + $0x8b0] sm:$0xff]  ;;  %v819_v21 = vld [vmem:[%s6999_s1 + $0x18a0] sm:$0xff] }
  0xf4   :  { %v821_v24 = vld [vmem:[%s6999_s1 + $0x18b0] sm:$0xff] }
  0xf5   :  { %2770 = vmatpush1.bf16.msra.mxu1 %v2769_v36  ;;  %v296_v36 = vld [vmem:[%s6999_s1 + $0x848] sm:$0xff]  ;;  %v3317_v32 = vpack.c.bf16 %v821_v24, %v819_v21  ;;  %v327_v21 = vld [vmem:[%s6999_s1 + $0x940] sm:$0xff] }
  0xf6   :  { %3282 = vmatpush1.bf16.msra.mxu0 %v3281_v37  ;;  %2772 = vmatprep.subr.bf16.mxu1 %v2771_v38  ;;  %v298_v37 = vld [vmem:[%s6999_s1 + $0x858] sm:$0xff]  ;;  %v1112_v38 = vcombine.high %v5333_v22, %v5333_v22  ;;  %v839_v24 = vld [vmem:[%s6999_s1 + $0x1940] sm:$0xff] }
  0xf7   :  { %3284 = vmatprep.subr.bf16.mxu0 %v3283_v42  ;;  %v2789_v42 = vpack.c.bf16 %v293_v31, %v291_v59  ;;  %v2791_v44 = vpack.c.bf16 %v298_v37, %v296_v36  ;;  %v826_v59 = vld [vmem:[%s6999_s1 + $0x18d8] sm:$0xff]  ;;  %v2805_v31 = vpack.c.bf16 %v309_v20, %v307_v19  ;;  %v313_v36 = vld [vmem:[%s6999_s1 + $0x8d0] sm:$0xff]  ;;  %v823_v37 = vld [vmem:[%s6999_s1 + $0x18c0] sm:$0xff] }
  0xf9   :  { %2774 = vmatpush1.bf16.msra.mxu1 %v2773_v48  ;;  %v300_v48 = vld [vmem:[%s6999_s1 + $0x868] sm:$0xff] }
  0xfa   :  { %3286 = vmatpush1.bf16.msra.mxu0 %v3285_v49  ;;  %2776 = vmatprep.subr.bf16.mxu1 %v2775_v25  ;;  %v302_v49 = vld [vmem:[%s6999_s1 + $0x878] sm:$0xff]  ;;  %v812_v25 = vld [vmem:[%s6999_s1 + $0x1868] sm:$0xff] }
  0xfb   :  { %3288 = vmatprep.subr.bf16.mxu0 %v3287_v55  ;;  %v2795_v55 = vpack.c.bf16 %v302_v49, %v300_v48  ;;  %v3307_v60 = vpack.c.bf16 %v814_v51, %v812_v25  ;;  %v829_v49 = vld [vmem:[%s6999_s1 + $0x18f0] sm:$0xff]  ;;  %v320_v25 = vld [vmem:[%s6999_s1 + $0x908] sm:$0xff]  ;;  %v322_v51 = vld [vmem:[%s6999_s1 + $0x918] sm:$0xff] }
  0xfc   :  { %v2815_v57 = vpack.c.bf16 %v322_v51, %v320_v25  ;;  %v849_v51 = vld [vmem:[%s6999_s1 + $0x1990] sm:$0xff] }
  0xfd   :  { %2778 = vmatpush1.bf16.msra.mxu1 %v2777_v63  ;;  %v304_v63 = vld [vmem:[%s6999_s1 + $0x888] sm:$0xff] }
  0xfe   :  { %3290 = vmatpush1.bf16.msra.mxu0 %v3289_v50  ;;  %2780 = vmatprep.subr.bf16.mxu1 %v2779_v0  ;;  %v306_v50 = vld [vmem:[%s6999_s1 + $0x898] sm:$0xff]  ;;  %v816_v0 = vld [vmem:[%s6999_s1 + $0x1888] sm:$0xff] }
  0xff   :  { %3292 = vmatprep.subr.bf16.mxu0 %v3291_v2  ;;  %v2799_v2 = vpack.c.bf16 %v306_v50, %v304_v63  ;;  %v3311_v7 = vpack.c.bf16 %v818_v1, %v816_v0  ;;  %v833_v50 = vld [vmem:[%s6999_s1 + $0x1910] sm:$0xff]  ;;  %v324_v0 = vld [vmem:[%s6999_s1 + $0x928] sm:$0xff]  ;;  %v326_v1 = vld [vmem:[%s6999_s1 + $0x938] sm:$0xff] }
 0x100   :  { %v3329_v3 = vpack.c.bf16 %v833_v50, %v831_v61  ;;  %v2819_v33 = vpack.c.bf16 %v326_v1, %v324_v0  ;;  %v339_v61 = vld [vmem:[%s6999_s1 + $0x9a0] sm:$0xff]  ;;  %v853_v1 = vld [vmem:[%s6999_s1 + $0x19b0] sm:$0xff] }
 0x101   :  { %2782 = vmatpush1.bf16.msra.mxu1 %v2781_v10  ;;  %v308_v10 = vld [vmem:[%s6999_s1 + $0x8a8] sm:$0xff]  ;;  %v851_v50 = vld [vmem:[%s6999_s1 + $0x19a0] sm:$0xff] }
 0x102   :  { %3294 = vmatpush1.bf16.msra.mxu0 %v3293_v13  ;;  %2784 = vmatprep.subr.bf16.mxu1 %v2783_v14  ;;  %v310_v13 = vld [vmem:[%s6999_s1 + $0x8b8] sm:$0xff]  ;;  %v820_v14 = vld [vmem:[%s6999_s1 + $0x18a8] sm:$0xff] }
 0x103   :  { %3296 = vmatprep.subr.bf16.mxu0 %v3295_v18  ;;  %v2803_v18 = vpack.c.bf16 %v310_v13, %v308_v10  ;;  %v3315_v23 = vpack.c.bf16 %v822_v15, %v820_v14  ;;  %v837_v13 = vld [vmem:[%s6999_s1 + $0x1930] sm:$0xff]  ;;  %v328_v14 = vld [vmem:[%s6999_s1 + $0x948] sm:$0xff]  ;;  %v330_v15 = vld [vmem:[%s6999_s1 + $0x958] sm:$0xff] }
 0x104   :  { %1509 = vmatmul.mubr.f32.vlgmr.msra.gmra.mrb[0].mxu1 %v4926_v4  ;;  %v295_v4 = vld [vmem:[%s6999_s1 + $0x840] sm:$0xff]  ;;  %v3333_v19 = vpack.c.bf16 %v837_v13, %v835_v8  ;;  %v2823_v20 = vpack.c.bf16 %v330_v15, %v328_v14  ;;  %v857_v15 = vld [vmem:[%s6999_s1 + $0x19d0] sm:$0xff] }
 0x105   :  { %2786 = vmatpush1.bf16.msra.mxu1 %v2785_v26  ;;  %2077 = vmatmul.mubr.f32.vlgmr.msra.gmra.mrb[0].mxu0 %v4935_v6  ;;  %v809_v6 = vld [vmem:[%s6999_s1 + $0x1850] sm:$0xff]  ;;  %v2793_v52 = vpack.c.bf16 %v297_v45, %v295_v4  ;;  %v312_v26 = vld [vmem:[%s6999_s1 + $0x8c8] sm:$0xff]  ;;  %v3321_v4 = vpack.c.bf16 %v825_v39, %v823_v37  ;;  %v331_v37 = vld [vmem:[%s6999_s1 + $0x960] sm:$0xff] }
 0x106   :  { %3298 = vmatpush1.bf16.msra.mxu0 %v3297_v27  ;;  %2788 = vmatprep.subr.bf16.mxu1 %v2787_v29  ;;  %v3305_v53 = vpack.c.bf16 %v809_v6, %v807_v46  ;;  %v314_v27 = vld [vmem:[%s6999_s1 + $0x8d8] sm:$0xff]  ;;  %v824_v29 = vld [vmem:[%s6999_s1 + $0x18c8] sm:$0xff]  ;;  %v315_v46 = vld [vmem:[%s6999_s1 + $0x8e0] sm:$0xff] }
 0x107   :  { %3300 = vmatprep.subr.bf16.mxu0 %v3299_v34  ;;  %1579 = vmatprep.mubr.f32.mxu1 %v1112_v38  ;;  %v2807_v34 = vpack.c.bf16 %v314_v27, %v312_v26  ;;  %v3319_v38 = vpack.c.bf16 %v826_v59, %v824_v29  ;;  %v827_v6 = vld [vmem:[%s6999_s1 + $0x18e0] sm:$0xff]  ;;  %v841_v27 = vld [vmem:[%s6999_s1 + $0x1950] sm:$0xff]  ;;  %v332_v29 = vld [vmem:[%s6999_s1 + $0x968] sm:$0xff] }
 0x108   :  { %2147 = vmatprep.mubr.f32.mxu0 %v1180_v41  ;;  %v318_v41 = vld [vmem:[%s6999_s1 + $0x8f8] sm:$0xff]  ;;  %v3325_v56 = vpack.c.bf16 %v829_v49, %v827_v6  ;;  %v843_v39 = vld [vmem:[%s6999_s1 + $0x1960] sm:$0xff] }
 0x109   :  { %2790 = vmatpush1.bf16.msra.mxu1 %v2789_v42  ;;  %v828_v42 = vld [vmem:[%s6999_s1 + $0x18e8] sm:$0xff]  ;;  %v2811_v45 = vpack.c.bf16 %v318_v41, %v316_v40  ;;  %v334_v59 = vld [vmem:[%s6999_s1 + $0x978] sm:$0xff]  ;;  %v845_v41 = vld [vmem:[%s6999_s1 + $0x1970] sm:$0xff] }
 0x10a   :  { %3302 = vmatpush1.bf16.msra.mxu0 %v3301_v43  ;;  %2792 = vmatprep.subr.bf16.mxu1 %v2791_v44  ;;  %v830_v43 = vld [vmem:[%s6999_s1 + $0x18f8] sm:$0xff]  ;;  %v2809_v44 = vpack.c.bf16 %v313_v36, %v311_v35  ;;  %v3337_v35 = vpack.c.bf16 %v841_v27, %v839_v24  ;;  %v2827_v36 = vpack.c.bf16 %v334_v59, %v332_v29  ;;  %v335_v6 = vld [vmem:[%s6999_s1 + $0x980] sm:$0xff]  ;;  %v861_v59 = vld [vmem:[%s6999_s1 + $0x19f0] sm:$0xff] }
 0x10b   :  { %3304 = vmatprep.subr.bf16.mxu0 %v3303_v47  ;;  %v317_v47 = vld [vmem:[%s6999_s1 + $0x8f0] sm:$0xff]  ;;  %v3323_v48 = vpack.c.bf16 %v830_v43, %v828_v42  ;;  %v336_v42 = vld [vmem:[%s6999_s1 + $0x988] sm:$0xff]  ;;  %v338_v43 = vld [vmem:[%s6999_s1 + $0x998] sm:$0xff] }
 0x10c   :  { %v847_v49 = vld [vmem:[%s6999_s1 + $0x1980] sm:$0xff] }
 0x10d   :  { %2794 = vmatpush1.bf16.msra.mxu1 %v2793_v52  ;;  %v832_v52 = vld [vmem:[%s6999_s1 + $0x1908] sm:$0xff]  ;;  %v343_v8 = vld [vmem:[%s6999_s1 + $0x9c0] sm:$0xff] }
 0x10e   :  { %3306 = vmatpush1.bf16.msra.mxu0 %v3305_v53  ;;  %2796 = vmatprep.subr.bf16.mxu1 %v2795_v55  ;;  %v834_v53 = vld [vmem:[%s6999_s1 + $0x1918] sm:$0xff]  ;;  %v2813_v55 = vpack.c.bf16 %v317_v47, %v315_v46  ;;  %v3341_v46 = vpack.c.bf16 %v845_v41, %v843_v39  ;;  %v2831_v47 = vpack.c.bf16 %v338_v43, %v336_v42  ;;  %v855_v13 = vld [vmem:[%s6999_s1 + $0x19c0] sm:$0xff]  ;;  %v353_v41 = vld [vmem:[%s6999_s1 + $0xa10] sm:$0xff] }
 0x10f   :  { %3308 = vmatprep.subr.bf16.mxu0 %v3307_v60  ;;  %v321_v60 = vld [vmem:[%s6999_s1 + $0x910] sm:$0xff]  ;;  %v3327_v63 = vpack.c.bf16 %v834_v53, %v832_v52  ;;  %v340_v52 = vld [vmem:[%s6999_s1 + $0x9a8] sm:$0xff]  ;;  %v342_v53 = vld [vmem:[%s6999_s1 + $0x9b8] sm:$0xff] }
 0x110   :  { %v347_v24 = vld [vmem:[%s6999_s1 + $0x9e0] sm:$0xff]  ;;  %v865_v43 = vld [vmem:[%s6999_s1 + $0x1a10] sm:$0xff] }
 0x111   :  { %2798 = vmatpush1.bf16.msra.mxu1 %v2797_v54  ;;  %v836_v54 = vld [vmem:[%s6999_s1 + $0x1928] sm:$0xff]  ;;  %v859_v27 = vld [vmem:[%s6999_s1 + $0x19e0] sm:$0xff] }
 0x112   :  { %3310 = vmatpush1.bf16.msra.mxu0 %v3309_v30  ;;  %2800 = vmatprep.subr.bf16.mxu1 %v2799_v2  ;;  %v838_v30 = vld [vmem:[%s6999_s1 + $0x1938] sm:$0xff]  ;;  %v2817_v2 = vpack.c.bf16 %v321_v60, %v319_v58  ;;  %v3345_v58 = vpack.c.bf16 %v849_v51, %v847_v49  ;;  %v2835_v60 = vpack.c.bf16 %v342_v53, %v340_v52  ;;  %v863_v42 = vld [vmem:[%s6999_s1 + $0x1a00] sm:$0xff]  ;;  %v357_v52 = vld [vmem:[%s6999_s1 + $0xa30] sm:$0xff] }
 0x113   :  { %3312 = vmatprep.subr.bf16.mxu0 %v3311_v7  ;;  %v325_v7 = vld [vmem:[%s6999_s1 + $0x930] sm:$0xff]  ;;  %v3331_v10 = vpack.c.bf16 %v838_v30, %v836_v54  ;;  %v344_v54 = vld [vmem:[%s6999_s1 + $0x9c8] sm:$0xff]  ;;  %v346_v30 = vld [vmem:[%s6999_s1 + $0x9d8] sm:$0xff]  ;;  %v3357_v39 = vpack.c.bf16 %v861_v59, %v859_v27  ;;  %v3361_v49 = vpack.c.bf16 %v865_v43, %v863_v42 }
 0x114   :  { %v355_v51 = vld [vmem:[%s6999_s1 + $0xa20] sm:$0xff] }
 0x115   :  { %2802 = vmatpush1.bf16.msra.mxu1 %v2801_v16  ;;  %v840_v16 = vld [vmem:[%s6999_s1 + $0x1948] sm:$0xff]  ;;  %v867_v53 = vld [vmem:[%s6999_s1 + $0x1a20] sm:$0xff] }
 0x116   :  { %3314 = vmatpush1.bf16.msra.mxu0 %v3313_v17  ;;  %2804 = vmatprep.subr.bf16.mxu1 %v2803_v18  ;;  %v842_v17 = vld [vmem:[%s6999_s1 + $0x1958] sm:$0xff]  ;;  %v2821_v18 = vpack.c.bf16 %v325_v7, %v323_v5  ;;  %v3349_v5 = vpack.c.bf16 %v853_v1, %v851_v50  ;;  %v2839_v7 = vpack.c.bf16 %v346_v30, %v344_v54  ;;  %v361_v30 = vld [vmem:[%s6999_s1 + $0xa50] sm:$0xff]  ;;  %v367_v59 = vld [vmem:[%s6999_s1 + $0xa80] sm:$0xff] }
 0x117   :  { %3316 = vmatprep.subr.bf16.mxu0 %v3315_v23  ;;  %v329_v23 = vld [vmem:[%s6999_s1 + $0x950] sm:$0xff]  ;;  %v3335_v26 = vpack.c.bf16 %v842_v17, %v840_v16  ;;  %v348_v16 = vld [vmem:[%s6999_s1 + $0x9e8] sm:$0xff]  ;;  %v350_v17 = vld [vmem:[%s6999_s1 + $0x9f8] sm:$0xff] }
 0x118   :  { %v371_v42 = vld [vmem:[%s6999_s1 + $0xaa0] sm:$0xff] }
 0x119   :  { %2806 = vmatpush1.bf16.msra.mxu1 %v2805_v31  ;;  %v844_v31 = vld [vmem:[%s6999_s1 + $0x1968] sm:$0xff]  ;;  %v883_v43 = vld [vmem:[%s6999_s1 + $0x1aa0] sm:$0xff] }
 0x11a   :  { %3318 = vmatpush1.bf16.msra.mxu0 %v3317_v32  ;;  %2808 = vmatprep.subr.bf16.mxu1 %v2807_v34  ;;  %v846_v32 = vld [vmem:[%s6999_s1 + $0x1978] sm:$0xff]  ;;  %v2825_v34 = vpack.c.bf16 %v329_v23, %v327_v21  ;;  %v3353_v21 = vpack.c.bf16 %v857_v15, %v855_v13  ;;  %v2843_v23 = vpack.c.bf16 %v350_v17, %v348_v16  ;;  %v363_v15 = vld [vmem:[%s6999_s1 + $0xa60] sm:$0xff]  ;;  %v365_v16 = vld [vmem:[%s6999_s1 + $0xa70] sm:$0xff] }
 0x11b   :  { %3320 = vmatprep.subr.bf16.mxu0 %v3319_v38  ;;  %v333_v38 = vld [vmem:[%s6999_s1 + $0x970] sm:$0xff]  ;;  %v3339_v40 = vpack.c.bf16 %v846_v32, %v844_v31  ;;  %v352_v31 = vld [vmem:[%s6999_s1 + $0xa08] sm:$0xff]  ;;  %v354_v32 = vld [vmem:[%s6999_s1 + $0xa18] sm:$0xff] }
 0x11c   :  { %v875_v17 = vld [vmem:[%s6999_s1 + $0x1a60] sm:$0xff] }
 0x11d   :  { %2810 = vmatpush1.bf16.msra.mxu1 %v2809_v44  ;;  %v848_v44 = vld [vmem:[%s6999_s1 + $0x1988] sm:$0xff] }
 0x11e   :  { %3322 = vmatpush1.bf16.msra.mxu0 %v3321_v4  ;;  %2812 = vmatprep.subr.bf16.mxu1 %v2811_v45  ;;  %v850_v4 = vld [vmem:[%s6999_s1 + $0x1998] sm:$0xff]  ;;  %v2829_v45 = vpack.c.bf16 %v333_v38, %v331_v37  ;;  %v1165_v37 = vcombine.high %v5311_v12, %v5311_v12 }
 0x11f   :  { %3324 = vmatprep.subr.bf16.mxu0 %v3323_v48  ;;  %v337_v48 = vld [vmem:[%s6999_s1 + $0x990] sm:$0xff]  ;;  %v3343_v25 = vpack.c.bf16 %v850_v4, %v848_v44  ;;  %v356_v44 = vld [vmem:[%s6999_s1 + $0xa28] sm:$0xff]  ;;  %v358_v4 = vld [vmem:[%s6999_s1 + $0xa38] sm:$0xff] }
 0x121   :  { %2814 = vmatpush1.bf16.msra.mxu1 %v2813_v55  ;;  %v852_v55 = vld [vmem:[%s6999_s1 + $0x19a8] sm:$0xff] }
 0x122   :  { %3326 = vmatpush1.bf16.msra.mxu0 %v3325_v56  ;;  %2816 = vmatprep.subr.bf16.mxu1 %v2815_v57  ;;  %v854_v56 = vld [vmem:[%s6999_s1 + $0x19b8] sm:$0xff]  ;;  %v2833_v57 = vpack.c.bf16 %v337_v48, %v335_v6  ;;  %v5743_v6 = vrot.slane %v1165_v37, %v3951_v11 }
 0x123   :  { %3328 = vmatprep.subr.bf16.mxu0 %v3327_v63  ;;  %v341_v63 = vld [vmem:[%s6999_s1 + $0x9b0] sm:$0xff]  ;;  %v3347_v0 = vpack.c.bf16 %v854_v56, %v852_v55  ;;  %v374_v37 = vld [vmem:[%s6999_s1 + $0xab8] sm:$0xff] }
 0x124   :  { %v869_v56 = vld [vmem:[%s6999_s1 + $0x1a30] sm:$0xff]  ;;  %v1181_v50 = vcombine.high %v5743_v6, %v5743_v6 }
 0x125   :  { %2818 = vmatpush1.bf16.msra.mxu1 %v2817_v2  ;;  %v856_v2 = vld [vmem:[%s6999_s1 + $0x19c8] sm:$0xff]  ;;  %v3365_v1 = vpack.c.bf16 %v869_v56, %v867_v53  ;;  %v375_v53 = vld [vmem:[%s6999_s1 + $0xac0] sm:$0xff] }
 0x126   :  { %3330 = vmatpush1.bf16.msra.mxu0 %v3329_v3  ;;  %2820 = vmatprep.subr.bf16.mxu1 %v2819_v33  ;;  %v858_v3 = vld [vmem:[%s6999_s1 + $0x19d8] sm:$0xff]  ;;  %v2837_v33 = vpack.c.bf16 %v341_v63, %v339_v61  ;;  %v872_v61 = vld [vmem:[%s6999_s1 + $0x1a48] sm:$0xff]  ;;  %v887_v56 = vld [vmem:[%s6999_s1 + $0x1ac0] sm:$0xff] }
 0x127   :  { %3332 = vmatprep.subr.bf16.mxu0 %v3331_v10  ;;  %v345_v10 = vld [vmem:[%s6999_s1 + $0x9d0] sm:$0xff]  ;;  %v3351_v14 = vpack.c.bf16 %v858_v3, %v856_v2  ;;  %v874_v63 = vld [vmem:[%s6999_s1 + $0x1a58] sm:$0xff]  ;;  %v871_v2 = vld [vmem:[%s6999_s1 + $0x1a40] sm:$0xff] }
 0x128   :  { %v3367_v3 = vpack.c.bf16 %v874_v63, %v872_v61  ;;  %v382_v61 = vld [vmem:[%s6999_s1 + $0xaf8] sm:$0xff]  ;;  %v892_v63 = vld [vmem:[%s6999_s1 + $0x1ae8] sm:$0xff] }
 0x129   :  { %2822 = vmatpush1.bf16.msra.mxu1 %v2821_v18  ;;  %v860_v18 = vld [vmem:[%s6999_s1 + $0x19e8] sm:$0xff] }
 0x12a   :  { %3334 = vmatpush1.bf16.msra.mxu0 %v3333_v19  ;;  %2824 = vmatprep.subr.bf16.mxu1 %v2823_v20  ;;  %v862_v19 = vld [vmem:[%s6999_s1 + $0x19f8] sm:$0xff]  ;;  %v2841_v20 = vpack.c.bf16 %v345_v10, %v343_v8 }
 0x12b   :  { %3336 = vmatprep.subr.bf16.mxu0 %v3335_v26  ;;  %v349_v26 = vld [vmem:[%s6999_s1 + $0x9f0] sm:$0xff]  ;;  %v3355_v29 = vpack.c.bf16 %v862_v19, %v860_v18  ;;  %v878_v8 = vld [vmem:[%s6999_s1 + $0x1a78] sm:$0xff] }
 0x12c   :  { %v2845_v38 = vpack.c.bf16 %v349_v26, %v347_v24  ;;  %v877_v19 = vld [vmem:[%s6999_s1 + $0x1a70] sm:$0xff]  ;;  %v882_v24 = vld [vmem:[%s6999_s1 + $0x1a98] sm:$0xff]  ;;  %v2861_v26 = vpack.c.bf16 %v365_v16, %v363_v15  ;;  %v383_v15 = vld [vmem:[%s6999_s1 + $0xb00] sm:$0xff] }
 0x12d   :  { %2826 = vmatpush1.bf16.msra.mxu1 %v2825_v34  ;;  %v1097_v34 = vcombine.high %v5306_v9, %v5306_v9  ;;  %v351_v9 = vld [vmem:[%s6999_s1 + $0xa00] sm:$0xff]  ;;  %v3373_v27 = vpack.c.bf16 %v877_v19, %v875_v17  ;;  %v385_v16 = vld [vmem:[%s6999_s1 + $0xb10] sm:$0xff] }
 0x12e   :  { %3338 = vmatpush1.bf16.msra.mxu0 %v3337_v35  ;;  %2828 = vmatprep.subr.bf16.mxu1 %v2827_v36  ;;  %v864_v35 = vld [vmem:[%s6999_s1 + $0x1a08] sm:$0xff]  ;;  %v866_v36 = vld [vmem:[%s6999_s1 + $0x1a18] sm:$0xff]  ;;  %v2849_v48 = vpack.c.bf16 %v353_v41, %v351_v9  ;;  %v895_v17 = vld [vmem:[%s6999_s1 + $0x1b00] sm:$0xff] }
 0x12f   :  { %3340 = vmatprep.subr.bf16.mxu0 %v3339_v40  ;;  %v2847_v40 = vpack.c.bf16 %v354_v32, %v352_v31  ;;  %v3359_v12 = vpack.c.bf16 %v866_v36, %v864_v35  ;;  %v369_v31 = vld [vmem:[%s6999_s1 + $0xa90] sm:$0xff]  ;;  %v879_v32 = vld [vmem:[%s6999_s1 + $0x1a80] sm:$0xff]  ;;  %v372_v36 = vld [vmem:[%s6999_s1 + $0xaa8] sm:$0xff] }
 0x130   :  { %v881_v35 = vld [vmem:[%s6999_s1 + $0x1a90] sm:$0xff]  ;;  %v2867_v41 = vpack.c.bf16 %v374_v37, %v372_v36  ;;  %v392_v36 = vld [vmem:[%s6999_s1 + $0xb48] sm:$0xff]  ;;  %v394_v37 = vld [vmem:[%s6999_s1 + $0xb58] sm:$0xff] }
 0x131   :  { %2830 = vmatpush1.bf16.msra.mxu1 %v2829_v45  ;;  %v5734_v45 = vrot.slane %v1097_v34, %v3951_v11  ;;  %v3377_v9 = vpack.c.bf16 %v881_v35, %v879_v32  ;;  %v897_v19 = vld [vmem:[%s6999_s1 + $0x1b10] sm:$0xff]  ;;  %v899_v32 = vld [vmem:[%s6999_s1 + $0x1b20] sm:$0xff] }
 0x132   :  { %3342 = vmatpush1.bf16.msra.mxu0 %v3341_v46  ;;  %2832 = vmatprep.subr.bf16.mxu1 %v2831_v47  ;;  %v868_v46 = vld [vmem:[%s6999_s1 + $0x1a28] sm:$0xff]  ;;  %v870_v47 = vld [vmem:[%s6999_s1 + $0x1a38] sm:$0xff]  ;;  %v901_v35 = vld [vmem:[%s6999_s1 + $0x1b30] sm:$0xff] }
 0x133   :  { %3344 = vmatprep.subr.bf16.mxu0 %v3343_v25  ;;  %v2851_v25 = vpack.c.bf16 %v358_v4, %v356_v44  ;;  %v3363_v55 = vpack.c.bf16 %v870_v47, %v868_v46  ;;  %v885_v4 = vld [vmem:[%s6999_s1 + $0x1ab0] sm:$0xff]  ;;  %v376_v46 = vld [vmem:[%s6999_s1 + $0xac8] sm:$0xff]  ;;  %v378_v47 = vld [vmem:[%s6999_s1 + $0xad8] sm:$0xff] }
 0x135   :  { %2834 = vmatpush1.bf16.msra.mxu1 %v2833_v57  ;;  %v360_v57 = vld [vmem:[%s6999_s1 + $0xa48] sm:$0xff] }
 0x136   :  { %3346 = vmatpush1.bf16.msra.mxu0 %v3345_v58  ;;  %2836 = vmatprep.subr.bf16.mxu1 %v2835_v60  ;;  %v362_v58 = vld [vmem:[%s6999_s1 + $0xa58] sm:$0xff]  ;;  %v1113_v60 = vcombine.high %v5734_v45, %v5734_v45 }
 0x137   :  { %3348 = vmatprep.subr.bf16.mxu0 %v3347_v0  ;;  %v2853_v0 = vpack.c.bf16 %v357_v52, %v355_v51  ;;  %v2855_v54 = vpack.c.bf16 %v362_v58, %v360_v57  ;;  %v3381_v51 = vpack.c.bf16 %v885_v4, %v883_v43  ;;  %v2871_v52 = vpack.c.bf16 %v378_v47, %v376_v46  ;;  %v889_v58 = vld [vmem:[%s6999_s1 + $0x1ad0] sm:$0xff]  ;;  %v903_v43 = vld [vmem:[%s6999_s1 + $0x1b40] sm:$0xff]  ;;  %v396_v46 = vld [vmem:[%s6999_s1 + $0xb68] sm:$0xff] }
 0x138   :  { %v905_v4 = vld [vmem:[%s6999_s1 + $0x1b50] sm:$0xff]  ;;  %v398_v47 = vld [vmem:[%s6999_s1 + $0xb78] sm:$0xff] }
 0x139   :  { %2838 = vmatpush1.bf16.msra.mxu1 %v2837_v33  ;;  %v364_v33 = vld [vmem:[%s6999_s1 + $0xa68] sm:$0xff] }
 0x13a   :  { %3350 = vmatpush1.bf16.msra.mxu0 %v3349_v5  ;;  %2840 = vmatprep.subr.bf16.mxu1 %v2839_v7  ;;  %v366_v5 = vld [vmem:[%s6999_s1 + $0xa78] sm:$0xff]  ;;  %v876_v7 = vld [vmem:[%s6999_s1 + $0x1a68] sm:$0xff] }
 0x13b   :  { %3352 = vmatprep.subr.bf16.mxu0 %v3351_v14  ;;  %v2859_v14 = vpack.c.bf16 %v366_v5, %v364_v33  ;;  %v3371_v18 = vpack.c.bf16 %v878_v8, %v876_v7  ;;  %v384_v33 = vld [vmem:[%s6999_s1 + $0xb08] sm:$0xff]  ;;  %v386_v5 = vld [vmem:[%s6999_s1 + $0xb18] sm:$0xff] }
 0x13c   :  { %v896_v7 = vld [vmem:[%s6999_s1 + $0x1b08] sm:$0xff]  ;;  %v898_v8 = vld [vmem:[%s6999_s1 + $0x1b18] sm:$0xff] }
 0x13d   :  { %2842 = vmatpush1.bf16.msra.mxu1 %v2841_v20  ;;  %v368_v20 = vld [vmem:[%s6999_s1 + $0xa88] sm:$0xff] }
 0x13e   :  { %3354 = vmatpush1.bf16.msra.mxu0 %v3353_v21  ;;  %2844 = vmatprep.subr.bf16.mxu1 %v2843_v23  ;;  %v370_v21 = vld [vmem:[%s6999_s1 + $0xa98] sm:$0xff]  ;;  %v880_v23 = vld [vmem:[%s6999_s1 + $0x1a88] sm:$0xff] }
 0x13f   :  { %3356 = vmatprep.subr.bf16.mxu0 %v3355_v29  ;;  %v2863_v29 = vpack.c.bf16 %v370_v21, %v368_v20  ;;  %v3375_v34 = vpack.c.bf16 %v882_v24, %v880_v23  ;;  %v388_v20 = vld [vmem:[%s6999_s1 + $0xb28] sm:$0xff]  ;;  %v390_v21 = vld [vmem:[%s6999_s1 + $0xb38] sm:$0xff] }
 0x140   :  { %v900_v23 = vld [vmem:[%s6999_s1 + $0x1b28] sm:$0xff]  ;;  %v902_v24 = vld [vmem:[%s6999_s1 + $0x1b38] sm:$0xff] }
 0x141   :  { %2846 = vmatpush1.bf16.msra.mxu1 %v2845_v38  ;;  %v884_v38 = vld [vmem:[%s6999_s1 + $0x1aa8] sm:$0xff] }
 0x142   :  { %3358 = vmatpush1.bf16.msra.mxu0 %v3357_v39  ;;  %2848 = vmatprep.subr.bf16.mxu1 %v2847_v40  ;;  %v886_v39 = vld [vmem:[%s6999_s1 + $0x1ab8] sm:$0xff]  ;;  %v2865_v40 = vpack.c.bf16 %v369_v31, %v367_v59  ;;  %v387_v59 = vld [vmem:[%s6999_s1 + $0xb20] sm:$0xff]  ;;  %v389_v31 = vld [vmem:[%s6999_s1 + $0xb30] sm:$0xff] }
 0x143   :  { %3360 = vmatprep.subr.bf16.mxu0 %v3359_v12  ;;  %v373_v12 = vld [vmem:[%s6999_s1 + $0xab0] sm:$0xff]  ;;  %v3379_v44 = vpack.c.bf16 %v886_v39, %v884_v38  ;;  %v904_v38 = vld [vmem:[%s6999_s1 + $0x1b48] sm:$0xff]  ;;  %v906_v39 = vld [vmem:[%s6999_s1 + $0x1b58] sm:$0xff] }
 0x144   :  { %1580 = vmatmul.mubr.f32.vlgmr.msra.gmra.mrb[0].mxu1 %v5333_v22  ;;  %v359_v22 = vld [vmem:[%s6999_s1 + $0xa40] sm:$0xff] }
 0x145   :  { %2850 = vmatpush1.bf16.msra.mxu1 %v2849_v48  ;;  %2148 = vmatmul.mubr.f32.vlgmr.msra.gmra.mrb[0].mxu0 %v5343_v28  ;;  %v873_v28 = vld [vmem:[%s6999_s1 + $0x1a50] sm:$0xff]  ;;  %v2857_v10 = vpack.c.bf16 %v361_v30, %v359_v22  ;;  %v888_v48 = vld [vmem:[%s6999_s1 + $0x1ac8] sm:$0xff]  ;;  %v379_v22 = vld [vmem:[%s6999_s1 + $0xae0] sm:$0xff] }
 0x146   :  { %3362 = vmatpush1.bf16.msra.mxu0 %v3361_v49  ;;  %2852 = vmatprep.subr.bf16.mxu1 %v2851_v25  ;;  %v3369_v13 = vpack.c.bf16 %v873_v28, %v871_v2  ;;  %v890_v49 = vld [vmem:[%s6999_s1 + $0x1ad8] sm:$0xff]  ;;  %v2869_v25 = vpack.c.bf16 %v373_v12, %v371_v42  ;;  %v381_v30 = vld [vmem:[%s6999_s1 + $0xaf0] sm:$0xff]  ;;  %v891_v2 = vld [vmem:[%s6999_s1 + $0x1ae0] sm:$0xff] }
 0x147   :  { %3364 = vmatprep.subr.bf16.mxu0 %v3363_v55  ;;  %1650 = vmatprep.mubr.f32.mxu1 %v1113_v60  ;;  %v377_v55 = vld [vmem:[%s6999_s1 + $0xad0] sm:$0xff]  ;;  %v3383_v57 = vpack.c.bf16 %v890_v49, %v888_v48  ;;  %v380_v60 = vld [vmem:[%s6999_s1 + $0xae8] sm:$0xff]  ;;  %v391_v42 = vld [vmem:[%s6999_s1 + $0xb40] sm:$0xff] }
 0x148   :  { %2218 = vmatprep.mubr.f32.mxu0 %v1181_v50  ;;  %v894_v50 = vld [vmem:[%s6999_s1 + $0x1af8] sm:$0xff]  ;;  %v893_v28 = vld [vmem:[%s6999_s1 + $0x1af0] sm:$0xff]  ;;  %v908_v48 = vld [vmem:[%s6999_s1 + $0x1b68] sm:$0xff] }
 0x149   :  { %2854 = vmatpush1.bf16.msra.mxu1 %v2853_v0  ;;  %v2873_v0 = vpack.c.bf16 %v377_v55, %v375_v53  ;;  %v393_v12 = vld [vmem:[%s6999_s1 + $0xb50] sm:$0xff]  ;;  %v910_v49 = vld [vmem:[%s6999_s1 + $0x1b78] sm:$0xff]  ;;  %v395_v53 = vld [vmem:[%s6999_s1 + $0xb60] sm:$0xff] }
 0x14a   :  { %3366 = vmatpush1.bf16.msra.mxu0 %v3365_v1  ;;  %2856 = vmatprep.subr.bf16.mxu1 %v2855_v54  ;;  %v3385_v1 = vpack.c.bf16 %v889_v58, %v887_v56  ;;  %v2875_v54 = vpack.c.bf16 %v382_v61, %v380_v60  ;;  %v397_v55 = vld [vmem:[%s6999_s1 + $0xb70] sm:$0xff]  ;;  %v907_v56 = vld [vmem:[%s6999_s1 + $0x1b60] sm:$0xff]  ;;  %v400_v60 = vld [vmem:[%s6999_s1 + $0xb88] sm:$0xff] }
 0x14b   :  { %3368 = vmatprep.subr.bf16.mxu0 %v3367_v3  ;;  %v3387_v3 = vpack.c.bf16 %v894_v50, %v892_v63  ;;  %v909_v58 = vld [vmem:[%s6999_s1 + $0x1b70] sm:$0xff]  ;;  %v402_v61 = vld [vmem:[%s6999_s1 + $0xb98] sm:$0xff]  ;;  %v912_v63 = vld [vmem:[%s6999_s1 + $0x1b88] sm:$0xff] }
 0x14c   :  { %v914_v50 = vld [vmem:[%s6999_s1 + $0x1b98] sm:$0xff] }
 0x14d   :  { %2858 = vmatpush1.bf16.msra.mxu1 %v2857_v10  ;;  %v2877_v10 = vpack.c.bf16 %v381_v30, %v379_v22  ;;  %v399_v22 = vld [vmem:[%s6999_s1 + $0xb80] sm:$0xff]  ;;  %v401_v30 = vld [vmem:[%s6999_s1 + $0xb90] sm:$0xff] }
 0x14e   :  { %3370 = vmatpush1.bf16.msra.mxu0 %v3369_v13  ;;  %2860 = vmatprep.subr.bf16.mxu1 %v2859_v14  ;;  %v3389_v13 = vpack.c.bf16 %v893_v28, %v891_v2  ;;  %v2879_v14 = vpack.c.bf16 %v386_v5, %v384_v33  ;;  %v911_v2 = vld [vmem:[%s6999_s1 + $0x1b80] sm:$0xff]  ;;  %v913_v28 = vld [vmem:[%s6999_s1 + $0x1b90] sm:$0xff]  ;;  %v404_v33 = vld [vmem:[%s6999_s1 + $0xba8] sm:$0xff] }
 0x14f   :  { %3372 = vmatprep.subr.bf16.mxu0 %v3371_v18  ;;  %v3391_v18 = vpack.c.bf16 %v898_v8, %v896_v7  ;;  %v406_v5 = vld [vmem:[%s6999_s1 + $0xbb8] sm:$0xff]  ;;  %v916_v7 = vld [vmem:[%s6999_s1 + $0x1ba8] sm:$0xff] }
 0x150   :  { %v918_v8 = vld [vmem:[%s6999_s1 + $0x1bb8] sm:$0xff] }
 0x151   :  { %2862 = vmatpush1.bf16.msra.mxu1 %v2861_v26  ;;  %v2881_v26 = vpack.c.bf16 %v385_v16, %v383_v15  ;;  %v403_v15 = vld [vmem:[%s6999_s1 + $0xba0] sm:$0xff]  ;;  %v405_v16 = vld [vmem:[%s6999_s1 + $0xbb0] sm:$0xff] }
 0x152   :  { %3374 = vmatpush1.bf16.msra.mxu0 %v3373_v27  ;;  %2864 = vmatprep.subr.bf16.mxu1 %v2863_v29  ;;  %v3393_v27 = vpack.c.bf16 %v897_v19, %v895_v17  ;;  %v2883_v29 = vpack.c.bf16 %v390_v21, %v388_v20  ;;  %v915_v17 = vld [vmem:[%s6999_s1 + $0x1ba0] sm:$0xff]  ;;  %v917_v19 = vld [vmem:[%s6999_s1 + $0x1bb0] sm:$0xff]  ;;  %v408_v20 = vld [vmem:[%s6999_s1 + $0xbc8] sm:$0xff] }
 0x153   :  { %3376 = vmatprep.subr.bf16.mxu0 %v3375_v34  ;;  %v3395_v34 = vpack.c.bf16 %v902_v24, %v900_v23  ;;  %v410_v21 = vld [vmem:[%s6999_s1 + $0xbd8] sm:$0xff]  ;;  %v920_v23 = vld [vmem:[%s6999_s1 + $0x1bc8] sm:$0xff] }
 0x154   :  { %v922_v24 = vld [vmem:[%s6999_s1 + $0x1bd8] sm:$0xff] }
 0x155   :  { %2866 = vmatpush1.bf16.msra.mxu1 %v2865_v40  ;;  %v2885_v40 = vpack.c.bf16 %v389_v31, %v387_v59  ;;  %v407_v59 = vld [vmem:[%s6999_s1 + $0xbc0] sm:$0xff]  ;;  %v409_v31 = vld [vmem:[%s6999_s1 + $0xbd0] sm:$0xff] }
 0x156   :  { %3378 = vmatpush1.bf16.msra.mxu0 %v3377_v9  ;;  %2868 = vmatprep.subr.bf16.mxu1 %v2867_v41  ;;  %v3397_v9 = vpack.c.bf16 %v901_v35, %v899_v32  ;;  %v2887_v41 = vpack.c.bf16 %v394_v37, %v392_v36  ;;  %v919_v32 = vld [vmem:[%s6999_s1 + $0x1bc0] sm:$0xff]  ;;  %v921_v35 = vld [vmem:[%s6999_s1 + $0x1bd0] sm:$0xff]  ;;  %v412_v36 = vld [vmem:[%s6999_s1 + $0xbe8] sm:$0xff] }
 0x157   :  { %3380 = vmatprep.subr.bf16.mxu0 %v3379_v44  ;;  %v3399_v44 = vpack.c.bf16 %v906_v39, %v904_v38  ;;  %v414_v37 = vld [vmem:[%s6999_s1 + $0xbf8] sm:$0xff]  ;;  %v924_v38 = vld [vmem:[%s6999_s1 + $0x1be8] sm:$0xff] }
 0x158   :  { %v926_v39 = vld [vmem:[%s6999_s1 + $0x1bf8] sm:$0xff] }
 0x159   :  { %2870 = vmatpush1.bf16.msra.mxu1 %v2869_v25  ;;  %v2889_v25 = vpack.c.bf16 %v393_v12, %v391_v42  ;;  %v411_v42 = vld [vmem:[%s6999_s1 + $0xbe0] sm:$0xff]  ;;  %v413_v12 = vld [vmem:[%s6999_s1 + $0xbf0] sm:$0xff] }
 0x15a   :  { %3382 = vmatpush1.bf16.msra.mxu0 %v3381_v51  ;;  %2872 = vmatprep.subr.bf16.mxu1 %v2871_v52  ;;  %v3401_v51 = vpack.c.bf16 %v905_v4, %v903_v43  ;;  %v2891_v52 = vpack.c.bf16 %v398_v47, %v396_v46  ;;  %v923_v43 = vld [vmem:[%s6999_s1 + $0x1be0] sm:$0xff]  ;;  %v925_v4 = vld [vmem:[%s6999_s1 + $0x1bf0] sm:$0xff]  ;;  %v416_v46 = vld [vmem:[%s6999_s1 + $0xc08] sm:$0xff] }
 0x15b   :  { %3384 = vmatprep.subr.bf16.mxu0 %v3383_v57  ;;  %v3403_v57 = vpack.c.bf16 %v910_v49, %v908_v48  ;;  %v418_v47 = vld [vmem:[%s6999_s1 + $0xc18] sm:$0xff]  ;;  %v928_v48 = vld [vmem:[%s6999_s1 + $0x1c08] sm:$0xff] }
 0x15c   :  { %v930_v49 = vld [vmem:[%s6999_s1 + $0x1c18] sm:$0xff] }
 0x15d   :  { %2874 = vmatpush1.bf16.msra.mxu1 %v2873_v0  ;;  %v2893_v0 = vpack.c.bf16 %v397_v55, %v395_v53  ;;  %v3421_v53 = vpack.c.bf16 %v925_v4, %v923_v43  ;;  %v2911_v55 = vpack.c.bf16 %v418_v47, %v416_v46  ;;  %v431_v4 = vld [vmem:[%s6999_s1 + $0xc80] sm:$0xff]  ;;  %v433_v46 = vld [vmem:[%s6999_s1 + $0xc90] sm:$0xff] }
 0x15e   :  { %3386 = vmatpush1.bf16.msra.mxu0 %v3385_v1  ;;  %2876 = vmatprep.subr.bf16.mxu1 %v2875_v54  ;;  %v3405_v1 = vpack.c.bf16 %v909_v58, %v907_v56  ;;  %v2895_v54 = vpack.c.bf16 %v402_v61, %v400_v60  ;;  %v415_v56 = vld [vmem:[%s6999_s1 + $0xc00] sm:$0xff]  ;;  %v3423_v60 = vpack.c.bf16 %v930_v49, %v928_v48  ;;  %v929_v61 = vld [vmem:[%s6999_s1 + $0x1c10] sm:$0xff] }
 0x15f   :  { %3388 = vmatprep.subr.bf16.mxu0 %v3387_v3  ;;  %v3407_v3 = vpack.c.bf16 %v914_v50, %v912_v63  ;;  %v927_v58 = vld [vmem:[%s6999_s1 + $0x1c00] sm:$0xff]  ;;  %v420_v63 = vld [vmem:[%s6999_s1 + $0xc28] sm:$0xff]  ;;  %v422_v50 = vld [vmem:[%s6999_s1 + $0xc38] sm:$0xff] }
 0x160   :  { %v943_v47 = vld [vmem:[%s6999_s1 + $0x1c80] sm:$0xff]  ;;  %v945_v49 = vld [vmem:[%s6999_s1 + $0x1c90] sm:$0xff] }
 0x161   :  { %2878 = vmatpush1.bf16.msra.mxu1 %v2877_v10  ;;  %v2897_v10 = vpack.c.bf16 %v401_v30, %v399_v22 }
 0x162   :  { %3390 = vmatpush1.bf16.msra.mxu0 %v3389_v13  ;;  %2880 = vmatprep.subr.bf16.mxu1 %v2879_v14  ;;  %v3409_v13 = vpack.c.bf16 %v913_v28, %v911_v2  ;;  %v2899_v14 = vpack.c.bf16 %v406_v5, %v404_v33  ;;  %v3425_v2 = vpack.c.bf16 %v929_v61, %v927_v58  ;;  %v419_v28 = vld [vmem:[%s6999_s1 + $0xc20] sm:$0xff]  ;;  %v421_v33 = vld [vmem:[%s6999_s1 + $0xc30] sm:$0xff] }
 0x163   :  { %3392 = vmatprep.subr.bf16.mxu0 %v3391_v18  ;;  %v3411_v18 = vpack.c.bf16 %v918_v8, %v916_v7  ;;  %v931_v5 = vld [vmem:[%s6999_s1 + $0x1c20] sm:$0xff]  ;;  %v933_v8 = vld [vmem:[%s6999_s1 + $0x1c30] sm:$0xff]  ;;  %v3441_v58 = vpack.c.bf16 %v945_v49, %v943_v47 }
 0x164   :  { %v435_v61 = vld [vmem:[%s6999_s1 + $0xca0] sm:$0xff] }
 0x165   :  { %2882 = vmatpush1.bf16.msra.mxu1 %v2881_v26  ;;  %v2901_v26 = vpack.c.bf16 %v405_v16, %v403_v15  ;;  %v936_v15 = vld [vmem:[%s6999_s1 + $0x1c48] sm:$0xff]  ;;  %v938_v16 = vld [vmem:[%s6999_s1 + $0x1c58] sm:$0xff]  ;;  %v451_v47 = vld [vmem:[%s6999_s1 + $0xd20] sm:$0xff] }
 0x166   :  { %3394 = vmatpush1.bf16.msra.mxu0 %v3393_v27  ;;  %2884 = vmatprep.subr.bf16.mxu1 %v2883_v29  ;;  %v3413_v27 = vpack.c.bf16 %v917_v19, %v915_v17  ;;  %v2903_v29 = vpack.c.bf16 %v410_v21, %v408_v20  ;;  %v3429_v19 = vpack.c.bf16 %v933_v8, %v931_v5  ;;  %v425_v21 = vld [vmem:[%s6999_s1 + $0xc50] sm:$0xff]  ;;  %v439_v8 = vld [vmem:[%s6999_s1 + $0xcc0] sm:$0xff] }
 0x167   :  { %3396 = vmatprep.subr.bf16.mxu0 %v3395_v34  ;;  %v3415_v34 = vpack.c.bf16 %v922_v24, %v920_v23  ;;  %v935_v23 = vld [vmem:[%s6999_s1 + $0x1c40] sm:$0xff]  ;;  %v3431_v24 = vpack.c.bf16 %v938_v16, %v936_v15  ;;  %v953_v15 = vld [vmem:[%s6999_s1 + $0x1cd0] sm:$0xff]  ;;  %v444_v16 = vld [vmem:[%s6999_s1 + $0xce8] sm:$0xff] }
 0x168   :  { %v963_v49 = vld [vmem:[%s6999_s1 + $0x1d20] sm:$0xff] }
 0x169   :  { %2886 = vmatpush1.bf16.msra.mxu1 %v2885_v40  ;;  %v2905_v40 = vpack.c.bf16 %v409_v31, %v407_v59  ;;  %v942_v59 = vld [vmem:[%s6999_s1 + $0x1c78] sm:$0xff] }
 0x16a   :  { %3398 = vmatpush1.bf16.msra.mxu0 %v3397_v9  ;;  %2888 = vmatprep.subr.bf16.mxu1 %v2887_v41  ;;  %v3417_v9 = vpack.c.bf16 %v921_v35, %v919_v32  ;;  %v2907_v41 = vpack.c.bf16 %v414_v37, %v412_v36  ;;  %v427_v35 = vld [vmem:[%s6999_s1 + $0xc60] sm:$0xff]  ;;  %v429_v36 = vld [vmem:[%s6999_s1 + $0xc70] sm:$0xff] }
 0x16b   :  { %3400 = vmatprep.subr.bf16.mxu0 %v3399_v44  ;;  %v3419_v44 = vpack.c.bf16 %v926_v39, %v924_v38  ;;  %v939_v37 = vld [vmem:[%s6999_s1 + $0x1c60] sm:$0xff]  ;;  %v941_v39 = vld [vmem:[%s6999_s1 + $0x1c70] sm:$0xff] }
 0x16c   :  { %v3437_v43 = vpack.c.bf16 %v941_v39, %v939_v37  ;;  %v447_v37 = vld [vmem:[%s6999_s1 + $0xd00] sm:$0xff] }
 0x16d   :  { %2890 = vmatpush1.bf16.msra.mxu1 %v2889_v25  ;;  %v6114_v25 = vld [vmem:[%s7000_s0 + $0x18] sm:$0xff]  ;;  %v959_v39 = vld [vmem:[%s6999_s1 + $0x1d00] sm:$0xff] }
 0x16e   :  { %3402 = vmatpush1.bf16.msra.mxu0 %v3401_v51  ;;  %2892 = vmatprep.subr.bf16.mxu1 %v2891_v52  ;;  %v2909_v51 = vpack.c.bf16 %v413_v12, %v411_v42  ;;  %v6119_v52 = vld [vmem:[%s7000_s0 + $0x38] sm:$0xff]  ;;  %v2925_v12 = vpack.c.bf16 %v429_v36, %v427_v35 }
 0x16f   :  { %3404 = vmatprep.subr.bf16.mxu0 %v3403_v57  ;;  %v417_v57 = vld [vmem:[%s6999_s1 + $0xc10] sm:$0xff]  ;;  %v6151_v22 = vrot.slane %v6119_v52, %v3951_v11  ;;  %v946_v42 = vld [vmem:[%s6999_s1 + $0x1c98] sm:$0xff] }
 0x170   :  { %v2913_v30 = vpack.c.bf16 %v417_v57, %v415_v56  ;;  %v950_v56 = vld [vmem:[%s6999_s1 + $0x1cb8] sm:$0xff]  ;;  %v2929_v57 = vpack.c.bf16 %v433_v46, %v431_v4 }
 0x171   :  { %2894 = vmatpush1.bf16.msra.mxu1 %v2893_v0  ;;  %v6141_v0 = vrot.slane %v6114_v25, %v3951_v11  ;;  %v1197_v17 = vcombine.high %v6151_v22, %v6151_v22 }
 0x172   :  { %3406 = vmatpush1.bf16.msra.mxu0 %v3405_v1  ;;  %2896 = vmatprep.subr.bf16.mxu1 %v2895_v54  ;;  %v932_v1 = vld [vmem:[%s6999_s1 + $0x1c28] sm:$0xff]  ;;  %v934_v54 = vld [vmem:[%s6999_s1 + $0x1c38] sm:$0xff] }
 0x173   :  { %3408 = vmatprep.subr.bf16.mxu0 %v3407_v3  ;;  %v2915_v3 = vpack.c.bf16 %v422_v50, %v420_v63  ;;  %v3427_v7 = vpack.c.bf16 %v934_v54, %v932_v1  ;;  %v437_v63 = vld [vmem:[%s6999_s1 + $0xcb0] sm:$0xff]  ;;  %v947_v50 = vld [vmem:[%s6999_s1 + $0x1ca0] sm:$0xff] }
 0x174   :  { %v949_v54 = vld [vmem:[%s6999_s1 + $0x1cb0] sm:$0xff] }
 0x175   :  { %2898 = vmatpush1.bf16.msra.mxu1 %v2897_v10  ;;  %v424_v10 = vld [vmem:[%s6999_s1 + $0xc48] sm:$0xff]  ;;  %v3445_v5 = vpack.c.bf16 %v949_v54, %v947_v50  ;;  %v455_v50 = vld [vmem:[%s6999_s1 + $0xd40] sm:$0xff] }
 0x176   :  { %3410 = vmatpush1.bf16.msra.mxu0 %v3409_v13  ;;  %2900 = vmatprep.subr.bf16.mxu1 %v2899_v14  ;;  %v426_v13 = vld [vmem:[%s6999_s1 + $0xc58] sm:$0xff]  ;;  %v1129_v14 = vcombine.high %v6141_v0, %v6141_v0  ;;  %v967_v54 = vld [vmem:[%s6999_s1 + $0x1d40] sm:$0xff] }
 0x177   :  { %3412 = vmatprep.subr.bf16.mxu0 %v3411_v18  ;;  %v2917_v18 = vpack.c.bf16 %v421_v33, %v419_v28  ;;  %v2919_v20 = vpack.c.bf16 %v426_v13, %v424_v10  ;;  %v954_v28 = vld [vmem:[%s6999_s1 + $0x1cd8] sm:$0xff]  ;;  %v2933_v33 = vpack.c.bf16 %v437_v63, %v435_v61  ;;  %v441_v10 = vld [vmem:[%s6999_s1 + $0xcd0] sm:$0xff]  ;;  %v951_v13 = vld [vmem:[%s6999_s1 + $0x1cc0] sm:$0xff] }
 0x179   :  { %2902 = vmatpush1.bf16.msra.mxu1 %v2901_v26  ;;  %v428_v26 = vld [vmem:[%s6999_s1 + $0xc68] sm:$0xff] }
 0x17a   :  { %3414 = vmatpush1.bf16.msra.mxu0 %v3413_v27  ;;  %2904 = vmatprep.subr.bf16.mxu1 %v2903_v29  ;;  %v430_v27 = vld [vmem:[%s6999_s1 + $0xc78] sm:$0xff]  ;;  %v940_v29 = vld [vmem:[%s6999_s1 + $0x1c68] sm:$0xff] }
 0x17b   :  { %3416 = vmatprep.subr.bf16.mxu0 %v3415_v34  ;;  %v2923_v34 = vpack.c.bf16 %v430_v27, %v428_v26  ;;  %v3435_v38 = vpack.c.bf16 %v942_v59, %v940_v29  ;;  %v957_v27 = vld [vmem:[%s6999_s1 + $0x1cf0] sm:$0xff]  ;;  %v448_v29 = vld [vmem:[%s6999_s1 + $0xd08] sm:$0xff]  ;;  %v450_v59 = vld [vmem:[%s6999_s1 + $0xd18] sm:$0xff] }
 0x17c   :  { %v2943_v36 = vpack.c.bf16 %v450_v59, %v448_v29  ;;  %v977_v59 = vld [vmem:[%s6999_s1 + $0x1d90] sm:$0xff] }
 0x17d   :  { %2906 = vmatpush1.bf16.msra.mxu1 %v2905_v40  ;;  %v432_v40 = vld [vmem:[%s6999_s1 + $0xc88] sm:$0xff] }
 0x17e   :  { %3418 = vmatpush1.bf16.msra.mxu0 %v3417_v9  ;;  %2908 = vmatprep.subr.bf16.mxu1 %v2907_v41  ;;  %v434_v9 = vld [vmem:[%s6999_s1 + $0xc98] sm:$0xff]  ;;  %v944_v41 = vld [vmem:[%s6999_s1 + $0x1c88] sm:$0xff] }
 0x17f   :  { %3420 = vmatprep.subr.bf16.mxu0 %v3419_v44  ;;  %v2927_v44 = vpack.c.bf16 %v434_v9, %v432_v40  ;;  %v3439_v48 = vpack.c.bf16 %v946_v42, %v944_v41  ;;  %v961_v9 = vld [vmem:[%s6999_s1 + $0x1d10] sm:$0xff]  ;;  %v452_v41 = vld [vmem:[%s6999_s1 + $0xd28] sm:$0xff]  ;;  %v454_v42 = vld [vmem:[%s6999_s1 + $0xd38] sm:$0xff] }
 0x180   :  { %v3457_v4 = vpack.c.bf16 %v961_v9, %v959_v39  ;;  %v2947_v46 = vpack.c.bf16 %v454_v42, %v452_v41  ;;  %v467_v39 = vld [vmem:[%s6999_s1 + $0xda0] sm:$0xff]  ;;  %v981_v42 = vld [vmem:[%s6999_s1 + $0x1db0] sm:$0xff] }
 0x181   :  { %2910 = vmatpush1.bf16.msra.mxu1 %v2909_v51  ;;  %v436_v51 = vld [vmem:[%s6999_s1 + $0xca8] sm:$0xff]  ;;  %v979_v9 = vld [vmem:[%s6999_s1 + $0x1da0] sm:$0xff] }
 0x182   :  { %3422 = vmatpush1.bf16.msra.mxu0 %v3421_v53  ;;  %2912 = vmatprep.subr.bf16.mxu1 %v2911_v55  ;;  %v438_v53 = vld [vmem:[%s6999_s1 + $0xcb8] sm:$0xff]  ;;  %v948_v55 = vld [vmem:[%s6999_s1 + $0x1ca8] sm:$0xff] }
 0x183   :  { %3424 = vmatprep.subr.bf16.mxu0 %v3423_v60  ;;  %v2931_v60 = vpack.c.bf16 %v438_v53, %v436_v51  ;;  %v3443_v1 = vpack.c.bf16 %v950_v56, %v948_v55  ;;  %v965_v53 = vld [vmem:[%s6999_s1 + $0x1d30] sm:$0xff]  ;;  %v456_v55 = vld [vmem:[%s6999_s1 + $0xd48] sm:$0xff]  ;;  %v458_v56 = vld [vmem:[%s6999_s1 + $0xd58] sm:$0xff] }
 0x184   :  { %1651 = vmatmul.mubr.f32.vlgmr.msra.gmra.mrb[0].mxu1 %v5734_v45  ;;  %v423_v45 = vld [vmem:[%s6999_s1 + $0xc40] sm:$0xff]  ;;  %v3461_v61 = vpack.c.bf16 %v965_v53, %v963_v49  ;;  %v2951_v63 = vpack.c.bf16 %v458_v56, %v456_v55  ;;  %v985_v56 = vld [vmem:[%s6999_s1 + $0x1dd0] sm:$0xff] }
 0x185   :  { %2914 = vmatpush1.bf16.msra.mxu1 %v2913_v30  ;;  %2219 = vmatmul.mubr.f32.vlgmr.msra.gmra.mrb[0].mxu0 %v5743_v6  ;;  %v937_v6 = vld [vmem:[%s6999_s1 + $0x1c50] sm:$0xff]  ;;  %v2921_v31 = vpack.c.bf16 %v425_v21, %v423_v45  ;;  %v440_v30 = vld [vmem:[%s6999_s1 + $0xcc8] sm:$0xff]  ;;  %v3449_v45 = vpack.c.bf16 %v953_v15, %v951_v13  ;;  %v459_v13 = vld [vmem:[%s6999_s1 + $0xd60] sm:$0xff] }
 0x186   :  { %3426 = vmatpush1.bf16.msra.mxu0 %v3425_v2  ;;  %2916 = vmatprep.subr.bf16.mxu1 %v2915_v3  ;;  %v3433_v32 = vpack.c.bf16 %v937_v6, %v935_v23  ;;  %v442_v2 = vld [vmem:[%s6999_s1 + $0xcd8] sm:$0xff]  ;;  %v952_v3 = vld [vmem:[%s6999_s1 + $0x1cc8] sm:$0xff]  ;;  %v443_v23 = vld [vmem:[%s6999_s1 + $0xce0] sm:$0xff] }
 0x187   :  { %3428 = vmatprep.subr.bf16.mxu0 %v3427_v7  ;;  %1721 = vmatprep.mubr.f32.mxu1 %v1129_v14  ;;  %v2935_v7 = vpack.c.bf16 %v442_v2, %v440_v30  ;;  %v3447_v14 = vpack.c.bf16 %v954_v28, %v952_v3  ;;  %v955_v6 = vld [vmem:[%s6999_s1 + $0x1ce0] sm:$0xff]  ;;  %v969_v2 = vld [vmem:[%s6999_s1 + $0x1d50] sm:$0xff]  ;;  %v460_v3 = vld [vmem:[%s6999_s1 + $0xd68] sm:$0xff] }
 0x188   :  { %2289 = vmatprep.mubr.f32.mxu0 %v1197_v17  ;;  %v446_v17 = vld [vmem:[%s6999_s1 + $0xcf8] sm:$0xff]  ;;  %v3453_v35 = vpack.c.bf16 %v957_v27, %v955_v6  ;;  %v971_v15 = vld [vmem:[%s6999_s1 + $0x1d60] sm:$0xff] }
 0x189   :  { %2918 = vmatpush1.bf16.msra.mxu1 %v2917_v18  ;;  %v956_v18 = vld [vmem:[%s6999_s1 + $0x1ce8] sm:$0xff]  ;;  %v2939_v21 = vpack.c.bf16 %v446_v17, %v444_v16  ;;  %v462_v28 = vld [vmem:[%s6999_s1 + $0xd78] sm:$0xff]  ;;  %v973_v17 = vld [vmem:[%s6999_s1 + $0x1d70] sm:$0xff] }
 0x18a   :  { %3430 = vmatpush1.bf16.msra.mxu0 %v3429_v19  ;;  %2920 = vmatprep.subr.bf16.mxu1 %v2919_v20  ;;  %v958_v19 = vld [vmem:[%s6999_s1 + $0x1cf8] sm:$0xff]  ;;  %v2937_v20 = vpack.c.bf16 %v441_v10, %v439_v8  ;;  %v3465_v8 = vpack.c.bf16 %v969_v2, %v967_v54  ;;  %v2955_v10 = vpack.c.bf16 %v462_v28, %v460_v3  ;;  %v463_v6 = vld [vmem:[%s6999_s1 + $0xd80] sm:$0xff]  ;;  %v989_v28 = vld [vmem:[%s6999_s1 + $0x1df0] sm:$0xff] }
 0x18b   :  { %3432 = vmatprep.subr.bf16.mxu0 %v3431_v24  ;;  %v445_v24 = vld [vmem:[%s6999_s1 + $0xcf0] sm:$0xff]  ;;  %v3451_v26 = vpack.c.bf16 %v958_v19, %v956_v18  ;;  %v464_v18 = vld [vmem:[%s6999_s1 + $0xd88] sm:$0xff]  ;;  %v466_v19 = vld [vmem:[%s6999_s1 + $0xd98] sm:$0xff] }
 0x18c   :  { %v975_v27 = vld [vmem:[%s6999_s1 + $0x1d80] sm:$0xff] }
 0x18d   :  { %2922 = vmatpush1.bf16.msra.mxu1 %v2921_v31  ;;  %v960_v31 = vld [vmem:[%s6999_s1 + $0x1d08] sm:$0xff]  ;;  %v471_v49 = vld [vmem:[%s6999_s1 + $0xdc0] sm:$0xff] }
 0x18e   :  { %3434 = vmatpush1.bf16.msra.mxu0 %v3433_v32  ;;  %2924 = vmatprep.subr.bf16.mxu1 %v2923_v34  ;;  %v962_v32 = vld [vmem:[%s6999_s1 + $0x1d18] sm:$0xff]  ;;  %v2941_v34 = vpack.c.bf16 %v445_v24, %v443_v23  ;;  %v3469_v23 = vpack.c.bf16 %v973_v17, %v971_v15  ;;  %v2959_v24 = vpack.c.bf16 %v466_v19, %v464_v18  ;;  %v983_v53 = vld [vmem:[%s6999_s1 + $0x1dc0] sm:$0xff]  ;;  %v481_v17 = vld [vmem:[%s6999_s1 + $0xe10] sm:$0xff] }
 0x18f   :  { %3436 = vmatprep.subr.bf16.mxu0 %v3435_v38  ;;  %v449_v38 = vld [vmem:[%s6999_s1 + $0xd10] sm:$0xff]  ;;  %v3455_v40 = vpack.c.bf16 %v962_v32, %v960_v31  ;;  %v468_v31 = vld [vmem:[%s6999_s1 + $0xda8] sm:$0xff]  ;;  %v470_v32 = vld [vmem:[%s6999_s1 + $0xdb8] sm:$0xff] }
 0x190   :  { %v475_v54 = vld [vmem:[%s6999_s1 + $0xde0] sm:$0xff]  ;;  %v993_v19 = vld [vmem:[%s6999_s1 + $0x1e10] sm:$0xff] }
 0x191   :  { %2926 = vmatpush1.bf16.msra.mxu1 %v2925_v12  ;;  %v964_v12 = vld [vmem:[%s6999_s1 + $0x1d28] sm:$0xff]  ;;  %v987_v2 = vld [vmem:[%s6999_s1 + $0x1de0] sm:$0xff] }
 0x192   :  { %3438 = vmatpush1.bf16.msra.mxu0 %v3437_v43  ;;  %2928 = vmatprep.subr.bf16.mxu1 %v2927_v44  ;;  %v966_v43 = vld [vmem:[%s6999_s1 + $0x1d38] sm:$0xff]  ;;  %v2945_v44 = vpack.c.bf16 %v449_v38, %v447_v37  ;;  %v3473_v37 = vpack.c.bf16 %v977_v59, %v975_v27  ;;  %v2963_v38 = vpack.c.bf16 %v470_v32, %v468_v31  ;;  %v991_v18 = vld [vmem:[%s6999_s1 + $0x1e00] sm:$0xff]  ;;  %v485_v31 = vld [vmem:[%s6999_s1 + $0xe30] sm:$0xff] }
 0x193   :  { %3440 = vmatprep.subr.bf16.mxu0 %v3439_v48  ;;  %v453_v48 = vld [vmem:[%s6999_s1 + $0xd30] sm:$0xff]  ;;  %v3459_v51 = vpack.c.bf16 %v966_v43, %v964_v12  ;;  %v472_v12 = vld [vmem:[%s6999_s1 + $0xdc8] sm:$0xff]  ;;  %v474_v43 = vld [vmem:[%s6999_s1 + $0xdd8] sm:$0xff]  ;;  %v3485_v15 = vpack.c.bf16 %v989_v28, %v987_v2  ;;  %v3489_v27 = vpack.c.bf16 %v993_v19, %v991_v18 }
 0x194   :  { %v483_v59 = vld [vmem:[%s6999_s1 + $0xe20] sm:$0xff]  ;;  %v497_v28 = vld [vmem:[%s6999_s1 + $0xe90] sm:$0xff] }
 0x195   :  { %2930 = vmatpush1.bf16.msra.mxu1 %v2929_v57  ;;  %v968_v57 = vld [vmem:[%s6999_s1 + $0x1d48] sm:$0xff]  ;;  %v995_v32 = vld [vmem:[%s6999_s1 + $0x1e20] sm:$0xff]  ;;  %v501_v18 = vld [vmem:[%s6999_s1 + $0xeb0] sm:$0xff] }
 0x196   :  { %3442 = vmatpush1.bf16.msra.mxu0 %v3441_v58  ;;  %2932 = vmatprep.subr.bf16.mxu1 %v2931_v60  ;;  %v970_v58 = vld [vmem:[%s6999_s1 + $0x1d58] sm:$0xff]  ;;  %v2949_v60 = vpack.c.bf16 %v453_v48, %v451_v47  ;;  %v3477_v47 = vpack.c.bf16 %v981_v42, %v979_v9  ;;  %v2967_v48 = vpack.c.bf16 %v474_v43, %v472_v12  ;;  %v489_v12 = vld [vmem:[%s6999_s1 + $0xe50] sm:$0xff]  ;;  %v999_v43 = vld [vmem:[%s6999_s1 + $0x1e40] sm:$0xff] }
 0x197   :  { %3444 = vmatprep.subr.bf16.mxu0 %v3443_v1  ;;  %v457_v1 = vld [vmem:[%s6999_s1 + $0xd50] sm:$0xff]  ;;  %v3463_v30 = vpack.c.bf16 %v970_v58, %v968_v57  ;;  %v476_v57 = vld [vmem:[%s6999_s1 + $0xde8] sm:$0xff]  ;;  %v478_v58 = vld [vmem:[%s6999_s1 + $0xdf8] sm:$0xff]  ;;  %v2981_v9 = vpack.c.bf16 %v485_v31, %v483_v59 }
 0x198   :  { %v503_v31 = vld [vmem:[%s6999_s1 + $0xec0] sm:$0xff] }
 0x199   :  { %2934 = vmatpush1.bf16.msra.mxu1 %v2933_v33  ;;  %v972_v33 = vld [vmem:[%s6999_s1 + $0x1d68] sm:$0xff] }
 0x19a   :  { %3446 = vmatpush1.bf16.msra.mxu0 %v3445_v5  ;;  %2936 = vmatprep.subr.bf16.mxu1 %v2935_v7  ;;  %v974_v5 = vld [vmem:[%s6999_s1 + $0x1d78] sm:$0xff]  ;;  %v2953_v7 = vpack.c.bf16 %v457_v1, %v455_v50  ;;  %v3481_v50 = vpack.c.bf16 %v985_v56, %v983_v53  ;;  %v2971_v1 = vpack.c.bf16 %v478_v58, %v476_v57  ;;  %v493_v56 = vld [vmem:[%s6999_s1 + $0xe70] sm:$0xff]  ;;  %v1003_v57 = vld [vmem:[%s6999_s1 + $0x1e60] sm:$0xff] }
 0x19b   :  { %3448 = vmatprep.subr.bf16.mxu0 %v3447_v14  ;;  %v461_v14 = vld [vmem:[%s6999_s1 + $0xd70] sm:$0xff]  ;;  %v3467_v16 = vpack.c.bf16 %v974_v5, %v972_v33  ;;  %v480_v33 = vld [vmem:[%s6999_s1 + $0xe08] sm:$0xff]  ;;  %v482_v5 = vld [vmem:[%s6999_s1 + $0xe18] sm:$0xff] }
 0x19d   :  { %2938 = vmatpush1.bf16.msra.mxu1 %v2937_v20  ;;  %v976_v20 = vld [vmem:[%s6999_s1 + $0x1d88] sm:$0xff] }
 0x19e   :  { %3450 = vmatpush1.bf16.msra.mxu0 %v3449_v45  ;;  %2940 = vmatprep.subr.bf16.mxu1 %v2939_v21  ;;  %v978_v45 = vld [vmem:[%s6999_s1 + $0x1d98] sm:$0xff]  ;;  %v2957_v21 = vpack.c.bf16 %v461_v14, %v459_v13  ;;  %v1182_v13 = vcombine.high %v6119_v52, %v6119_v52 }
 0x19f   :  { %3452 = vmatprep.subr.bf16.mxu0 %v3451_v26  ;;  %v465_v26 = vld [vmem:[%s6999_s1 + $0xd90] sm:$0xff]  ;;  %v3471_v29 = vpack.c.bf16 %v978_v45, %v976_v20  ;;  %v484_v20 = vld [vmem:[%s6999_s1 + $0xe28] sm:$0xff]  ;;  %v486_v45 = vld [vmem:[%s6999_s1 + $0xe38] sm:$0xff] }
 0x1a1   :  { %2942 = vmatpush1.bf16.msra.mxu1 %v2941_v34  ;;  %v980_v34 = vld [vmem:[%s6999_s1 + $0x1da8] sm:$0xff] }
 0x1a2   :  { %3454 = vmatpush1.bf16.msra.mxu0 %v3453_v35  ;;  %2944 = vmatprep.subr.bf16.mxu1 %v2943_v36  ;;  %v982_v35 = vld [vmem:[%s6999_s1 + $0x1db8] sm:$0xff]  ;;  %v2961_v36 = vpack.c.bf16 %v465_v26, %v463_v6  ;;  %v6551_v6 = vrot.slane %v1182_v13, %v3951_v11  ;;  %v1012_v13 = vld [vmem:[%s6999_s1 + $0x1ea8] sm:$0xff] }
 0x1a3   :  { %3456 = vmatprep.subr.bf16.mxu0 %v3455_v40  ;;  %v469_v40 = vld [vmem:[%s6999_s1 + $0xdb0] sm:$0xff]  ;;  %v3475_v41 = vpack.c.bf16 %v982_v35, %v980_v34  ;;  %v488_v35 = vld [vmem:[%s6999_s1 + $0xe48] sm:$0xff] }
 0x1a4   :  { %v997_v34 = vld [vmem:[%s6999_s1 + $0x1e30] sm:$0xff] }
 0x1a5   :  { %2946 = vmatpush1.bf16.msra.mxu1 %v2945_v44  ;;  %v984_v44 = vld [vmem:[%s6999_s1 + $0x1dc8] sm:$0xff] }
 0x1a6   :  { %3458 = vmatpush1.bf16.msra.mxu0 %v3457_v4  ;;  %2948 = vmatprep.subr.bf16.mxu1 %v2947_v46  ;;  %v986_v4 = vld [vmem:[%s6999_s1 + $0x1dd8] sm:$0xff]  ;;  %v2965_v46 = vpack.c.bf16 %v469_v40, %v467_v39  ;;  %v1198_v40 = vcombine.high %v6551_v6, %v6551_v6 }
 0x1a7   :  { %3460 = vmatprep.subr.bf16.mxu0 %v3459_v51  ;;  %v473_v51 = vld [vmem:[%s6999_s1 + $0xdd0] sm:$0xff]  ;;  %v3479_v55 = vpack.c.bf16 %v986_v4, %v984_v44  ;;  %v1002_v39 = vld [vmem:[%s6999_s1 + $0x1e58] sm:$0xff]  ;;  %v492_v4 = vld [vmem:[%s6999_s1 + $0xe68] sm:$0xff] }
 0x1a9   :  { %2950 = vmatpush1.bf16.msra.mxu1 %v2949_v60  ;;  %v988_v60 = vld [vmem:[%s6999_s1 + $0x1de8] sm:$0xff] }
 0x1aa   :  { %3462 = vmatpush1.bf16.msra.mxu0 %v3461_v61  ;;  %2952 = vmatprep.subr.bf16.mxu1 %v2951_v63  ;;  %v990_v61 = vld [vmem:[%s6999_s1 + $0x1df8] sm:$0xff]  ;;  %v2969_v63 = vpack.c.bf16 %v473_v51, %v471_v49 }
 0x1ab   :  { %3464 = vmatprep.subr.bf16.mxu0 %v3463_v30  ;;  %v477_v30 = vld [vmem:[%s6999_s1 + $0xdf0] sm:$0xff]  ;;  %v3483_v3 = vpack.c.bf16 %v990_v61, %v988_v60  ;;  %v496_v61 = vld [vmem:[%s6999_s1 + $0xe88] sm:$0xff] }
 0x1ac   :  { %v2973_v14 = vpack.c.bf16 %v477_v30, %v475_v54  ;;  %v1005_v60 = vld [vmem:[%s6999_s1 + $0x1e70] sm:$0xff] }
 0x1ad   :  { %2954 = vmatpush1.bf16.msra.mxu1 %v2953_v7  ;;  %v1114_v7 = vcombine.high %v6114_v25, %v6114_v25  ;;  %v479_v25 = vld [vmem:[%s6999_s1 + $0xe00] sm:$0xff]  ;;  %v3501_v30 = vpack.c.bf16 %v1005_v60, %v1003_v57  ;;  %v516_v60 = vld [vmem:[%s6999_s1 + $0xf28] sm:$0xff] }
 0x1ae   :  { %3466 = vmatpush1.bf16.msra.mxu0 %v3465_v8  ;;  %2956 = vmatprep.subr.bf16.mxu1 %v2955_v10  ;;  %v992_v8 = vld [vmem:[%s6999_s1 + $0x1e08] sm:$0xff]  ;;  %v994_v10 = vld [vmem:[%s6999_s1 + $0x1e18] sm:$0xff]  ;;  %v2977_v26 = vpack.c.bf16 %v481_v17, %v479_v25  ;;  %v499_v17 = vld [vmem:[%s6999_s1 + $0xea0] sm:$0xff] }
 0x1af   :  { %3468 = vmatprep.subr.bf16.mxu0 %v3467_v16  ;;  %v2975_v16 = vpack.c.bf16 %v482_v5, %v480_v33  ;;  %v3487_v52 = vpack.c.bf16 %v994_v10, %v992_v8  ;;  %v1007_v33 = vld [vmem:[%s6999_s1 + $0x1e80] sm:$0xff]  ;;  %v500_v8 = vld [vmem:[%s6999_s1 + $0xea8] sm:$0xff]  ;;  %v502_v10 = vld [vmem:[%s6999_s1 + $0xeb8] sm:$0xff] }
 0x1b0   :  { %v2995_v25 = vpack.c.bf16 %v502_v10, %v500_v8  ;;  %v522_v8 = vld [vmem:[%s6999_s1 + $0xf58] sm:$0xff]  ;;  %v1032_v10 = vld [vmem:[%s6999_s1 + $0x1f48] sm:$0xff] }
 0x1b1   :  { %2958 = vmatpush1.bf16.msra.mxu1 %v2957_v21  ;;  %v6542_v21 = vrot.slane %v1114_v7, %v3951_v11  ;;  %v1009_v7 = vld [vmem:[%s6999_s1 + $0x1e90] sm:$0xff] }
 0x1b2   :  { %3470 = vmatpush1.bf16.msra.mxu0 %v3469_v23  ;;  %2960 = vmatprep.subr.bf16.mxu1 %v2959_v24  ;;  %v996_v23 = vld [vmem:[%s6999_s1 + $0x1e28] sm:$0xff]  ;;  %v998_v24 = vld [vmem:[%s6999_s1 + $0x1e38] sm:$0xff] }
 0x1b3   :  { %3472 = vmatprep.subr.bf16.mxu0 %v3471_v29  ;;  %v2979_v29 = vpack.c.bf16 %v486_v45, %v484_v20  ;;  %v3491_v11 = vpack.c.bf16 %v998_v24, %v996_v23  ;;  %v1013_v20 = vld [vmem:[%s6999_s1 + $0x1eb0] sm:$0xff]  ;;  %v504_v45 = vld [vmem:[%s6999_s1 + $0xec8] sm:$0xff]  ;;  %v506_v23 = vld [vmem:[%s6999_s1 + $0xed8] sm:$0xff] }
 0x1b4   :  { %v1016_v24 = vld [vmem:[%s6999_s1 + $0x1ec8] sm:$0xff]  ;;  %v2999_v59 = vpack.c.bf16 %v506_v23, %v504_v45  ;;  %v526_v45 = vld [vmem:[%s6999_s1 + $0xf78] sm:$0xff] }
 0x1b5   :  { %2962 = vmatpush1.bf16.msra.mxu1 %v2961_v36  ;;  %v490_v36 = vld [vmem:[%s6999_s1 + $0xe58] sm:$0xff]  ;;  %v1036_v23 = vld [vmem:[%s6999_s1 + $0x1f68] sm:$0xff] }
 0x1b6   :  { %3474 = vmatpush1.bf16.msra.mxu0 %v3473_v37  ;;  %2964 = vmatprep.subr.bf16.mxu1 %v2963_v38  ;;  %v1130_v37 = vcombine.high %v6542_v21, %v6542_v21  ;;  %v1000_v38 = vld [vmem:[%s6999_s1 + $0x1e48] sm:$0xff]  ;;  %v2983_v42 = vpack.c.bf16 %v490_v36, %v488_v35  ;;  %v1017_v35 = vld [vmem:[%s6999_s1 + $0x1ed0] sm:$0xff] }
 0x1b7   :  { %3476 = vmatprep.subr.bf16.mxu0 %v3475_v41  ;;  %v3493_v41 = vpack.c.bf16 %v997_v34, %v995_v32  ;;  %v3495_v44 = vpack.c.bf16 %v1002_v39, %v1000_v38  ;;  %v505_v32 = vld [vmem:[%s6999_s1 + $0xed0] sm:$0xff]  ;;  %v508_v36 = vld [vmem:[%s6999_s1 + $0xee8] sm:$0xff]  ;;  %v1022_v39 = vld [vmem:[%s6999_s1 + $0x1ef8] sm:$0xff] }
 0x1b8   :  { %v1020_v38 = vld [vmem:[%s6999_s1 + $0x1ee8] sm:$0xff] }
 0x1b9   :  { %2966 = vmatpush1.bf16.msra.mxu1 %v2965_v46  ;;  %v494_v46 = vld [vmem:[%s6999_s1 + $0xe78] sm:$0xff] }
 0x1ba   :  { %3478 = vmatpush1.bf16.msra.mxu0 %v3477_v47  ;;  %2968 = vmatprep.subr.bf16.mxu1 %v2967_v48  ;;  %v1004_v47 = vld [vmem:[%s6999_s1 + $0x1e68] sm:$0xff]  ;;  %v1006_v48 = vld [vmem:[%s6999_s1 + $0x1e78] sm:$0xff]  ;;  %v2987_v53 = vpack.c.bf16 %v494_v46, %v492_v4 }
 0x1bb   :  { %3480 = vmatprep.subr.bf16.mxu0 %v3479_v55  ;;  %v491_v55 = vld [vmem:[%s6999_s1 + $0xe60] sm:$0xff]  ;;  %v3499_v58 = vpack.c.bf16 %v1006_v48, %v1004_v47  ;;  %v514_v4 = vld [vmem:[%s6999_s1 + $0xf18] sm:$0xff]  ;;  %v1024_v46 = vld [vmem:[%s6999_s1 + $0x1f08] sm:$0xff] }
 0x1bc   :  { %v2989_v54 = vpack.c.bf16 %v493_v56, %v491_v55  ;;  %v1026_v47 = vld [vmem:[%s6999_s1 + $0x1f18] sm:$0xff]  ;;  %v513_v55 = vld [vmem:[%s6999_s1 + $0xf10] sm:$0xff]  ;;  %v1023_v56 = vld [vmem:[%s6999_s1 + $0x1f00] sm:$0xff] }
 0x1bd   :  { %2970 = vmatpush1.bf16.msra.mxu1 %v2969_v63  ;;  %v498_v63 = vld [vmem:[%s6999_s1 + $0xe98] sm:$0xff]  ;;  %v3519_v57 = vpack.c.bf16 %v1026_v47, %v1024_v46 }
 0x1be   :  { %3482 = vmatpush1.bf16.msra.mxu0 %v3481_v50  ;;  %2972 = vmatprep.subr.bf16.mxu1 %v2971_v1  ;;  %v1008_v50 = vld [vmem:[%s6999_s1 + $0x1e88] sm:$0xff]  ;;  %v1010_v1 = vld [vmem:[%s6999_s1 + $0x1e98] sm:$0xff]  ;;  %v2991_v2 = vpack.c.bf16 %v498_v63, %v496_v61 }
 0x1bf   :  { %3484 = vmatprep.subr.bf16.mxu0 %v3483_v3  ;;  %v495_v3 = vld [vmem:[%s6999_s1 + $0xe80] sm:$0xff]  ;;  %v3503_v5 = vpack.c.bf16 %v1010_v1, %v1008_v50  ;;  %v518_v61 = vld [vmem:[%s6999_s1 + $0xf38] sm:$0xff]  ;;  %v1028_v63 = vld [vmem:[%s6999_s1 + $0x1f28] sm:$0xff] }
 0x1c0   :  { %v1030_v50 = vld [vmem:[%s6999_s1 + $0x1f38] sm:$0xff] }
 0x1c1   :  { %2974 = vmatpush1.bf16.msra.mxu1 %v2973_v14  ;;  %v1014_v14 = vld [vmem:[%s6999_s1 + $0x1eb8] sm:$0xff] }
 0x1c2   :  { %3486 = vmatpush1.bf16.msra.mxu0 %v3485_v15  ;;  %2976 = vmatprep.subr.bf16.mxu1 %v2975_v16  ;;  %v2993_v15 = vpack.c.bf16 %v497_v28, %v495_v3  ;;  %v3505_v16 = vpack.c.bf16 %v1009_v7, %v1007_v33  ;;  %v3507_v19 = vpack.c.bf16 %v1014_v14, %v1012_v13  ;;  %v517_v3 = vld [vmem:[%s6999_s1 + $0xf30] sm:$0xff]  ;;  %v1027_v28 = vld [vmem:[%s6999_s1 + $0x1f20] sm:$0xff]  ;;  %v520_v7 = vld [vmem:[%s6999_s1 + $0xf48] sm:$0xff] }
 0x1c3   :  { %3488 = vmatprep.subr.bf16.mxu0 %v3487_v52  ;;  %v1011_v52 = vld [vmem:[%s6999_s1 + $0x1ea0] sm:$0xff]  ;;  %v3523_v33 = vpack.c.bf16 %v1030_v50, %v1028_v63  ;;  %v1034_v13 = vld [vmem:[%s6999_s1 + $0x1f58] sm:$0xff] }
 0x1c4   :  { %1722 = vmatmul.mubr.f32.vlgmr.msra.gmra.mrb[0].mxu1 %v6141_v0  ;;  %v487_v0 = vld [vmem:[%s6999_s1 + $0xe40] sm:$0xff]  ;;  %v1046_v46 = vld [vmem:[%s6999_s1 + $0x1fb8] sm:$0xff] }
 0x1c5   :  { %2978 = vmatpush1.bf16.msra.mxu1 %v2977_v26  ;;  %2290 = vmatmul.mubr.f32.vlgmr.msra.gmra.mrb[0].mxu0 %v6151_v22  ;;  %v1001_v22 = vld [vmem:[%s6999_s1 + $0x1e50] sm:$0xff]  ;;  %v2985_v49 = vpack.c.bf16 %v489_v12, %v487_v0  ;;  %v1018_v26 = vld [vmem:[%s6999_s1 + $0x1ed8] sm:$0xff]  ;;  %v1019_v12 = vld [vmem:[%s6999_s1 + $0x1ee0] sm:$0xff] }
 0x1c6   :  { %3490 = vmatpush1.bf16.msra.mxu0 %v3489_v27  ;;  %2980 = vmatprep.subr.bf16.mxu1 %v2979_v29  ;;  %v3497_v51 = vpack.c.bf16 %v1001_v22, %v999_v43  ;;  %v2997_v27 = vpack.c.bf16 %v501_v18, %v499_v17  ;;  %v3509_v29 = vpack.c.bf16 %v1013_v20, %v1011_v52  ;;  %v509_v0 = vld [vmem:[%s6999_s1 + $0xef0] sm:$0xff]  ;;  %v512_v22 = vld [vmem:[%s6999_s1 + $0xf08] sm:$0xff]  ;;  %v1031_v18 = vld [vmem:[%s6999_s1 + $0x1f40] sm:$0xff] }
 0x1c7   :  { %3492 = vmatprep.subr.bf16.mxu0 %v3491_v11  ;;  %1792 = vmatprep.mubr.f32.mxu1 %v1130_v37  ;;  %v1015_v11 = vld [vmem:[%s6999_s1 + $0x1ec0] sm:$0xff]  ;;  %v3511_v34 = vpack.c.bf16 %v1018_v26, %v1016_v24  ;;  %v510_v37 = vld [vmem:[%s6999_s1 + $0xef8] sm:$0xff]  ;;  %v3515_v43 = vpack.c.bf16 %v1022_v39, %v1020_v38  ;;  %v521_v17 = vld [vmem:[%s6999_s1 + $0xf50] sm:$0xff]  ;;  %v3527_v52 = vpack.c.bf16 %v1034_v13, %v1032_v10 }
 0x1c8   :  { %2360 = vmatprep.mubr.f32.mxu0 %v1198_v40  ;;  %v3001_v40 = vpack.c.bf16 %v505_v32, %v503_v31  ;;  %v524_v20 = vld [vmem:[%s6999_s1 + $0xf68] sm:$0xff]  ;;  %v1038_v24 = vld [vmem:[%s6999_s1 + $0x1f78] sm:$0xff]  ;;  %v525_v31 = vld [vmem:[%s6999_s1 + $0xf70] sm:$0xff] }
 0x1c9   :  { %2982 = vmatpush1.bf16.msra.mxu1 %v2981_v9  ;;  %v3513_v9 = vpack.c.bf16 %v1017_v35, %v1015_v11  ;;  %v1035_v32 = vld [vmem:[%s6999_s1 + $0x1f60] sm:$0xff]  ;;  %v3531_v11 = vpack.c.bf16 %v1038_v24, %v1036_v23  ;;  %v528_v35 = vld [vmem:[%s6999_s1 + $0xf88] sm:$0xff]  ;;  %v1042_v38 = vld [vmem:[%s6999_s1 + $0x1f98] sm:$0xff] }
 0x1ca   :  { %3494 = vmatpush1.bf16.msra.mxu0 %v3493_v41  ;;  %2984 = vmatprep.subr.bf16.mxu1 %v2983_v42  ;;  %v3003_v41 = vpack.c.bf16 %v510_v37, %v508_v36  ;;  %v507_v42 = vld [vmem:[%s6999_s1 + $0xee0] sm:$0xff]  ;;  %v530_v36 = vld [vmem:[%s6999_s1 + $0xf98] sm:$0xff]  ;;  %v1040_v37 = vld [vmem:[%s6999_s1 + $0x1f88] sm:$0xff] }
 0x1cb   :  { %3496 = vmatprep.subr.bf16.mxu0 %v3495_v44  ;;  %v1021_v44 = vld [vmem:[%s6999_s1 + $0x1ef0] sm:$0xff]  ;;  %v3005_v48 = vpack.c.bf16 %v509_v0, %v507_v42  ;;  %v1039_v0 = vld [vmem:[%s6999_s1 + $0x1f80] sm:$0xff]  ;;  %v1050_v63 = vld [vmem:[%s6999_s1 + $0x1fd8] sm:$0xff] }
 0x1cc   :  { %v529_v42 = vld [vmem:[%s6999_s1 + $0xf90] sm:$0xff]  ;;  %v1054_v10 = vld [vmem:[%s6999_s1 + $0x1ff8] sm:$0xff]  ;;  %v2368_v23 = vld [vmem:[%s7001_s2 + $0x8] sm:$0xff] }
 0x1cd   :  { %2986 = vmatpush1.bf16.msra.mxu1 %v2985_v49  ;;  %v3517_v49 = vpack.c.bf16 %v1021_v44, %v1019_v12  ;;  %v3535_v12 = vpack.c.bf16 %v1042_v38, %v1040_v37  ;;  %v532_v44 = vld [vmem:[%s6999_s1 + $0xfa8] sm:$0xff]  ;;  %v2377_v38 = vld [vmem:[%s7001_s2 + $0x50] sm:$0xff] }
 0x1ce   :  { %3498 = vmatpush1.bf16.msra.mxu0 %v3497_v51  ;;  %2988 = vmatprep.subr.bf16.mxu1 %v2987_v53  ;;  %v3007_v51 = vpack.c.bf16 %v514_v4, %v512_v22  ;;  %v511_v53 = vld [vmem:[%s6999_s1 + $0xf00] sm:$0xff]  ;;  %v534_v22 = vld [vmem:[%s6999_s1 + $0xfb8] sm:$0xff]  ;;  %v1044_v4 = vld [vmem:[%s6999_s1 + $0x1fa8] sm:$0xff] }
 0x1cf   :  { %3500 = vmatprep.subr.bf16.mxu0 %v3499_v58  ;;  %v1025_v58 = vld [vmem:[%s6999_s1 + $0x1f10] sm:$0xff]  ;;  %v3009_v1 = vpack.c.bf16 %v513_v55, %v511_v53  ;;  %v1043_v55 = vld [vmem:[%s6999_s1 + $0x1fa0] sm:$0xff] }
 0x1d0   :  { %v533_v53 = vld [vmem:[%s6999_s1 + $0xfb0] sm:$0xff] }
 0x1d1   :  { %2990 = vmatpush1.bf16.msra.mxu1 %v2989_v54  ;;  %v3521_v54 = vpack.c.bf16 %v1025_v58, %v1023_v56  ;;  %v3539_v56 = vpack.c.bf16 %v1046_v46, %v1044_v4  ;;  %v536_v58 = vld [vmem:[%s6999_s1 + $0xfc8] sm:$0xff]  ;;  %v2385_v46 = vld [vmem:[%s7001_s2 + $0x90] sm:$0xff] }
 0x1d2   :  { %3502 = vmatpush1.bf16.msra.mxu0 %v3501_v30  ;;  %2992 = vmatprep.subr.bf16.mxu1 %v2991_v2  ;;  %v3011_v30 = vpack.c.bf16 %v518_v61, %v516_v60  ;;  %v515_v2 = vld [vmem:[%s6999_s1 + $0xf20] sm:$0xff]  ;;  %v538_v60 = vld [vmem:[%s6999_s1 + $0xfd8] sm:$0xff]  ;;  %v1048_v61 = vld [vmem:[%s6999_s1 + $0x1fc8] sm:$0xff] }
 0x1d3   :  { %3504 = vmatprep.subr.bf16.mxu0 %v3503_v5  ;;  %v1029_v5 = vld [vmem:[%s6999_s1 + $0x1f30] sm:$0xff]  ;;  %v3013_v14 = vpack.c.bf16 %v517_v3, %v515_v2  ;;  %v1047_v3 = vld [vmem:[%s6999_s1 + $0x1fc0] sm:$0xff] }
 0x1d4   :  { %v537_v2 = vld [vmem:[%s6999_s1 + $0xfd0] sm:$0xff] }
 0x1d5   :  { %2994 = vmatpush1.bf16.msra.mxu1 %v2993_v15  ;;  %v3525_v15 = vpack.c.bf16 %v1029_v5, %v1027_v28  ;;  %v3543_v28 = vpack.c.bf16 %v1050_v63, %v1048_v61  ;;  %v540_v5 = vld [vmem:[%s6999_s1 + $0xfe8] sm:$0xff]  ;;  %v2478_v61 = vld [vmem:[%s7002_s3] sm:$0x1] }
 0x1d6   :  { %3506 = vmatpush1.bf16.msra.mxu0 %v3505_v16  ;;  %2996 = vmatprep.subr.bf16.mxu1 %v2995_v25  ;;  %v3015_v16 = vpack.c.bf16 %v522_v8, %v520_v7  ;;  %v519_v25 = vld [vmem:[%s6999_s1 + $0xf40] sm:$0xff]  ;;  %v542_v7 = vld [vmem:[%s6999_s1 + $0xff8] sm:$0xff]  ;;  %v1052_v8 = vld [vmem:[%s6999_s1 + $0x1fe8] sm:$0xff]  ;;  %v2479_v63 = vmul.f32 %v2478_v61, %v2478_v61 }
 0x1d7   :  { %3508 = vmatprep.subr.bf16.mxu0 %v3507_v19  ;;  %v1033_v19 = vld [vmem:[%s6999_s1 + $0x1f50] sm:$0xff]  ;;  %v3017_v26 = vpack.c.bf16 %v521_v17, %v519_v25  ;;  %v3547_v17 = vpack.c.bf16 %v1054_v10, %v1052_v8 }
 0x1d8   :  { %v541_v25 = vld [vmem:[%s6999_s1 + $0xff0] sm:$0xff] }
 0x1d9   :  { %2998 = vmatpush1.bf16.msra.mxu1 %v2997_v27  ;;  %v3529_v27 = vpack.c.bf16 %v1033_v19, %v1031_v18  ;;  %v1051_v18 = vld [vmem:[%s6999_s1 + $0x1fe0] sm:$0xff] }
 0x1da   :  { %3510 = vmatpush1.bf16.msra.mxu0 %v3509_v29  ;;  %3000 = vmatprep.subr.bf16.mxu1 %v2999_v59  ;;  %v3019_v29 = vpack.c.bf16 %v526_v45, %v524_v20  ;;  %v523_v59 = vld [vmem:[%s6999_s1 + $0xf60] sm:$0xff] }
 0x1db   :  { %3512 = vmatprep.subr.bf16.mxu0 %v3511_v34  ;;  %v1037_v34 = vld [vmem:[%s6999_s1 + $0x1f70] sm:$0xff]  ;;  %v3021_v39 = vpack.c.bf16 %v525_v31, %v523_v59  ;;  %v2367_v45 = vld [vmem:[%s7001_s2] sm:$0xff] }
 0x1dc   :  { %v3552_v24 = vpack.c.bf16 %v2368_v23, %v2367_v45  ;;  %v2371_v31 = vld [vmem:[%s7001_s2 + $0x20] sm:$0xff] }
 0x1dd   :  { %3002 = vmatpush1.bf16.msra.mxu1 %v3001_v40  ;;  %v3533_v40 = vpack.c.bf16 %v1037_v34, %v1035_v32  ;;  %v2372_v32 = vld [vmem:[%s7001_s2 + $0x28] sm:$0xff] }
 0x1de   :  { %3514 = vmatpush1.bf16.msra.mxu0 %v3513_v9  ;;  %3004 = vmatprep.subr.bf16.mxu1 %v3003_v41  ;;  %v3023_v9 = vpack.c.bf16 %v530_v36, %v528_v35  ;;  %v527_v41 = vld [vmem:[%s6999_s1 + $0xf80] sm:$0xff]  ;;  %v2376_v36 = vld [vmem:[%s7001_s2 + $0x48] sm:$0xff] }
 0x1df   :  { %3516 = vmatprep.subr.bf16.mxu0 %v3515_v43  ;;  %v1041_v43 = vld [vmem:[%s6999_s1 + $0x1f90] sm:$0xff]  ;;  %v3025_v47 = vpack.c.bf16 %v529_v42, %v527_v41  ;;  %v2375_v35 = vld [vmem:[%s7001_s2 + $0x40] sm:$0xff]  ;;  %v2380_v41 = vld [vmem:[%s7001_s2 + $0x68] sm:$0xff] }
 0x1e0   :  { %v3564_v37 = vpack.c.bf16 %v2376_v36, %v2375_v35 }
 0x1e1   :  { %3006 = vmatpush1.bf16.msra.mxu1 %v3005_v48  ;;  %v3537_v48 = vpack.c.bf16 %v1041_v43, %v1039_v0  ;;  %v2381_v0 = vld [vmem:[%s7001_s2 + $0x70] sm:$0xff] }
 0x1e2   :  { %3518 = vmatpush1.bf16.msra.mxu0 %v3517_v49  ;;  %3008 = vmatprep.subr.bf16.mxu1 %v3007_v51  ;;  %v3027_v49 = vpack.c.bf16 %v534_v22, %v532_v44  ;;  %v531_v51 = vld [vmem:[%s6999_s1 + $0xfa0] sm:$0xff]  ;;  %v2384_v22 = vld [vmem:[%s7001_s2 + $0x88] sm:$0xff] }
 0x1e3   :  { %3520 = vmatprep.subr.bf16.mxu0 %v3519_v57  ;;  %v1045_v57 = vld [vmem:[%s6999_s1 + $0x1fb0] sm:$0xff]  ;;  %v3029_v50 = vpack.c.bf16 %v533_v53, %v531_v51  ;;  %v2383_v44 = vld [vmem:[%s7001_s2 + $0x80] sm:$0xff]  ;;  %v2388_v51 = vld [vmem:[%s7001_s2 + $0xa8] sm:$0xff] }
 0x1e4   :  { %v3576_v4 = vpack.c.bf16 %v2384_v22, %v2383_v44 }
 0x1e5   :  { %3010 = vmatpush1.bf16.msra.mxu1 %v3009_v1  ;;  %v3541_v1 = vpack.c.bf16 %v1045_v57, %v1043_v55  ;;  %v2389_v55 = vld [vmem:[%s7001_s2 + $0xb0] sm:$0xff] }
 0x1e6   :  { %3522 = vmatpush1.bf16.msra.mxu0 %v3521_v54  ;;  %3012 = vmatprep.subr.bf16.mxu1 %v3011_v30  ;;  %v3031_v54 = vpack.c.bf16 %v538_v60, %v536_v58  ;;  %v535_v30 = vld [vmem:[%s6999_s1 + $0xfc0] sm:$0xff]  ;;  %v3636_v60 = vmov 0.0  }
 0x1e7   :  { %3524 = vmatprep.subr.bf16.mxu0 %v3523_v33  ;;  %v1049_v33 = vld [vmem:[%s6999_s1 + $0x1fd0] sm:$0xff]  ;;  %v3033_v13 = vpack.c.bf16 %v537_v2, %v535_v30  ;;  %v2391_v58 = vld [vmem:[%s7001_s2 + $0xc0] sm:$0xf] }
 0x1e9   :  { %3014 = vmatpush1.bf16.msra.mxu1 %v3013_v14  ;;  %v3545_v14 = vpack.c.bf16 %v1049_v33, %v1047_v3  ;;  %v2498_v33 = vld [vmem:[%s7004_s5] sm:$0x3] }
 0x1ea   :  { %3526 = vmatpush1.bf16.msra.mxu0 %v3525_v15  ;;  %3016 = vmatprep.subr.bf16.mxu1 %v3015_v16  ;;  %v3035_v15 = vpack.c.bf16 %v542_v7, %v540_v5  ;;  %v539_v16 = vld [vmem:[%s6999_s1 + $0xfe0] sm:$0xff] }
 0x1eb   :  { %3528 = vmatprep.subr.bf16.mxu0 %v3527_v52  ;;  %v1053_v52 = vld [vmem:[%s6999_s1 + $0x1ff0] sm:$0xff]  ;;  %v3037_v19 = vpack.c.bf16 %v541_v25, %v539_v16  ;;  %v2499_v5 = vld [vmem:[%s7003_s4] sm:$0x3] }
 0x1ec   :  { %v3549_v20 = vpack.c.bf16 %v1053_v52, %v1051_v18  ;;  %v2500_v7 = vsub.f32 %v2498_v33, %v2499_v5 }
 0x1ed   :  { %3018 = vmatpush1.bf16.msra.mxu1 %v3017_v26  ;;  %v3635_v26 = vmov 0.0|0.0  }
 0x1ee   :  { %3530 = vmatpush1.bf16.msra.mxu0 %v3529_v27  ;;  %3020 = vmatprep.subr.bf16.mxu1 %v3019_v29  ;;  %v2369_v27 = vld [vmem:[%s7001_s2 + $0x10] sm:$0xff]  ;;  %v2370_v29 = vld [vmem:[%s7001_s2 + $0x18] sm:$0xff]  ;;  %v2501_v8 = vmul.f32 %v2500_v7, %v2500_v7 }
 0x1ef   :  { %3532 = vmatprep.subr.bf16.mxu0 %v3531_v11  ;;  %v3555_v59 = vpack.c.bf16 %v2370_v29, %v2369_v27  ;;  %v3558_v11 = vpack.c.bf16 %v2372_v32, %v2371_v31  ;;  %v2490_v31 = vsub.s32 0, %v3924_v62 }
 0x1f0   :  { %v2503_v10 = vsel %vm2502_vm3, %v2501_v8, 0.0 }
 0x1f1   :  { %3022 = vmatpush1.bf16.msra.mxu1 %v3021_v39  ;;  %v2378_v39 = vld [vmem:[%s7001_s2 + $0x58] sm:$0xff]  ;;  %2504 = vadd.xlane.f32.xlu1 %v2503_v10 }
 0x1f2   :  { %3534 = vmatpush1.bf16.msra.mxu0 %v3533_v40  ;;  %3024 = vmatprep.subr.bf16.mxu1 %v3023_v9  ;;  %v3567_v40 = vpack.c.bf16 %v2378_v39, %v2377_v38  ;;  %v2379_v9 = vld [vmem:[%s7001_s2 + $0x60] sm:$0xff] }
 0x1f3   :  { %3536 = vmatprep.subr.bf16.mxu0 %v3535_v12  ;;  %v3570_v42 = vpack.c.bf16 %v2380_v41, %v2379_v9  ;;  %v2382_v12 = vld [vmem:[%s7001_s2 + $0x78] sm:$0xff] }
 0x1f4   :  { %v3573_v43 = vpack.c.bf16 %v2382_v12, %v2381_v0 }
 0x1f5   :  { %3026 = vmatpush1.bf16.msra.mxu1 %v3025_v47  ;;  %v2386_v47 = vld [vmem:[%s7001_s2 + $0x98] sm:$0xff] }
 0x1f6   :  { %3538 = vmatpush1.bf16.msra.mxu0 %v3537_v48  ;;  %3028 = vmatprep.subr.bf16.mxu1 %v3027_v49  ;;  %v3579_v48 = vpack.c.bf16 %v2386_v47, %v2385_v46  ;;  %v2387_v49 = vld [vmem:[%s7001_s2 + $0xa0] sm:$0xff] }
 0x1f7   :  { %3540 = vmatprep.subr.bf16.mxu0 %v3539_v56  ;;  %v3582_v53 = vpack.c.bf16 %v2388_v51, %v2387_v49  ;;  %v2390_v56 = vld [vmem:[%s7001_s2 + $0xb8] sm:$0xff] }
 0x1f8   :  { %v3585_v57 = vpack.c.bf16 %v2390_v56, %v2389_v55 }
 0x1f9   :  { %3030 = vmatpush1.bf16.msra.mxu1 %v3029_v50  ;;  %v2481_v50 = vsel %vm2480_vm1, %v2479_v63, 0.0 }
 0x1fa   :  { %3542 = vmatpush1.bf16.msra.mxu0 %v3541_v1  ;;  %3032 = vmatprep.subr.bf16.mxu1 %v3031_v54 }
 0x1fb   :  { %3544 = vmatprep.subr.bf16.mxu0 %v3543_v28  ;;  %2482 = vadd.xlane.f32.xlu0 %v2481_v50 }
 0x1fd   :  { %3034 = vmatpush1.bf16.msra.mxu1 %v3033_v13 }
 0x1fe   :  { %3546 = vmatpush1.bf16.msra.mxu0 %v3545_v14  ;;  %3036 = vmatprep.subr.bf16.mxu1 %v3035_v15 }
 0x1ff   :  { %3548 = vmatprep.subr.bf16.mxu0 %v3547_v17 }
 0x201   :  { %3038 = vmatpush1.bf16.msra.mxu1 %v3037_v19 }
 0x202   :  { %3550 = vmatpush1.bf16.msra.mxu0 %v3549_v20  ;;  %3551 = vmatprep.subr.bf16.mxu1 %v3635_v26 }
 0x204   :  { %1793 = vmatmul.mubr.f32.vlgmr.msra.gmra.mrb[0].mxu1 %v6542_v21  ;;  %v2373_v21 = vld [vmem:[%s7001_s2 + $0x30] sm:$0xff] }
 0x205   :  { %2361 = vmatmul.mubr.f32.vlgmr.msra.gmra.mrb[0].mxu0 %v6551_v6  ;;  %3553 = vmatpush1.bf16.msra.mxu1 %v3552_v24  ;;  %v2374_v6 = vld [vmem:[%s7001_s2 + $0x38] sm:$0xff] }
 0x206   :  { %3554 = vmatprep.subr.bf16.mxu1 %v3635_v26  ;;  %v3561_v34 = vpack.c.bf16 %v2374_v6, %v2373_v21 }
 0x209   :  { %3556 = vmatpush1.bf16.msra.mxu1 %v3555_v59 }
 0x20a   :  { %3557 = vmatprep.subr.bf16.mxu1 %v3635_v26 }
 0x20d   :  { %3559 = vmatpush1.bf16.msra.mxu1 %v3558_v11 }
 0x20e   :  { %3560 = vmatprep.subr.bf16.mxu1 %v3635_v26 }
 0x211   :  { %3562 = vmatpush1.bf16.msra.mxu1 %v3561_v34 }
 0x212   :  { %3563 = vmatprep.subr.bf16.mxu1 %v3635_v26 }
 0x215   :  { %3565 = vmatpush1.bf16.msra.mxu1 %v3564_v37 }
 0x216   :  { %3566 = vmatprep.subr.bf16.mxu1 %v3635_v26 }
 0x219   :  { %3568 = vmatpush1.bf16.msra.mxu1 %v3567_v40 }
 0x21a   :  { %3569 = vmatprep.subr.bf16.mxu1 %v3635_v26 }
 0x21d   :  { %3571 = vmatpush1.bf16.msra.mxu1 %v3570_v42 }
 0x21e   :  { %3572 = vmatprep.subr.bf16.mxu1 %v3635_v26 }
 0x221   :  { %3574 = vmatpush1.bf16.msra.mxu1 %v3573_v43 }
 0x222   :  { %3575 = vmatprep.subr.bf16.mxu1 %v3635_v26 }
 0x225   :  { %3577 = vmatpush1.bf16.msra.mxu1 %v3576_v4 }
 0x226   :  { %3578 = vmatprep.subr.bf16.mxu1 %v3635_v26 }
 0x229   :  { %3580 = vmatpush1.bf16.msra.mxu1 %v3579_v48 }
 0x22a   :  { %3581 = vmatprep.subr.bf16.mxu1 %v3635_v26 }
 0x22d   :  { %3583 = vmatpush1.bf16.msra.mxu1 %v3582_v53 }
 0x22e   :  { %3584 = vmatprep.subr.bf16.mxu1 %v3635_v26 }
 0x231   :  { %3586 = vmatpush1.bf16.msra.mxu1 %v3585_v57 }
 0x232   :  { %2448 = vmatprep.subr.mxu1 %v3636_v60 }
 0x235   :  { %2525 = vmatpush1.msk.msra.mxu1 %vm2396_vm0, %v2391_v58 }
 0x27e   :  { %v2505_v25 = vpop.xlane.xlu1 %2504 }
 0x27f   :  { %v2506_v17 = vrot.slane %v2505_v25, 4 }
 0x281   :  { %v2507_v18 = vadd.f32 %v2506_v17, %v2505_v25 }
 0x283   :  { %v2508_v52 = vrot.slane %v2507_v18, 2 }
 0x285   :  { %v2509_v19 = vadd.f32 %v2508_v52, %v2507_v18 }
 0x287   :  { %v2510_v20 = vrot.slane %v2509_v19, 1 }
 0x288   :  { %v2483_v23 = vpop.xlane.xlu0 %2482 }
 0x289   :  { %v2511_v45 = vadd.f32 %v2510_v20, %v2509_v19  ;;  %v2484_v24 = vadd.f32 1e-12, %v2483_v23 }
 0x28b   :  { %3617 = vpush %v2511_v45  ;;  %3630 = vrsqrt.f32 %v2484_v24 }
 0x295   :  { %v3631_v29 = vpop.eup %3630 }
 0x296   :  { %v2486_v59 = vmul.f32 %v3631_v29, %v2478_v61 }
 0x298   :  { %v2491_v21 = vrot.slane %v2486_v59, %v2490_v31 }
 0x2bc   :  { %s3618_s3 = spop %3617 }
 0x2bd   :  { %s2515_s4 = smul.f32 0.0078125, %s3618_s3 }
 0x2bf   :  { %s2516_s5 = smul.f32 0.8, %s2515_s4 }
 0x2c1   :  { %v2517_v37 = vstv %s2516_s5 }
 0x2d7   :  { %v1794_v1 = vpop.f32.mrb[0].mxu1 }
 0x2d8   :  { %v2362_v54 = vpop.f32.mrb[0].mxu0  ;;  %v1796_v30 = vpop.f32.mrb[1].mxu1 }
 0x2d9   :  { %v3587_v2 = vadd.f32 %v2362_v54, %v1794_v1  ;;  %v2364_v3 = vpop.f32.mrb[1].mxu0 }
 0x2da   :  { %v3588_v28 = vadd.f32 %v2364_v3, %v1796_v30 }
 0x2dc   :  { %2526 = vmatprep.mubr.msk.f32.mxu1 %vm2392_vm2, %v3588_v28 }
 0x2dd   :  { %2465 = vmatmul.mubr.f32.vlgmr.msra.gmra.mrb[2].mxu1 %v3587_v2 }
 0x3b0   :  { %v2466_v13 = vpop.f32.mrb[2].mxu1 }
 0x3b1   :  { %v2470_v14 = vmul.f32 %v2466_v13, %v2466_v13  ;;  %v2468_v15 = vpop.f32.mrb[3].mxu1 }
 0x3b3   :  { %v2472_v16 = vsel %vm2471_vm4, %v2470_v14, 0.0 }
 0x3b4   :  { %2473 = vadd.xlane.f32.xlu0 %v2472_v16 }
 0x441   :  { %v2474_v26 = vpop.xlane.xlu0 %2473 }
 0x442   :  { %v2475_v27 = vadd.f32 1e-12, %v2474_v26 }
 0x444   :  { %3632 = vrsqrt.f32 %v2475_v27 }
 0x44e   :  { %v3633_v32 = vpop.eup %3632 }
 0x44f   :  { %v2477_v11 = vmul.f32 %v3633_v32, %v2466_v13 }
 0x451   :  { %v2493_v6 = vmul.f32 %v2491_v21, %v2477_v11 }
 0x453   :  { %v2494_v34 = vsel %vm2471_vm4, %v2493_v6, 0.0 }
 0x454   :  { %2495 = vadd.xlane.f32.xlu1 %v2494_v34 }
 0x4e1   :  { %v2496_v35 = vpop.xlane.xlu1 %2495 }
 0x4e2   :  { %v2497_v36 = vsub.f32 1.0, %v2496_v35 }
 0x4e4   :  { %v2518_v38 = vadd.f32 %v2517_v37, %v2497_v36 }
 0x4e6   :  { %2520 = vst.msk [vmem:[%s7005_s6] sm:$0x3] %vm2519_vm5, %v2518_v38 }

</bundles_post_ra>
